<compile_context>
chip_gen: v6e
topology: v6e:2x2x1
jax: 0.10.0
libtpu: 0.0.40
codegen_flags: <defaults>
</compile_context>

<pallas_src>
import functools

import jax
import jax.numpy as jnp
from jax.experimental import pallas as pl
from jax.experimental.pallas import tpu as pltpu

_P = jax.lax.Precision.HIGHEST  # full-precision f32 MXU passes (matches the JAX reference)


# --------------------------------------------------------------------------
# Kernel: one grid step == one (batch block, time chunk); recurrence inside.
# --------------------------------------------------------------------------
def _critic_rnn_kernel(use_relu,
                       x_ref, h0_ref, w1_ref, b1_ref,
                       wg_ref, bg_ref, w2_ref, b2_ref,
                       values_ref, hout_ref, a_scr):
    tt, bb, d = x_ref.shape
    H = hout_ref.shape[1]

    # Seed the resident hidden-state block from the caller's hidden at chunk 0.
    @pl.when(pl.program_id(1) == 0)
    def _():
        hout_ref[...] = h0_ref[...]

    # fc1 + activation for the WHOLE chunk in one MXU pass (fc1 has no recurrent
    # dependence), instead of one tiny (bb x D) matmul per timestep.
    a_all = jnp.dot(x_ref[...].reshape(tt * bb, d), w1_ref[...],
                    preferred_element_type=jnp.float32, precision=_P) + b1_ref[...]
    a_all = jnp.maximum(a_all, 0.0) if use_relu else jnp.tanh(a_all)
    a_scr[...] = a_all.reshape(tt, bb, H)

    wg = wg_ref[...]      # (2H, 4H) = [[Wih_r Wih_z Wih_n 0], [Whh_r Whh_z 0 Whh_n]]
    bg = bg_ref[...]      # (1, 4H)  = [bih_r+bhh_r | bih_z+bhh_z | bih_n | bhh_n]
    w2 = w2_ref[...]      # (1, H)
    b2 = b2_ref[0, 0]     # scalar, SMEM

    def step(t, h):
        a = a_scr[t]                                                   # (bb, H)
        # Single fused MXU matmul per step: [a | h] @ wg  -> [r_pre|z_pre|gi_n|gh_n]
        g = jnp.dot(jnp.concatenate([a, h], axis=-1), wg,
                    preferred_element_type=jnp.float32, precision=_P) + bg
        r = jax.nn.sigmoid(g[:, 0:H])
        z = jax.nn.sigmoid(g[:, H:2 * H])
        n = jnp.tanh(g[:, 2 * H:3 * H] + r * g[:, 3 * H:4 * H])
        h_new = (1.0 - z) * n + z * h
        # fc2 (1-wide output): VPU multiply + lane reduce.  values block is
        # VMEM-resident; HBM writeback happens once per chunk, not per step.
        values_ref[t] = jnp.sum(h_new * w2, axis=-1, keepdims=True) + b2
        return h_new

    hout_ref[...] = jax.lax.fori_loop(
        0, tt, step, hout_ref[...], unroll=True if tt <= 32 else 8)


# --------------------------------------------------------------------------
# Wrappers
# --------------------------------------------------------------------------
def critic_rnn_forward_seq(x_seq, rnn_hidden, params, *, use_relu=False,
                           time_chunk=None, batch_block=None):
    """Fused T-step Critic_RNN forward.

    x_seq:      (T, B, D) per-step critic inputs
    rnn_hidden: (B, H)    hidden state entering step 0
    Returns (values (T, B, 1), final_hidden (B, H)).
    """
    T, B, D = x_seq.shape
    H = rnn_hidden.shape[1]
    tt = T if time_chunk is None else time_chunk       # time chunk per grid step
    bb = B if batch_block is None else batch_block     # batch block (v7x: split over 2 TCs)
    assert T % tt == 0 and B % bb == 0
    if bb < B:
        assert bb % 8 == 0, "batch blocks must be sublane-aligned (f32)"

    const = lambda bi, c: (0, 0)   # weights stay VMEM-resident across all steps
    grid_spec = pltpu.PrefetchScalarGridSpec(
        num_scalar_prefetch=0,
        grid=(B // bb, T // tt),
        in_specs=[
            pl.BlockSpec((tt, bb, D), lambda bi, c: (c, bi, 0)),     # x, per chunk
            pl.BlockSpec((bb, H), lambda bi, c: (bi, 0)),            # initial hidden
            pl.BlockSpec((D, H), const),                             # w1
            pl.BlockSpec((1, H), const),                             # b1
            pl.BlockSpec((2 * H, 4 * H), const),                     # fused GRU weights
            pl.BlockSpec((1, 4 * H), const),                         # fused GRU biases
            pl.BlockSpec((1, H), const),                             # w2 row
            pl.BlockSpec(memory_space=pltpu.MemorySpace.SMEM),       # b2 scalar
        ],
        out_specs=(
            pl.BlockSpec((tt, bb, 1), lambda bi, c: (c, bi, 0)),     # values per chunk
            pl.BlockSpec((bb, H), lambda bi, c: (bi, 0)),            # hidden (resident over c)
        ),
        scratch_shapes=[pltpu.VMEM((tt, bb, H), jnp.float32)],       # chunk fc1 activations
    )

    values, h_final = pl.pallas_call(
        functools.partial(_critic_rnn_kernel, use_relu),
        out_shape=(
            jax.ShapeDtypeStruct((T, B, 1), jnp.float32),
            jax.ShapeDtypeStruct((B, H), jnp.float32),
        ),
        grid_spec=grid_spec,
        input_output_aliases={1: 1},   # rnn_hidden buffer reused for final hidden
        compiler_params=pltpu.CompilerParams(
            dimension_semantics=("parallel", "arbitrary"),   # batch parallel, time serial
        ),
    )(x_seq, rnn_hidden,
      params["w1"], params["b1"], params["wg"], params["bg"],
      params["w2"], params["b2"])
    return values, h_final


def critic_rnn_forward(critic_input, rnn_hidden, params, *, use_relu=False):
    """Single-step forward matching Critic_RNN.forward: returns (value, new_hidden)."""
    values, h_new = critic_rnn_forward_seq(
        critic_input[None], rnn_hidden, params, use_relu=use_relu)
    return values[0], h_new


# --------------------------------------------------------------------------
# Parameter construction (orthogonal weights, as in orthogonal_init), packed
# for the kernel; an unpacked copy is kept for the independent reference.
# --------------------------------------------------------------------------
def _orthogonal(key, shape, gain=1.0):
    rows, cols = shape
    flat = jax.random.normal(key, (rows, cols), dtype=jnp.float32)
    if rows < cols:
        flat = flat.T
    q, r = jnp.linalg.qr(flat)
    d = jnp.sign(jnp.diag(r))          # sign correction, as torch orthogonal_ does
    q = q * d[None, :]
    if rows < cols:
        q = q.T
    return (gain * q[:rows, :cols]).astype(jnp.float32)


def make_params(key, critic_input_dim, rnn_hidden_dim, *, bias_scale=0.0):
    """bias_scale=0.0 reproduces orthogonal_init (zero biases); nonzero biases
    are used in the test so that bias packing/placement is actually exercised."""
    D, H = critic_input_dim, rnn_hidden_dim
    k1, k2, k3, k4, kb = jax.random.split(key, 5)

    w1_t = _orthogonal(k1, (H, D))        # torch fc1.weight (H, D)
    wih_t = _orthogonal(k2, (3 * H, H))   # torch rnn.weight_ih (3H, H), rows [r|z|n]
    whh_t = _orthogonal(k3, (3 * H, H))   # torch rnn.weight_hh (3H, H)
    w2_t = _orthogonal(k4, (1, H))        # torch fc2.weight (1, H)

    kb1, kb2, kb3, kb4 = jax.random.split(kb, 4)
    b1 = bias_scale * jax.random.normal(kb1, (H,), jnp.float32)
    bih = bias_scale * jax.random.normal(kb2, (3 * H,), jnp.float32)
    bhh = bias_scale * jax.random.normal(kb3, (3 * H,), jnp.float32)
    b2 = bias_scale * jax.random.normal(kb4, (), jnp.float32)

    wih, whh = wih_t.T, whh_t.T           # (H, 3H), columns [r | z | n]
    zeros = jnp.zeros((H, H), jnp.float32)
    wg = jnp.concatenate([
        jnp.concatenate([wih[:, :H], wih[:, H:2 * H], wih[:, 2 * H:], zeros], axis=1),
        jnp.concatenate([whh[:, :H], whh[:, H:2 * H], zeros, whh[:, 2 * H:]], axis=1),
    ], axis=0)                                                       # (2H, 4H)
    bg = jnp.concatenate([bih[:H] + bhh[:H], bih[H:2 * H] + bhh[H:2 * H],
                          bih[2 * H:], bhh[2 * H:]])[None, :]        # (1, 4H)

    kernel_params = {
        "w1": w1_t.T,                              # (D, H)
        "b1": b1[None, :],                         # (1, H)
        "wg": wg,                                  # (2H, 4H) fused GRU weights
        "bg": bg,                                  # (1, 4H) fused GRU biases
        "w2": w2_t,                                # (1, H) row for VPU reduction
        "b2": jnp.reshape(b2, (1, 1)),             # scalar, lives in SMEM
    }
    ref_params = {
        "w1": w1_t.T, "b1": b1[None, :],
        "wih": wih, "bih": bih[None, :],
        "whh": whh, "bhh": bhh[None, :],
        "w2": w2_t, "b2": jnp.reshape(b2, (1, 1)),
    }
    return kernel_params, ref_params


# --------------------------------------------------------------------------
# Pure-JAX reference (un-fused formulation -> independent check of the packing).
# --------------------------------------------------------------------------
def _reference_forward(x_seq, h0, p, use_relu):
    H = h0.shape[1]

    def step(h, x):
        a = jnp.dot(x, p["w1"], precision=_P) + p["b1"]
        a = jnp.maximum(a, 0.0) if use_relu else jnp.tanh(a)
        gi = jnp.dot(a, p["wih"], precision=_P) + p["bih"]
        gh = jnp.dot(h, p["whh"], precision=_P) + p["bhh"]
        r = jax.nn.sigmoid(gi[:, :H] + gh[:, :H])
        z = jax.nn.sigmoid(gi[:, H:2 * H] + gh[:, H:2 * H])
        n = jnp.tanh(gi[:, 2 * H:] + r * gh[:, 2 * H:])
        h_new = (1.0 - z) * n + z * h
        v = jnp.dot(h_new, p["w2"].T, precision=_P) + p["b2"]
        return h_new, (v, h_new)

    h_final, (values, hiddens) = jax.lax.scan(step, h0, x_seq)
    return values, hiddens, h_final


# --------------------------------------------------------------------------
if __name__ == "__main__":
    T = 8                   # rollout length (one time chunk -> single grid step)
    B = 8                   # batch (agents * envs); pad to a multiple of 8 when scaling
    critic_input_dim = 16
    rnn_hidden_dim = 32
    use_relu = False        # args.use_relu = 0 -> Tanh

    key = jax.random.PRNGKey(0)
    k_x, k_p = jax.random.split(key)

    x_seq = jax.random.normal(k_x, (T, B, critic_input_dim), dtype=jnp.float32)
    # self.rnn_hidden starts as None -> GRUCell uses zeros for the first step.
    rnn_hidden = jnp.zeros((B, rnn_hidden_dim), dtype=jnp.float32)
    # Nonzero biases so the bias packing is actually verified (orthogonal_init
    # would zero them, which cannot distinguish a mis-placed bias from a correct one).
    kparams, rparams = make_params(k_p, critic_input_dim, rnn_hidden_dim, bias_scale=0.1)

    # Multi-step fused kernel (time loop inside the kernel).
    values, h_final = critic_rnn_forward_seq(x_seq, rnn_hidden, kparams, use_relu=use_relu)
    jax.block_until_ready((values, h_final))

    # Single-step API matching the PyTorch module's forward().
    v0, h0_new = critic_rnn_forward(x_seq[0], rnn_hidden, kparams, use_relu=use_relu)
    jax.block_until_ready((v0, h0_new))

    # Correctness check against a pure-JAX reference (tight f32 tolerance).
    ref_vals, ref_hiddens, ref_h = _reference_forward(x_seq, rnn_hidden, rparams, use_relu)
    tol = 1e-4
    assert values.shape == (T, B, 1)
    assert h_final.shape == (B, rnn_hidden_dim)
    assert float(jnp.max(jnp.abs(values - ref_vals))) < tol
    assert float(jnp.max(jnp.abs(h_final - ref_h))) < tol
    assert float(jnp.max(jnp.abs(v0 - ref_vals[0]))) < tol
    assert float(jnp.max(jnp.abs(h0_new - ref_hiddens[0]))) < tol
    print("KERNEL_OK")
</pallas_src>

<mosaic_0001>
module attributes {stable_mosaic.version = 11 : i64} {
  func.func @_critic_rnn_kernel(%arg0: i32, %arg1: i32, %arg2: memref<8x8x16xf32, #tpu.memory_space<vmem>>, %arg3: memref<8x32xf32, #tpu.memory_space<vmem>>, %arg4: memref<16x32xf32, #tpu.memory_space<vmem>>, %arg5: memref<1x32xf32, #tpu.memory_space<vmem>>, %arg6: memref<64x128xf32, #tpu.memory_space<vmem>>, %arg7: memref<1x128xf32, #tpu.memory_space<vmem>>, %arg8: memref<1x32xf32, #tpu.memory_space<vmem>>, %arg9: memref<1x1xf32, #tpu.memory_space<smem>>, %arg10: memref<8x8x1xf32, #tpu.memory_space<vmem>>, %arg11: memref<8x32xf32, #tpu.memory_space<vmem>>, %arg12: memref<8x8x32xf32, #tpu.memory_space<vmem>>) attributes {dimension_semantics = [#tpu.dimension_semantics<parallel>, #tpu.dimension_semantics<arbitrary>], iteration_bounds = array<i64: 1, 1>, scalar_prefetch = 0 : i64, scratch_operands = 1 : i64, tpu.core_type = #tpu.core_type<tc>, window_params = [{transform_indices = @transform_0, window_bounds = array<i64: 8, 8, 16>}, {transform_indices = @transform_1, window_bounds = array<i64: 8, 32>}, {pipeline_mode = #tpu.pipeline_mode<synchronous>, transform_indices = @transform_2, window_bounds = array<i64: 16, 32>}, {pipeline_mode = #tpu.pipeline_mode<synchronous>, transform_indices = @transform_3, window_bounds = array<i64: 1, 32>}, {pipeline_mode = #tpu.pipeline_mode<synchronous>, transform_indices = @transform_4, window_bounds = array<i64: 64, 128>}, {pipeline_mode = #tpu.pipeline_mode<synchronous>, transform_indices = @transform_5, window_bounds = array<i64: 1, 128>}, {pipeline_mode = #tpu.pipeline_mode<synchronous>, transform_indices = @transform_6, window_bounds = array<i64: 1, 32>}, {transform_indices = @transform_7, window_bounds = array<i64: 1, 1>}, {transform_indices = @transform_8, window_bounds = array<i64: 8, 8, 1>}, {transform_indices = @transform_9, window_bounds = array<i64: 8, 32>}]} {
    %c0_i32 = arith.constant 0 : i32
    %0 = arith.cmpi eq, %arg1, %c0_i32 : i32
    %1 = arith.extui %0 : i1 to i32
    %c0_i32_0 = arith.constant 0 : i32
    %2 = arith.cmpi ne, %1, %c0_i32_0 : i32
    scf.if %2 {
      %c0_95 = arith.constant 0 : index
      %c0_96 = arith.constant 0 : index
      %331 = vector.load %arg3[%c0_95, %c0_96] : memref<8x32xf32, #tpu.memory_space<vmem>>, vector<8x32xf32>
      %c0_97 = arith.constant 0 : index
      %c0_98 = arith.constant 0 : index
      %332 = vector.load %arg11[%c0_97, %c0_98] : memref<8x32xf32, #tpu.memory_space<vmem>>, vector<8x32xf32>
      tpu.vector_store %arg11[%c0_97, %c0_98], %331 {strides = array<i32>} : memref<8x32xf32, #tpu.memory_space<vmem>>, vector<8x32xf32>,
    } else {
    }
    %c0 = arith.constant 0 : index
    %c0_1 = arith.constant 0 : index
    %c0_2 = arith.constant 0 : index
    %3 = vector.load %arg2[%c0, %c0_1, %c0_2] : memref<8x8x16xf32, #tpu.memory_space<vmem>>, vector<8x8x16xf32>
    %4 = vector.shape_cast %3 : vector<8x8x16xf32> to vector<64x16xf32>
    %c0_3 = arith.constant 0 : index
    %c0_4 = arith.constant 0 : index
    %5 = vector.load %arg4[%c0_3, %c0_4] : memref<16x32xf32, #tpu.memory_space<vmem>>, vector<16x32xf32>
    %cst = arith.constant dense<0.000000e+00> : vector<64x32xf32>
    %6 = tpu.matmul %4, %5, %cst {dimension_numbers = #tpu.dot_dimension_numbers<[1], [0], [0], [1], [0, 0, 1, 1], [], []>, precision = #tpu.contract_precision<fp32>} : vector<64x16xf32>, vector<16x32xf32>, vector<64x32xf32> -> vector<64x32xf32>
    %c0_5 = arith.constant 0 : index
    %c0_6 = arith.constant 0 : index
    %7 = vector.load %arg5[%c0_5, %c0_6] : memref<1x32xf32, #tpu.memory_space<vmem>>, vector<1x32xf32>
    %8 = vector.broadcast %7 : vector<1x32xf32> to vector<64x32xf32>
    %9 = arith.addf %6, %8 : vector<64x32xf32>
    %10 = math.tanh %9 : vector<64x32xf32>
    %11 = vector.shape_cast %10 : vector<64x32xf32> to vector<8x8x32xf32>
    %c0_7 = arith.constant 0 : index
    %c0_8 = arith.constant 0 : index
    %c0_9 = arith.constant 0 : index
    %12 = vector.load %arg12[%c0_7, %c0_8, %c0_9] : memref<8x8x32xf32, #tpu.memory_space<vmem>>, vector<8x8x32xf32>
    tpu.vector_store %arg12[%c0_7, %c0_8, %c0_9], %11 {strides = array<i32>} : memref<8x8x32xf32, #tpu.memory_space<vmem>>, vector<8x8x32xf32>,
    %c0_10 = arith.constant 0 : index
    %c0_11 = arith.constant 0 : index
    %13 = vector.load %arg6[%c0_10, %c0_11] : memref<64x128xf32, #tpu.memory_space<vmem>>, vector<64x128xf32>
    %c0_12 = arith.constant 0 : index
    %c0_13 = arith.constant 0 : index
    %14 = vector.load %arg7[%c0_12, %c0_13] : memref<1x128xf32, #tpu.memory_space<vmem>>, vector<1x128xf32>
    %c0_14 = arith.constant 0 : index
    %c0_15 = arith.constant 0 : index
    %15 = vector.load %arg8[%c0_14, %c0_15] : memref<1x32xf32, #tpu.memory_space<vmem>>, vector<1x32xf32>
    %c0_16 = arith.constant 0 : index
    %c0_17 = arith.constant 0 : index
    %16 = memref.load %arg9[%c0_16, %c0_17] : memref<1x1xf32, #tpu.memory_space<smem>>
    %c0_18 = arith.constant 0 : index
    %c0_19 = arith.constant 0 : index
    %17 = vector.load %arg11[%c0_18, %c0_19] : memref<8x32xf32, #tpu.memory_space<vmem>>, vector<8x32xf32>
    %c0_i32_20 = arith.constant 0 : i32
    %18 = arith.index_cast %c0_i32_20 : i32 to index
    %c0_21 = arith.constant 0 : index
    %c0_22 = arith.constant 0 : index
    %19 = vector.load %arg12[%18, %c0_21, %c0_22] : memref<8x8x32xf32, #tpu.memory_space<vmem>>, vector<1x8x32xf32>
    %20 = vector.shape_cast %19 : vector<1x8x32xf32> to vector<8x32xf32>
    %21 = tpu.concatenate %20, %17 in 1 : vector<8x32xf32>, vector<8x32xf32> -> vector<8x64xf32>
    %cst_23 = arith.constant dense<0.000000e+00> : vector<8x128xf32>
    %22 = tpu.matmul %21, %13, %cst_23 {dimension_numbers = #tpu.dot_dimension_numbers<[1], [0], [0], [1], [0, 0, 1, 1], [], []>, precision = #tpu.contract_precision<fp32>} : vector<8x64xf32>, vector<64x128xf32>, vector<8x128xf32> -> vector<8x128xf32>
    %23 = vector.broadcast %14 : vector<1x128xf32> to vector<8x128xf32>
    %24 = arith.addf %22, %23 : vector<8x128xf32>
    %25 = vector.extract_strided_slice %24 {offsets = [0, 0], sizes = [8, 32], strides = [1, 1]} : vector<8x128xf32> to vector<8x32xf32>
    %26 = arith.negf %25 : vector<8x32xf32>
    %27 = math.exp %26 : vector<8x32xf32>
    %cst_24 = arith.constant 1.000000e+00 : f32
    %28 = vector.broadcast %cst_24 : f32 to vector<8x32xf32>
    %29 = arith.addf %28, %27 : vector<8x32xf32>
    %30 = arith.divf %28, %29 : vector<8x32xf32>
    %31 = vector.extract_strided_slice %24 {offsets = [0, 32], sizes = [8, 32], strides = [1, 1]} : vector<8x128xf32> to vector<8x32xf32>
    %32 = arith.negf %31 : vector<8x32xf32>
    %33 = math.exp %32 : vector<8x32xf32>
    %cst_25 = arith.constant 1.000000e+00 : f32
    %34 = vector.broadcast %cst_25 : f32 to vector<8x32xf32>
    %35 = arith.addf %34, %33 : vector<8x32xf32>
    %36 = arith.divf %34, %35 : vector<8x32xf32>
    %37 = vector.extract_strided_slice %24 {offsets = [0, 64], sizes = [8, 32], strides = [1, 1]} : vector<8x128xf32> to vector<8x32xf32>
    %38 = vector.extract_strided_slice %24 {offsets = [0, 96], sizes = [8, 32], strides = [1, 1]} : vector<8x128xf32> to vector<8x32xf32>
    %39 = arith.mulf %30, %38 : vector<8x32xf32>
    %40 = arith.addf %37, %39 : vector<8x32xf32>
    %41 = math.tanh %40 : vector<8x32xf32>
    %cst_26 = arith.constant 1.000000e+00 : f32
    %42 = vector.broadcast %cst_26 : f32 to vector<8x32xf32>
    %43 = arith.subf %42, %36 : vector<8x32xf32>
    %44 = arith.mulf %43, %41 : vector<8x32xf32>
    %45 = arith.mulf %36, %17 : vector<8x32xf32>
    %46 = arith.addf %44, %45 : vector<8x32xf32>
    %47 = vector.broadcast %15 : vector<1x32xf32> to vector<8x32xf32>
    %48 = arith.mulf %46, %47 : vector<8x32xf32>
    %cst_27 = arith.constant dense<0.000000e+00> : vector<8xf32>
    %49 = vector.multi_reduction <add>, %48, %cst_27 [1] : vector<8x32xf32> to vector<8xf32>
    %50 = vector.shape_cast %49 : vector<8xf32> to vector<8x1xf32>
    %51 = vector.broadcast %16 : f32 to vector<8x1xf32>
    %52 = arith.addf %50, %51 : vector<8x1xf32>
    %53 = arith.index_cast %c0_i32_20 : i32 to index
    %c0_28 = arith.constant 0 : index
    %c0_29 = arith.constant 0 : index
    %54 = vector.load %arg10[%53, %c0_28, %c0_29] : memref<8x8x1xf32, #tpu.memory_space<vmem>>, vector<1x8x1xf32>
    %55 = vector.shape_cast %54 : vector<1x8x1xf32> to vector<8x1xf32>
    %56 = vector.shape_cast %52 : vector<8x1xf32> to vector<1x8x1xf32>
    tpu.vector_store %arg10[%53, %c0_28, %c0_29], %56 {strides = array<i32>} : memref<8x8x1xf32, #tpu.memory_space<vmem>>, vector<1x8x1xf32>,
    %c1_i32 = arith.constant 1 : i32
    %57 = arith.index_cast %c1_i32 : i32 to index
    %c0_30 = arith.constant 0 : index
    %c0_31 = arith.constant 0 : index
    %58 = vector.load %arg12[%57, %c0_30, %c0_31] : memref<8x8x32xf32, #tpu.memory_space<vmem>>, vector<1x8x32xf32>
    %59 = vector.shape_cast %58 : vector<1x8x32xf32> to vector<8x32xf32>
    %60 = tpu.concatenate %59, %46 in 1 : vector<8x32xf32>, vector<8x32xf32> -> vector<8x64xf32>
    %cst_32 = arith.constant dense<0.000000e+00> : vector<8x128xf32>
    %61 = tpu.matmul %60, %13, %cst_32 {dimension_numbers = #tpu.dot_dimension_numbers<[1], [0], [0], [1], [0, 0, 1, 1], [], []>, precision = #tpu.contract_precision<fp32>} : vector<8x64xf32>, vector<64x128xf32>, vector<8x128xf32> -> vector<8x128xf32>
    %62 = vector.broadcast %14 : vector<1x128xf32> to vector<8x128xf32>
    %63 = arith.addf %61, %62 : vector<8x128xf32>
    %64 = vector.extract_strided_slice %63 {offsets = [0, 0], sizes = [8, 32], strides = [1, 1]} : vector<8x128xf32> to vector<8x32xf32>
    %65 = arith.negf %64 : vector<8x32xf32>
    %66 = math.exp %65 : vector<8x32xf32>
    %cst_33 = arith.constant 1.000000e+00 : f32
    %67 = vector.broadcast %cst_33 : f32 to vector<8x32xf32>
    %68 = arith.addf %67, %66 : vector<8x32xf32>
    %69 = arith.divf %67, %68 : vector<8x32xf32>
    %70 = vector.extract_strided_slice %63 {offsets = [0, 32], sizes = [8, 32], strides = [1, 1]} : vector<8x128xf32> to vector<8x32xf32>
    %71 = arith.negf %70 : vector<8x32xf32>
    %72 = math.exp %71 : vector<8x32xf32>
    %cst_34 = arith.constant 1.000000e+00 : f32
    %73 = vector.broadcast %cst_34 : f32 to vector<8x32xf32>
    %74 = arith.addf %73, %72 : vector<8x32xf32>
    %75 = arith.divf %73, %74 : vector<8x32xf32>
    %76 = vector.extract_strided_slice %63 {offsets = [0, 64], sizes = [8, 32], strides = [1, 1]} : vector<8x128xf32> to vector<8x32xf32>
    %77 = vector.extract_strided_slice %63 {offsets = [0, 96], sizes = [8, 32], strides = [1, 1]} : vector<8x128xf32> to vector<8x32xf32>
    %78 = arith.mulf %69, %77 : vector<8x32xf32>
    %79 = arith.addf %76, %78 : vector<8x32xf32>
    %80 = math.tanh %79 : vector<8x32xf32>
    %cst_35 = arith.constant 1.000000e+00 : f32
    %81 = vector.broadcast %cst_35 : f32 to vector<8x32xf32>
    %82 = arith.subf %81, %75 : vector<8x32xf32>
    %83 = arith.mulf %82, %80 : vector<8x32xf32>
    %84 = arith.mulf %75, %46 : vector<8x32xf32>
    %85 = arith.addf %83, %84 : vector<8x32xf32>
    %86 = vector.broadcast %15 : vector<1x32xf32> to vector<8x32xf32>
    %87 = arith.mulf %85, %86 : vector<8x32xf32>
    %cst_36 = arith.constant dense<0.000000e+00> : vector<8xf32>
    %88 = vector.multi_reduction <add>, %87, %cst_36 [1] : vector<8x32xf32> to vector<8xf32>
    %89 = vector.shape_cast %88 : vector<8xf32> to vector<8x1xf32>
    %90 = vector.broadcast %16 : f32 to vector<8x1xf32>
    %91 = arith.addf %89, %90 : vector<8x1xf32>
    %92 = arith.index_cast %c1_i32 : i32 to index
    %c0_37 = arith.constant 0 : index
    %c0_38 = arith.constant 0 : index
    %93 = vector.load %arg10[%92, %c0_37, %c0_38] : memref<8x8x1xf32, #tpu.memory_space<vmem>>, vector<1x8x1xf32>
    %94 = vector.shape_cast %93 : vector<1x8x1xf32> to vector<8x1xf32>
    %95 = vector.shape_cast %91 : vector<8x1xf32> to vector<1x8x1xf32>
    tpu.vector_store %arg10[%92, %c0_37, %c0_38], %95 {strides = array<i32>} : memref<8x8x1xf32, #tpu.memory_space<vmem>>, vector<1x8x1xf32>,
    %c2_i32 = arith.constant 2 : i32
    %96 = arith.index_cast %c2_i32 : i32 to index
    %c0_39 = arith.constant 0 : index
    %c0_40 = arith.constant 0 : index
    %97 = vector.load %arg12[%96, %c0_39, %c0_40] : memref<8x8x32xf32, #tpu.memory_space<vmem>>, vector<1x8x32xf32>
    %98 = vector.shape_cast %97 : vector<1x8x32xf32> to vector<8x32xf32>
    %99 = tpu.concatenate %98, %85 in 1 : vector<8x32xf32>, vector<8x32xf32> -> vector<8x64xf32>
    %cst_41 = arith.constant dense<0.000000e+00> : vector<8x128xf32>
    %100 = tpu.matmul %99, %13, %cst_41 {dimension_numbers = #tpu.dot_dimension_numbers<[1], [0], [0], [1], [0, 0, 1, 1], [], []>, precision = #tpu.contract_precision<fp32>} : vector<8x64xf32>, vector<64x128xf32>, vector<8x128xf32> -> vector<8x128xf32>
    %101 = vector.broadcast %14 : vector<1x128xf32> to vector<8x128xf32>
    %102 = arith.addf %100, %101 : vector<8x128xf32>
    %103 = vector.extract_strided_slice %102 {offsets = [0, 0], sizes = [8, 32], strides = [1, 1]} : vector<8x128xf32> to vector<8x32xf32>
    %104 = arith.negf %103 : vector<8x32xf32>
    %105 = math.exp %104 : vector<8x32xf32>
    %cst_42 = arith.constant 1.000000e+00 : f32
    %106 = vector.broadcast %cst_42 : f32 to vector<8x32xf32>
    %107 = arith.addf %106, %105 : vector<8x32xf32>
    %108 = arith.divf %106, %107 : vector<8x32xf32>
    %109 = vector.extract_strided_slice %102 {offsets = [0, 32], sizes = [8, 32], strides = [1, 1]} : vector<8x128xf32> to vector<8x32xf32>
    %110 = arith.negf %109 : vector<8x32xf32>
    %111 = math.exp %110 : vector<8x32xf32>
    %cst_43 = arith.constant 1.000000e+00 : f32
    %112 = vector.broadcast %cst_43 : f32 to vector<8x32xf32>
    %113 = arith.addf %112, %111 : vector<8x32xf32>
    %114 = arith.divf %112, %113 : vector<8x32xf32>
    %115 = vector.extract_strided_slice %102 {offsets = [0, 64], sizes = [8, 32], strides = [1, 1]} : vector<8x128xf32> to vector<8x32xf32>
    %116 = vector.extract_strided_slice %102 {offsets = [0, 96], sizes = [8, 32], strides = [1, 1]} : vector<8x128xf32> to vector<8x32xf32>
    %117 = arith.mulf %108, %116 : vector<8x32xf32>
    %118 = arith.addf %115, %117 : vector<8x32xf32>
    %119 = math.tanh %118 : vector<8x32xf32>
    %cst_44 = arith.constant 1.000000e+00 : f32
    %120 = vector.broadcast %cst_44 : f32 to vector<8x32xf32>
    %121 = arith.subf %120, %114 : vector<8x32xf32>
    %122 = arith.mulf %121, %119 : vector<8x32xf32>
    %123 = arith.mulf %114, %85 : vector<8x32xf32>
    %124 = arith.addf %122, %123 : vector<8x32xf32>
    %125 = vector.broadcast %15 : vector<1x32xf32> to vector<8x32xf32>
    %126 = arith.mulf %124, %125 : vector<8x32xf32>
    %cst_45 = arith.constant dense<0.000000e+00> : vector<8xf32>
    %127 = vector.multi_reduction <add>, %126, %cst_45 [1] : vector<8x32xf32> to vector<8xf32>
    %128 = vector.shape_cast %127 : vector<8xf32> to vector<8x1xf32>
    %129 = vector.broadcast %16 : f32 to vector<8x1xf32>
    %130 = arith.addf %128, %129 : vector<8x1xf32>
    %131 = arith.index_cast %c2_i32 : i32 to index
    %c0_46 = arith.constant 0 : index
    %c0_47 = arith.constant 0 : index
    %132 = vector.load %arg10[%131, %c0_46, %c0_47] : memref<8x8x1xf32, #tpu.memory_space<vmem>>, vector<1x8x1xf32>
    %133 = vector.shape_cast %132 : vector<1x8x1xf32> to vector<8x1xf32>
    %134 = vector.shape_cast %130 : vector<8x1xf32> to vector<1x8x1xf32>
    tpu.vector_store %arg10[%131, %c0_46, %c0_47], %134 {strides = array<i32>} : memref<8x8x1xf32, #tpu.memory_space<vmem>>, vector<1x8x1xf32>,
    %c3_i32 = arith.constant 3 : i32
    %135 = arith.index_cast %c3_i32 : i32 to index
    %c0_48 = arith.constant 0 : index
    %c0_49 = arith.constant 0 : index
    %136 = vector.load %arg12[%135, %c0_48, %c0_49] : memref<8x8x32xf32, #tpu.memory_space<vmem>>, vector<1x8x32xf32>
    %137 = vector.shape_cast %136 : vector<1x8x32xf32> to vector<8x32xf32>
    %138 = tpu.concatenate %137, %124 in 1 : vector<8x32xf32>, vector<8x32xf32> -> vector<8x64xf32>
    %cst_50 = arith.constant dense<0.000000e+00> : vector<8x128xf32>
    %139 = tpu.matmul %138, %13, %cst_50 {dimension_numbers = #tpu.dot_dimension_numbers<[1], [0], [0], [1], [0, 0, 1, 1], [], []>, precision = #tpu.contract_precision<fp32>} : vector<8x64xf32>, vector<64x128xf32>, vector<8x128xf32> -> vector<8x128xf32>
    %140 = vector.broadcast %14 : vector<1x128xf32> to vector<8x128xf32>
    %141 = arith.addf %139, %140 : vector<8x128xf32>
    %142 = vector.extract_strided_slice %141 {offsets = [0, 0], sizes = [8, 32], strides = [1, 1]} : vector<8x128xf32> to vector<8x32xf32>
    %143 = arith.negf %142 : vector<8x32xf32>
    %144 = math.exp %143 : vector<8x32xf32>
    %cst_51 = arith.constant 1.000000e+00 : f32
    %145 = vector.broadcast %cst_51 : f32 to vector<8x32xf32>
    %146 = arith.addf %145, %144 : vector<8x32xf32>
    %147 = arith.divf %145, %146 : vector<8x32xf32>
    %148 = vector.extract_strided_slice %141 {offsets = [0, 32], sizes = [8, 32], strides = [1, 1]} : vector<8x128xf32> to vector<8x32xf32>
    %149 = arith.negf %148 : vector<8x32xf32>
    %150 = math.exp %149 : vector<8x32xf32>
    %cst_52 = arith.constant 1.000000e+00 : f32
    %151 = vector.broadcast %cst_52 : f32 to vector<8x32xf32>
    %152 = arith.addf %151, %150 : vector<8x32xf32>
    %153 = arith.divf %151, %152 : vector<8x32xf32>
    %154 = vector.extract_strided_slice %141 {offsets = [0, 64], sizes = [8, 32], strides = [1, 1]} : vector<8x128xf32> to vector<8x32xf32>
    %155 = vector.extract_strided_slice %141 {offsets = [0, 96], sizes = [8, 32], strides = [1, 1]} : vector<8x128xf32> to vector<8x32xf32>
    %156 = arith.mulf %147, %155 : vector<8x32xf32>
    %157 = arith.addf %154, %156 : vector<8x32xf32>
    %158 = math.tanh %157 : vector<8x32xf32>
    %cst_53 = arith.constant 1.000000e+00 : f32
    %159 = vector.broadcast %cst_53 : f32 to vector<8x32xf32>
    %160 = arith.subf %159, %153 : vector<8x32xf32>
    %161 = arith.mulf %160, %158 : vector<8x32xf32>
    %162 = arith.mulf %153, %124 : vector<8x32xf32>
    %163 = arith.addf %161, %162 : vector<8x32xf32>
    %164 = vector.broadcast %15 : vector<1x32xf32> to vector<8x32xf32>
    %165 = arith.mulf %163, %164 : vector<8x32xf32>
    %cst_54 = arith.constant dense<0.000000e+00> : vector<8xf32>
    %166 = vector.multi_reduction <add>, %165, %cst_54 [1] : vector<8x32xf32> to vector<8xf32>
    %167 = vector.shape_cast %166 : vector<8xf32> to vector<8x1xf32>
    %168 = vector.broadcast %16 : f32 to vector<8x1xf32>
    %169 = arith.addf %167, %168 : vector<8x1xf32>
    %170 = arith.index_cast %c3_i32 : i32 to index
    %c0_55 = arith.constant 0 : index
    %c0_56 = arith.constant 0 : index
    %171 = vector.load %arg10[%170, %c0_55, %c0_56] : memref<8x8x1xf32, #tpu.memory_space<vmem>>, vector<1x8x1xf32>
    %172 = vector.shape_cast %171 : vector<1x8x1xf32> to vector<8x1xf32>
    %173 = vector.shape_cast %169 : vector<8x1xf32> to vector<1x8x1xf32>
    tpu.vector_store %arg10[%170, %c0_55, %c0_56], %173 {strides = array<i32>} : memref<8x8x1xf32, #tpu.memory_space<vmem>>, vector<1x8x1xf32>,
    %c4_i32 = arith.constant 4 : i32
    %174 = arith.index_cast %c4_i32 : i32 to index
    %c0_57 = arith.constant 0 : index
    %c0_58 = arith.constant 0 : index
    %175 = vector.load %arg12[%174, %c0_57, %c0_58] : memref<8x8x32xf32, #tpu.memory_space<vmem>>, vector<1x8x32xf32>
    %176 = vector.shape_cast %175 : vector<1x8x32xf32> to vector<8x32xf32>
    %177 = tpu.concatenate %176, %163 in 1 : vector<8x32xf32>, vector<8x32xf32> -> vector<8x64xf32>
    %cst_59 = arith.constant dense<0.000000e+00> : vector<8x128xf32>
    %178 = tpu.matmul %177, %13, %cst_59 {dimension_numbers = #tpu.dot_dimension_numbers<[1], [0], [0], [1], [0, 0, 1, 1], [], []>, precision = #tpu.contract_precision<fp32>} : vector<8x64xf32>, vector<64x128xf32>, vector<8x128xf32> -> vector<8x128xf32>
    %179 = vector.broadcast %14 : vector<1x128xf32> to vector<8x128xf32>
    %180 = arith.addf %178, %179 : vector<8x128xf32>
    %181 = vector.extract_strided_slice %180 {offsets = [0, 0], sizes = [8, 32], strides = [1, 1]} : vector<8x128xf32> to vector<8x32xf32>
    %182 = arith.negf %181 : vector<8x32xf32>
    %183 = math.exp %182 : vector<8x32xf32>
    %cst_60 = arith.constant 1.000000e+00 : f32
    %184 = vector.broadcast %cst_60 : f32 to vector<8x32xf32>
    %185 = arith.addf %184, %183 : vector<8x32xf32>
    %186 = arith.divf %184, %185 : vector<8x32xf32>
    %187 = vector.extract_strided_slice %180 {offsets = [0, 32], sizes = [8, 32], strides = [1, 1]} : vector<8x128xf32> to vector<8x32xf32>
    %188 = arith.negf %187 : vector<8x32xf32>
    %189 = math.exp %188 : vector<8x32xf32>
    %cst_61 = arith.constant 1.000000e+00 : f32
    %190 = vector.broadcast %cst_61 : f32 to vector<8x32xf32>
    %191 = arith.addf %190, %189 : vector<8x32xf32>
    %192 = arith.divf %190, %191 : vector<8x32xf32>
    %193 = vector.extract_strided_slice %180 {offsets = [0, 64], sizes = [8, 32], strides = [1, 1]} : vector<8x128xf32> to vector<8x32xf32>
    %194 = vector.extract_strided_slice %180 {offsets = [0, 96], sizes = [8, 32], strides = [1, 1]} : vector<8x128xf32> to vector<8x32xf32>
    %195 = arith.mulf %186, %194 : vector<8x32xf32>
    %196 = arith.addf %193, %195 : vector<8x32xf32>
    %197 = math.tanh %196 : vector<8x32xf32>
    %cst_62 = arith.constant 1.000000e+00 : f32
    %198 = vector.broadcast %cst_62 : f32 to vector<8x32xf32>
    %199 = arith.subf %198, %192 : vector<8x32xf32>
    %200 = arith.mulf %199, %197 : vector<8x32xf32>
    %201 = arith.mulf %192, %163 : vector<8x32xf32>
    %202 = arith.addf %200, %201 : vector<8x32xf32>
    %203 = vector.broadcast %15 : vector<1x32xf32> to vector<8x32xf32>
    %204 = arith.mulf %202, %203 : vector<8x32xf32>
    %cst_63 = arith.constant dense<0.000000e+00> : vector<8xf32>
    %205 = vector.multi_reduction <add>, %204, %cst_63 [1] : vector<8x32xf32> to vector<8xf32>
    %206 = vector.shape_cast %205 : vector<8xf32> to vector<8x1xf32>
    %207 = vector.broadcast %16 : f32 to vector<8x1xf32>
    %208 = arith.addf %206, %207 : vector<8x1xf32>
    %209 = arith.index_cast %c4_i32 : i32 to index
    %c0_64 = arith.constant 0 : index
    %c0_65 = arith.constant 0 : index
    %210 = vector.load %arg10[%209, %c0_64, %c0_65] : memref<8x8x1xf32, #tpu.memory_space<vmem>>, vector<1x8x1xf32>
    %211 = vector.shape_cast %210 : vector<1x8x1xf32> to vector<8x1xf32>
    %212 = vector.shape_cast %208 : vector<8x1xf32> to vector<1x8x1xf32>
    tpu.vector_store %arg10[%209, %c0_64, %c0_65], %212 {strides = array<i32>} : memref<8x8x1xf32, #tpu.memory_space<vmem>>, vector<1x8x1xf32>,
    %c5_i32 = arith.constant 5 : i32
    %213 = arith.index_cast %c5_i32 : i32 to index
    %c0_66 = arith.constant 0 : index
    %c0_67 = arith.constant 0 : index
    %214 = vector.load %arg12[%213, %c0_66, %c0_67] : memref<8x8x32xf32, #tpu.memory_space<vmem>>, vector<1x8x32xf32>
    %215 = vector.shape_cast %214 : vector<1x8x32xf32> to vector<8x32xf32>
    %216 = tpu.concatenate %215, %202 in 1 : vector<8x32xf32>, vector<8x32xf32> -> vector<8x64xf32>
    %cst_68 = arith.constant dense<0.000000e+00> : vector<8x128xf32>
    %217 = tpu.matmul %216, %13, %cst_68 {dimension_numbers = #tpu.dot_dimension_numbers<[1], [0], [0], [1], [0, 0, 1, 1], [], []>, precision = #tpu.contract_precision<fp32>} : vector<8x64xf32>, vector<64x128xf32>, vector<8x128xf32> -> vector<8x128xf32>
    %218 = vector.broadcast %14 : vector<1x128xf32> to vector<8x128xf32>
    %219 = arith.addf %217, %218 : vector<8x128xf32>
    %220 = vector.extract_strided_slice %219 {offsets = [0, 0], sizes = [8, 32], strides = [1, 1]} : vector<8x128xf32> to vector<8x32xf32>
    %221 = arith.negf %220 : vector<8x32xf32>
    %222 = math.exp %221 : vector<8x32xf32>
    %cst_69 = arith.constant 1.000000e+00 : f32
    %223 = vector.broadcast %cst_69 : f32 to vector<8x32xf32>
    %224 = arith.addf %223, %222 : vector<8x32xf32>
    %225 = arith.divf %223, %224 : vector<8x32xf32>
    %226 = vector.extract_strided_slice %219 {offsets = [0, 32], sizes = [8, 32], strides = [1, 1]} : vector<8x128xf32> to vector<8x32xf32>
    %227 = arith.negf %226 : vector<8x32xf32>
    %228 = math.exp %227 : vector<8x32xf32>
    %cst_70 = arith.constant 1.000000e+00 : f32
    %229 = vector.broadcast %cst_70 : f32 to vector<8x32xf32>
    %230 = arith.addf %229, %228 : vector<8x32xf32>
    %231 = arith.divf %229, %230 : vector<8x32xf32>
    %232 = vector.extract_strided_slice %219 {offsets = [0, 64], sizes = [8, 32], strides = [1, 1]} : vector<8x128xf32> to vector<8x32xf32>
    %233 = vector.extract_strided_slice %219 {offsets = [0, 96], sizes = [8, 32], strides = [1, 1]} : vector<8x128xf32> to vector<8x32xf32>
    %234 = arith.mulf %225, %233 : vector<8x32xf32>
    %235 = arith.addf %232, %234 : vector<8x32xf32>
    %236 = math.tanh %235 : vector<8x32xf32>
    %cst_71 = arith.constant 1.000000e+00 : f32
    %237 = vector.broadcast %cst_71 : f32 to vector<8x32xf32>
    %238 = arith.subf %237, %231 : vector<8x32xf32>
    %239 = arith.mulf %238, %236 : vector<8x32xf32>
    %240 = arith.mulf %231, %202 : vector<8x32xf32>
    %241 = arith.addf %239, %240 : vector<8x32xf32>
    %242 = vector.broadcast %15 : vector<1x32xf32> to vector<8x32xf32>
    %243 = arith.mulf %241, %242 : vector<8x32xf32>
    %cst_72 = arith.constant dense<0.000000e+00> : vector<8xf32>
    %244 = vector.multi_reduction <add>, %243, %cst_72 [1] : vector<8x32xf32> to vector<8xf32>
    %245 = vector.shape_cast %244 : vector<8xf32> to vector<8x1xf32>
    %246 = vector.broadcast %16 : f32 to vector<8x1xf32>
    %247 = arith.addf %245, %246 : vector<8x1xf32>
    %248 = arith.index_cast %c5_i32 : i32 to index
    %c0_73 = arith.constant 0 : index
    %c0_74 = arith.constant 0 : index
    %249 = vector.load %arg10[%248, %c0_73, %c0_74] : memref<8x8x1xf32, #tpu.memory_space<vmem>>, vector<1x8x1xf32>
    %250 = vector.shape_cast %249 : vector<1x8x1xf32> to vector<8x1xf32>
    %251 = vector.shape_cast %247 : vector<8x1xf32> to vector<1x8x1xf32>
    tpu.vector_store %arg10[%248, %c0_73, %c0_74], %251 {strides = array<i32>} : memref<8x8x1xf32, #tpu.memory_space<vmem>>, vector<1x8x1xf32>,
    %c6_i32 = arith.constant 6 : i32
    %252 = arith.index_cast %c6_i32 : i32 to index
    %c0_75 = arith.constant 0 : index
    %c0_76 = arith.constant 0 : index
    %253 = vector.load %arg12[%252, %c0_75, %c0_76] : memref<8x8x32xf32, #tpu.memory_space<vmem>>, vector<1x8x32xf32>
    %254 = vector.shape_cast %253 : vector<1x8x32xf32> to vector<8x32xf32>
    %255 = tpu.concatenate %254, %241 in 1 : vector<8x32xf32>, vector<8x32xf32> -> vector<8x64xf32>
    %cst_77 = arith.constant dense<0.000000e+00> : vector<8x128xf32>
    %256 = tpu.matmul %255, %13, %cst_77 {dimension_numbers = #tpu.dot_dimension_numbers<[1], [0], [0], [1], [0, 0, 1, 1], [], []>, precision = #tpu.contract_precision<fp32>} : vector<8x64xf32>, vector<64x128xf32>, vector<8x128xf32> -> vector<8x128xf32>
    %257 = vector.broadcast %14 : vector<1x128xf32> to vector<8x128xf32>
    %258 = arith.addf %256, %257 : vector<8x128xf32>
    %259 = vector.extract_strided_slice %258 {offsets = [0, 0], sizes = [8, 32], strides = [1, 1]} : vector<8x128xf32> to vector<8x32xf32>
    %260 = arith.negf %259 : vector<8x32xf32>
    %261 = math.exp %260 : vector<8x32xf32>
    %cst_78 = arith.constant 1.000000e+00 : f32
    %262 = vector.broadcast %cst_78 : f32 to vector<8x32xf32>
    %263 = arith.addf %262, %261 : vector<8x32xf32>
    %264 = arith.divf %262, %263 : vector<8x32xf32>
    %265 = vector.extract_strided_slice %258 {offsets = [0, 32], sizes = [8, 32], strides = [1, 1]} : vector<8x128xf32> to vector<8x32xf32>
    %266 = arith.negf %265 : vector<8x32xf32>
    %267 = math.exp %266 : vector<8x32xf32>
    %cst_79 = arith.constant 1.000000e+00 : f32
    %268 = vector.broadcast %cst_79 : f32 to vector<8x32xf32>
    %269 = arith.addf %268, %267 : vector<8x32xf32>
    %270 = arith.divf %268, %269 : vector<8x32xf32>
    %271 = vector.extract_strided_slice %258 {offsets = [0, 64], sizes = [8, 32], strides = [1, 1]} : vector<8x128xf32> to vector<8x32xf32>
    %272 = vector.extract_strided_slice %258 {offsets = [0, 96], sizes = [8, 32], strides = [1, 1]} : vector<8x128xf32> to vector<8x32xf32>
    %273 = arith.mulf %264, %272 : vector<8x32xf32>
    %274 = arith.addf %271, %273 : vector<8x32xf32>
    %275 = math.tanh %274 : vector<8x32xf32>
    %cst_80 = arith.constant 1.000000e+00 : f32
    %276 = vector.broadcast %cst_80 : f32 to vector<8x32xf32>
    %277 = arith.subf %276, %270 : vector<8x32xf32>
    %278 = arith.mulf %277, %275 : vector<8x32xf32>
    %279 = arith.mulf %270, %241 : vector<8x32xf32>
    %280 = arith.addf %278, %279 : vector<8x32xf32>
    %281 = vector.broadcast %15 : vector<1x32xf32> to vector<8x32xf32>
    %282 = arith.mulf %280, %281 : vector<8x32xf32>
    %cst_81 = arith.constant dense<0.000000e+00> : vector<8xf32>
    %283 = vector.multi_reduction <add>, %282, %cst_81 [1] : vector<8x32xf32> to vector<8xf32>
    %284 = vector.shape_cast %283 : vector<8xf32> to vector<8x1xf32>
    %285 = vector.broadcast %16 : f32 to vector<8x1xf32>
    %286 = arith.addf %284, %285 : vector<8x1xf32>
    %287 = arith.index_cast %c6_i32 : i32 to index
    %c0_82 = arith.constant 0 : index
    %c0_83 = arith.constant 0 : index
    %288 = vector.load %arg10[%287, %c0_82, %c0_83] : memref<8x8x1xf32, #tpu.memory_space<vmem>>, vector<1x8x1xf32>
    %289 = vector.shape_cast %288 : vector<1x8x1xf32> to vector<8x1xf32>
    %290 = vector.shape_cast %286 : vector<8x1xf32> to vector<1x8x1xf32>
    tpu.vector_store %arg10[%287, %c0_82, %c0_83], %290 {strides = array<i32>} : memref<8x8x1xf32, #tpu.memory_space<vmem>>, vector<1x8x1xf32>,
    %c7_i32 = arith.constant 7 : i32
    %291 = arith.index_cast %c7_i32 : i32 to index
    %c0_84 = arith.constant 0 : index
    %c0_85 = arith.constant 0 : index
    %292 = vector.load %arg12[%291, %c0_84, %c0_85] : memref<8x8x32xf32, #tpu.memory_space<vmem>>, vector<1x8x32xf32>
    %293 = vector.shape_cast %292 : vector<1x8x32xf32> to vector<8x32xf32>
    %294 = tpu.concatenate %293, %280 in 1 : vector<8x32xf32>, vector<8x32xf32> -> vector<8x64xf32>
    %cst_86 = arith.constant dense<0.000000e+00> : vector<8x128xf32>
    %295 = tpu.matmul %294, %13, %cst_86 {dimension_numbers = #tpu.dot_dimension_numbers<[1], [0], [0], [1], [0, 0, 1, 1], [], []>, precision = #tpu.contract_precision<fp32>} : vector<8x64xf32>, vector<64x128xf32>, vector<8x128xf32> -> vector<8x128xf32>
    %296 = vector.broadcast %14 : vector<1x128xf32> to vector<8x128xf32>
    %297 = arith.addf %295, %296 : vector<8x128xf32>
    %298 = vector.extract_strided_slice %297 {offsets = [0, 0], sizes = [8, 32], strides = [1, 1]} : vector<8x128xf32> to vector<8x32xf32>
    %299 = arith.negf %298 : vector<8x32xf32>
    %300 = math.exp %299 : vector<8x32xf32>
    %cst_87 = arith.constant 1.000000e+00 : f32
    %301 = vector.broadcast %cst_87 : f32 to vector<8x32xf32>
    %302 = arith.addf %301, %300 : vector<8x32xf32>
    %303 = arith.divf %301, %302 : vector<8x32xf32>
    %304 = vector.extract_strided_slice %297 {offsets = [0, 32], sizes = [8, 32], strides = [1, 1]} : vector<8x128xf32> to vector<8x32xf32>
    %305 = arith.negf %304 : vector<8x32xf32>
    %306 = math.exp %305 : vector<8x32xf32>
    %cst_88 = arith.constant 1.000000e+00 : f32
    %307 = vector.broadcast %cst_88 : f32 to vector<8x32xf32>
    %308 = arith.addf %307, %306 : vector<8x32xf32>
    %309 = arith.divf %307, %308 : vector<8x32xf32>
    %310 = vector.extract_strided_slice %297 {offsets = [0, 64], sizes = [8, 32], strides = [1, 1]} : vector<8x128xf32> to vector<8x32xf32>
    %311 = vector.extract_strided_slice %297 {offsets = [0, 96], sizes = [8, 32], strides = [1, 1]} : vector<8x128xf32> to vector<8x32xf32>
    %312 = arith.mulf %303, %311 : vector<8x32xf32>
    %313 = arith.addf %310, %312 : vector<8x32xf32>
    %314 = math.tanh %313 : vector<8x32xf32>
    %cst_89 = arith.constant 1.000000e+00 : f32
    %315 = vector.broadcast %cst_89 : f32 to vector<8x32xf32>
    %316 = arith.subf %315, %309 : vector<8x32xf32>
    %317 = arith.mulf %316, %314 : vector<8x32xf32>
    %318 = arith.mulf %309, %280 : vector<8x32xf32>
    %319 = arith.addf %317, %318 : vector<8x32xf32>
    %320 = vector.broadcast %15 : vector<1x32xf32> to vector<8x32xf32>
    %321 = arith.mulf %319, %320 : vector<8x32xf32>
    %cst_90 = arith.constant dense<0.000000e+00> : vector<8xf32>
    %322 = vector.multi_reduction <add>, %321, %cst_90 [1] : vector<8x32xf32> to vector<8xf32>
    %323 = vector.shape_cast %322 : vector<8xf32> to vector<8x1xf32>
    %324 = vector.broadcast %16 : f32 to vector<8x1xf32>
    %325 = arith.addf %323, %324 : vector<8x1xf32>
    %326 = arith.index_cast %c7_i32 : i32 to index
    %c0_91 = arith.constant 0 : index
    %c0_92 = arith.constant 0 : index
    %327 = vector.load %arg10[%326, %c0_91, %c0_92] : memref<8x8x1xf32, #tpu.memory_space<vmem>>, vector<1x8x1xf32>
    %328 = vector.shape_cast %327 : vector<1x8x1xf32> to vector<8x1xf32>
    %329 = vector.shape_cast %325 : vector<8x1xf32> to vector<1x8x1xf32>
    tpu.vector_store %arg10[%326, %c0_91, %c0_92], %329 {strides = array<i32>} : memref<8x8x1xf32, #tpu.memory_space<vmem>>, vector<1x8x1xf32>,
    %c8_i32 = arith.constant 8 : i32
    %c0_93 = arith.constant 0 : index
    %c0_94 = arith.constant 0 : index
    %330 = vector.load %arg11[%c0_93, %c0_94] : memref<8x32xf32, #tpu.memory_space<vmem>>, vector<8x32xf32>
    tpu.vector_store %arg11[%c0_93, %c0_94], %319 {strides = array<i32>} : memref<8x32xf32, #tpu.memory_space<vmem>>, vector<8x32xf32>,
    return
  }
  func.func @transform_0(%arg0: i32, %arg1: i32) -> (i32, i32, i32) {
    %c0_i32 = arith.constant 0 : i32
    %c0_i32_0 = arith.constant 0 : i32
    return %arg1, %arg0, %c0_i32 : i32, i32, i32
  }
  func.func @transform_1(%arg0: i32, %arg1: i32) -> (i32, i32) {
    %c0_i32 = arith.constant 0 : i32
    %c0_i32_0 = arith.constant 0 : i32
    return %arg0, %c0_i32 : i32, i32
  }
  func.func @transform_2(%arg0: i32, %arg1: i32) -> (i32, i32) {
    %c0_i32 = arith.constant 0 : i32
    %c0_i32_0 = arith.constant 0 : i32
    %c0_i32_1 = arith.constant 0 : i32
    return %c0_i32, %c0_i32_0 : i32, i32
  }
  func.func @transform_3(%arg0: i32, %arg1: i32) -> (i32, i32) {
    %c0_i32 = arith.constant 0 : i32
    %c0_i32_0 = arith.constant 0 : i32
    %c0_i32_1 = arith.constant 0 : i32
    return %c0_i32, %c0_i32_0 : i32, i32
  }
  func.func @transform_4(%arg0: i32, %arg1: i32) -> (i32, i32) {
    %c0_i32 = arith.constant 0 : i32
    %c0_i32_0 = arith.constant 0 : i32
    %c0_i32_1 = arith.constant 0 : i32
    return %c0_i32, %c0_i32_0 : i32, i32
  }
  func.func @transform_5(%arg0: i32, %arg1: i32) -> (i32, i32) {
    %c0_i32 = arith.constant 0 : i32
    %c0_i32_0 = arith.constant 0 : i32
    %c0_i32_1 = arith.constant 0 : i32
    return %c0_i32, %c0_i32_0 : i32, i32
  }
  func.func @transform_6(%arg0: i32, %arg1: i32) -> (i32, i32) {
    %c0_i32 = arith.constant 0 : i32
    %c0_i32_0 = arith.constant 0 : i32
    %c0_i32_1 = arith.constant 0 : i32
    return %c0_i32, %c0_i32_0 : i32, i32
  }
  func.func @transform_7(%arg0: i32, %arg1: i32) -> (i32, i32) {
    %c0_i32 = arith.constant 0 : i32
    %c0_i32_0 = arith.constant 0 : i32
    %c0_i32_1 = arith.constant 0 : i32
    return %c0_i32, %c0_i32_0 : i32, i32
  }
  func.func @transform_8(%arg0: i32, %arg1: i32) -> (i32, i32, i32) {
    %c0_i32 = arith.constant 0 : i32
    %c0_i32_0 = arith.constant 0 : i32
    return %arg1, %arg0, %c0_i32 : i32, i32, i32
  }
  func.func @transform_9(%arg0: i32, %arg1: i32) -> (i32, i32) {
    %c0_i32 = arith.constant 0 : i32
    %c0_i32_0 = arith.constant 0 : i32
    return %arg0, %c0_i32 : i32, i32
  }
}

</mosaic_0001>

<bundles_post_ra>
// kernel: tpu_custom_call.1
= control target key start
LH: loop header
LB: loop body
LE: loop exit
PB: predicated region body
PF: predicated region fallthrough
CT: control target
= control target key end

     0   :  { %16 = vsyncpa [#allocation5], 0  ;;  %s8602_s0 = inlined_call_operand.hbm [shape: f32[8,8,16], index: 0, kind: input, shape index: {}]   ;;  %s8603_s1 = inlined_call_operand.vmem [shape: f32[8,32], index: 1, kind: input, shape index: {}, may-alias: {1,9}]   ;;  %s8604_s2 = inlined_call_operand.vmem [shape: f32[16,32], index: 2, kind: input, shape index: {}]   ;;  %s8605_s3 = inlined_call_operand.vmem [shape: f32[1,32], index: 3, kind: input, shape index: {}]   ;;  %s8606_s4 = inlined_call_operand.hbm [shape: f32[64,128], index: 4, kind: input, shape index: {}]   ;;  %s8607_s5 = inlined_call_operand.vmem [shape: f32[1,128], index: 5, kind: input, shape index: {}]   ;;  %s8608_s6 = inlined_call_operand.vmem [shape: f32[1,32], index: 6, kind: input, shape index: {}]   ;;  %s8609_s7 = inlined_call_operand.<no memory space> [shape: f32[1,1], index: 7, kind: input, shape index: {}]   ;;  %s8610_s8 = inlined_call_operand.vmem [shape: f32[8,8,1], index: 8, kind: output, shape index: {0}]   ;;  %s8611_s9 = inlined_call_operand.vmem [shape: f32[8,32], index: 9, kind: output, shape index: {1}, may-alias: {1,9}]  }
   0x1   :  { %17 = vsyncpa [#allocation7], 0  ;;  %s7200_s30 = smov [#allocation4]  }
   0x2   :  { %s23_s10 = sshll.u32 %s7200_s30, 4  ;;  %s24_s10 = int_to_ptr.vmem [resolvable:$true] %s23_s10 }
   0x3   :  { %s7164_s11 = scalar_lea.vmem %s24_s10, 1024  ;;  %p7169_p1 = scmp.lt.s32.totalorder %s24_s10, %s24_s10 }
   0x4   :  { %p7165_p0 = scmp.ne.s32.totalorder %s24_s10, %s7164_s11  ;;  %p7170_p2 = scmp.lt.s32.totalorder %s7164_s11, %s7164_s11 }
   0x6   :  { %p7171_p3 = por %p7170_p2, %p7169_p1 }
   0x8   :  { %p7172_p4 = pnand %p7171_p3, %p7165_p0 }
   0xa   :  { %7175 = shalt.err (!%p7172_p4)
}
   0xb   :  { %s7201_s12 = smov 128   ;;  %s7202_s13 = smov 8  }
   0xc   :  { %29 = dma.hbm_to_vmem [thread:$0]  %s8602_s0, 1024, %s24_s10, [#allocation5], %s7201_s12, %s7201_s12, %s7202_s13  }
   0xd   :  { %s7203_s16 = smov [#allocation6]  }
   0xe   :  { %s41_s17 = sshll.u32 %s7203_s16, 4  ;;  %s42_s17 = int_to_ptr.vmem [resolvable:$true] %s41_s17 }
   0xf   :  { %s7184_s18 = scalar_lea.vmem %s42_s17, 1024  ;;  %p7189_p6 = scmp.lt.s32.totalorder %s42_s17, %s42_s17 }
  0x10   :  { %p7185_p5 = scmp.ne.s32.totalorder %s42_s17, %s7184_s18  ;;  %p7190_p7 = scmp.lt.s32.totalorder %s7184_s18, %s7184_s18 }
  0x12   :  { %p7191_p8 = por %p7190_p7, %p7189_p6 }
  0x14   :  { %p7192_p9 = pnand %p7191_p8, %p7185_p5 }
  0x16   :  { %7195 = shalt.err (!%p7192_p9)
}
  0x17   :  { %47 = dma.hbm_to_vmem [thread:$0]  %s8606_s4, 1024, %s42_s17, [#allocation7], %s7201_s12, %s7201_s12, %s7202_s13  }
  0x18   :  { %7196 = dma.done.wait [#allocation5], 1024  }
  0x19   :  { %7197 = vsyncadd [#allocation5], 4294966272 }
  0x1a   :  { %7198 = dma.done.wait [#allocation7], 1024  }
  0x1b   :  { %7199 = vsyncadd [#allocation7], 4294966272  ;;  %vm84_vm0 = vcmask 130048   ;;  %v76_v0 = vld [vmem:[%s8604_s2 + $0x8] sm:$0xff]  ;;  %v75_v1 = vld [vmem:[%s8604_s2] sm:$0xff]  ;;  %vm65_vm1 = vcmask 261120  }
  0x1c   :  { %v67_v2 = vld [vmem:[#allocation4] sm:$0xff]  ;;  %v7271_v3 = vand.u32 4294901760, %v76_v0  ;;  %v7273_v4 = vand.u32 4294901760, %v75_v1  ;;  %v68_v6 = vld [vmem:[#allocation4 + $0x8] sm:$0xff]  ;;  %v69_v7 = vld [vmem:[#allocation4 + $0x10] sm:$0xff]  ;;  %s7204_s27 = smov 32  }
  0x1d   :  { %v86_v5 = vsel %vm84_vm0, %v67_v2, 0  ;;  %v70_v8 = vld [vmem:[#allocation4 + $0x18] sm:$0xff]  ;;  %v89_v10 = vsel %vm84_vm0, %v68_v6, 0  ;;  %v92_v11 = vsel %vm84_vm0, %v69_v7, 0  ;;  %v71_v13 = vld [vmem:[#allocation4 + $0x20] sm:$0xff]  ;;  %v72_v14 = vld [vmem:[#allocation4 + $0x28] sm:$0xff] }
  0x1e   :  { %v7276_v9 = vand.u32 4294901760, %v86_v5  ;;  %v95_v12 = vsel %vm84_vm0, %v70_v8, 0  ;;  %6074 = vmatprep.subr.mxu0 %v7271_v3  ;;  %v286_v15 = vsub.f32 %v76_v0, %v7271_v3  ;;  %v7283_v16 = vand.u32 4294901760, %v89_v10  ;;  %v64_v19 = vld [vmem:[%s8603_s1] sm:$0xff]  ;;  %v73_v40 = vld [vmem:[#allocation4 + $0x30] sm:$0xff]  ;;  %v74_v41 = vld [vmem:[#allocation4 + $0x38] sm:$0xff] }
  0x1f   :  { %v7286_v17 = vsub.f32 %v75_v1, %v7273_v4  ;;  %v7288_v18 = vand.u32 4294901760, %v92_v11  ;;  %6075 = vmatpush3.msra.mxu0 %v7271_v3  ;;  %v7298_v21 = vand.u32 4294901760, %v95_v12  ;;  %v98_v22 = vsel %vm84_vm0, %v71_v13, 0  ;;  %66 = vst.msk [vmem:[%s8611_s9] sm:$0xff] %vm65_vm1, %v64_v19  ;;  %v892_v8 = vld [vmem:[#allocation6 + $0x30] sm:$0xff]  ;;  %s7207_s10 = smov 64  }
  0x20   :  { %v7295_v20 = vsub.f32 %v86_v5, %v7276_v9  ;;  %6094 = vmatprep.mubr.f32.mxu1 %v7276_v9  ;;  %v101_v23 = vsel %vm84_vm0, %v72_v14, 0  ;;  %6076 = vmatprep.subr.mxu0 %v7273_v4  ;;  %v7307_v24 = vand.u32 4294901760, %v286_v15  ;;  %v7310_v25 = vsub.f32 %v89_v10, %v7283_v16  ;;  %s7208_s11 = smov 96  }
  0x21   :  { %v7313_v26 = vand.u32 4294901760, %v7286_v17  ;;  %v7316_v27 = vsub.f32 %v92_v11, %v7288_v18  ;;  %6077 = vmatpush3.msra.mxu0 %v7273_v4  ;;  %v7321_v29 = vsub.f32 %v95_v12, %v7298_v21  ;;  %v7323_v30 = vand.u32 4294901760, %v98_v22  ;;  %v891_v11 = vld [vmem:[#allocation6 + $0x28] sm:$0xff] }
  0x22   :  { %v178_v28 = vand.u32 4294901760, %v7295_v20  ;;  %v7325_v31 = vand.u32 4294901760, %v101_v23  ;;  %v288_v32 = vsub.f32 %v286_v15, %v7307_v24  ;;  %v188_v33 = vand.u32 4294901760, %v7310_v25  ;;  %6106 = vmatprep.subr.mxu0 %v286_v15 }
  0x23   :  { %v295_v34 = vsub.f32 %v7286_v17, %v7313_v26  ;;  %v198_v35 = vand.u32 4294901760, %v7316_v27  ;;  %v208_v37 = vand.u32 4294901760, %v7321_v29  ;;  %v7337_v38 = vsub.f32 %v98_v22, %v7323_v30 }
  0x24   :  { %v179_v36 = vsub.f32 %v7295_v20, %v178_v28  ;;  %v7340_v39 = vsub.f32 %v101_v23, %v7325_v31  ;;  %v289_v42 = vand.u32 4294901760, %v288_v32  ;;  %v189_v43 = vsub.f32 %v7310_v25, %v188_v33 }
  0x25   :  { %v296_v44 = vand.u32 4294901760, %v295_v34  ;;  %v199_v45 = vsub.f32 %v7316_v27, %v198_v35  ;;  %v209_v47 = vsub.f32 %v7321_v29, %v208_v37  ;;  %v218_v48 = vand.u32 4294901760, %v7337_v38 }
  0x26   :  { %v180_v46 = vand.u32 4294901760, %v179_v36  ;;  %v228_v49 = vand.u32 4294901760, %v7340_v39  ;;  %6090 = vmatprep.subr.mxu1 %v289_v42  ;;  %v190_v50 = vand.u32 4294901760, %v189_v43  ;;  %v104_v51 = vsel %vm84_vm0, %v73_v40, 0  ;;  %v897_v7 = vld [vmem:[%s8611_s9] sm:$0xff] }
  0x27   :  { %v107_v52 = vsel %vm84_vm0, %v74_v41, 0  ;;  %6091 = vmatpush3.msra.mxu1 %v289_v42  ;;  %v200_v53 = vand.u32 4294901760, %v199_v45  ;;  %v219_v54 = vsub.f32 %v7337_v38, %v218_v48  ;;  %v7358_v55 = vand.u32 4294901760, %v104_v51  ;;  %900 = vrot.lane.b32.xlu0 %v897_v7, %s7204_s27 }
  0x28   :  { %6078 = vmatprep.mubr.f32.mxu0 %v180_v46  ;;  %6092 = vmatprep.subr.mxu1 %v296_v44  ;;  %v210_v56 = vand.u32 4294901760, %v209_v47  ;;  %v229_v57 = vsub.f32 %v7340_v39, %v228_v49  ;;  %v7363_v58 = vand.u32 4294901760, %v107_v52  ;;  %v7431_v10 = vand.u32 4294901760, %v892_v8 }
  0x29   :  { %6079 = vmatmul.mubr.f32.vlgmr.msra.gmra.mxu0 %v190_v50  ;;  %6093 = vmatpush3.msra.mxu1 %v296_v44  ;;  %v220_v59 = vand.u32 4294901760, %v219_v54  ;;  %v237_v60 = vsub.f32 %v104_v51, %v7358_v55  ;;  %v7439_v14 = vand.u32 4294901760, %v891_v11  ;;  %vm7206_vm2 = vmmov 0  }
  0x2a   :  { %6107 = vmatpush3.msra.mxu0 %v286_v15  ;;  %6095 = vmatmul.mubr.f32.vlgmr.msra.gmra.mxu1 %v7283_v16  ;;  %v247_v61 = vsub.f32 %v107_v52, %v7363_v58  ;;  %v230_v63 = vand.u32 4294901760, %v229_v57  ;;  %v7437_v13 = vsub.f32 %v892_v8, %v7431_v10  ;;  %v890_v15 = vld [vmem:[#allocation6 + $0x20] sm:$0xff]  ;;  %vm910_vm3 = vcmask 523264  }
  0x2b   :  { %6122 = vmatprep.subr.mxu1 %v7271_v3  ;;  %6081 = vmatprep.mubr.f32.mxu0 %v200_v53  ;;  %v238_v62 = vand.u32 4294901760, %v237_v60  ;;  %v7449_v19 = vand.u32 4294901760, %v890_v15  ;;  %vm1494_vm4 = vcmask 7168  }
  0x2c   :  { %6123 = vmatpush3.msra.mxu1 %v7271_v3  ;;  %6097 = vmatprep.mubr.f32.mxu1 %v7288_v18  ;;  %v248_v0 = vand.u32 4294901760, %v247_v61 }
  0x2d   :  { %6082 = vmatmul.mubr.f32.gmra.mxu0 %v210_v56  ;;  %6108 = vmatprep.subr.mxu0 %v7286_v17  ;;  %v239_v1 = vsub.f32 %v237_v60, %v238_v62 }
  0x2e   :  { %6084 = vmatprep.mubr.f32.mxu0 %v220_v59  ;;  %6098 = vmatmul.mubr.f32.gmra.mxu1 %v7298_v21  ;;  %v249_v2 = vsub.f32 %v247_v61, %v248_v0 }
  0x2f   :  { %6109 = vmatpush3.msra.mxu0 %v7286_v17  ;;  %6100 = vmatprep.mubr.f32.mxu1 %v7323_v30  ;;  %v240_v5 = vand.u32 4294901760, %v239_v1  ;;  %v7444_v17 = vand.u32 4294901760, %v7437_v13 }
  0x30   :  { %6124 = vmatprep.subr.mxu1 %v7273_v4  ;;  %v250_v6 = vand.u32 4294901760, %v249_v2  ;;  %6138 = vmatprep.subr.mxu0 %v7307_v24 }
  0x31   :  { %6085 = vmatmul.mubr.f32.gmra.mxu0 %v230_v63  ;;  %6125 = vmatpush3.msra.mxu1 %v7273_v4  ;;  %8644 = vst [vmem:[#allocation10_spill] sm:$0xff] %v7444_v17  ;;  %v1024_v22 = vsub.f32 %v7437_v13, %v7444_v17 }
  0x32   :  { %6087 = vmatprep.mubr.f32.mxu0 %v240_v5  ;;  %6101 = vmatmul.mubr.f32.gmra.mxu1 %v7325_v31 }
  0x33   :  { %6154 = vmatprep.subr.mxu1 %v7271_v3  ;;  %6103 = vmatprep.mubr.f32.mxu1 %v7358_v55 }
  0x35   :  { %6088 = vmatmul.mubr.f32.gmra.mxu0 %v250_v6 }
  0x36   :  { %6110 = vmatprep.mubr.f32.mxu0 %v7295_v20  ;;  %6104 = vmatmul.mubr.f32.gmra.mxu1 %v7363_v58  ;;  %v889_v20 = vld [vmem:[#allocation6 + $0x18] sm:$0xff] }
  0x37   :  { %6126 = vmatprep.mubr.f32.mxu1 %v178_v28  ;;  %v7466_v28 = vand.u32 4294901760, %v1024_v22 }
  0x39   :  { %6111 = vmatmul.mubr.f32.vlgmr.msra.gmra.mxu0 %v7310_v25  ;;  %v7460_v25 = vsub.f32 %v890_v15, %v7449_v19  ;;  %8647 = vst [vmem:[#allocation13_spill] sm:$0xff] %v7466_v28 }
  0x3a   :  { %6139 = vmatpush3.msra.mxu0 %v7307_v24  ;;  %6113 = vmatprep.mubr.f32.mxu0 %v7316_v27  ;;  %v8612_v24 = vmov 0.0   ;;  %v888_v27 = vld [vmem:[#allocation6 + $0x10] sm:$0xff] }
  0x3b   :  { %6127 = vmatmul.mubr.f32.vlgmr.msra.gmra.mxu1 %v188_v33  ;;  %6140 = vmatprep.subr.mxu0 %v7313_v26  ;;  %v887_v33 = vld [vmem:[#allocation6 + $0x8] sm:$0xff] }
  0x3c   :  { %6155 = vmatpush3.msra.mxu1 %v7271_v3  ;;  %6129 = vmatprep.mubr.f32.mxu1 %v198_v35  ;;  %v893_v3 = vld [vmem:[#allocation6 + $0x38] sm:$0xff]  ;;  %v7488_v36 = vand.u32 4294901760, %v887_v33 }
  0x3d   :  { %6114 = vmatmul.mubr.f32.gmra.mxu0 %v7321_v29  ;;  %6156 = vmatprep.subr.mxu1 %v7273_v4 }
  0x3e   :  { %6116 = vmatprep.mubr.f32.mxu0 %v7337_v38  ;;  %6141 = vmatpush3.msra.mxu0 %v7313_v26  ;;  %v7463_v26 = vand.u32 4294901760, %v889_v20  ;;  %v7503_v41 = vsub.f32 %v887_v33, %v7488_v36 }
  0x3f   :  { %6130 = vmatmul.mubr.f32.gmra.mxu1 %v208_v37  ;;  %6170 = vmatprep.subr.mxu0 %v8612_v24 }
  0x40   :  { %6132 = vmatprep.mubr.f32.mxu1 %v218_v48  ;;  %6157 = vmatpush3.msra.mxu1 %v7273_v4  ;;  %v7426_v4 = vand.u32 4294901760, %v893_v3  ;;  %v7478_v32 = vsub.f32 %v889_v20, %v7463_v26  ;;  %v7516_v46 = vand.u32 4294901760, %v7503_v41 }
  0x41   :  { %6117 = vmatmul.mubr.f32.gmra.mxu0 %v7340_v39  ;;  %6189 = vmatprep.subr.mxu1 %v8612_v24  ;;  %v886_v39 = vld [vmem:[#allocation6] sm:$0xff] }
  0x42   :  { %6119 = vmatprep.mubr.f32.mxu0 %v237_v60  ;;  %v7494_v38 = vand.u32 4294901760, %v7478_v32  ;;  %v7505_v42 = vand.u32 4294901760, %v886_v39  ;;  %8653 = vst [vmem:[#allocation19_spill] sm:$0xff] %v7516_v46  ;;  %v1059_v50 = vsub.f32 %v7503_v41, %v7516_v46 }
  0x43   :  { %6133 = vmatmul.mubr.f32.gmra.mxu1 %v228_v49 }
  0x44   :  { %6135 = vmatprep.mubr.f32.mxu1 %v238_v62  ;;  %8650 = vst [vmem:[#allocation16_spill] sm:$0xff] %v7494_v38  ;;  %v1045_v44 = vsub.f32 %v7478_v32, %v7494_v38  ;;  %v7520_v47 = vsub.f32 %v886_v39, %v7505_v42  ;;  %v7538_v52 = vand.u32 4294901760, %v1059_v50 }
  0x45   :  { %6120 = vmatmul.mubr.f32.gmra.mxu0 %v247_v61 }
  0x46   :  { %6142 = vmatprep.mubr.f32.mxu0 %v7276_v9  ;;  %v7523_v48 = vand.u32 4294901760, %v1045_v44  ;;  %v7532_v51 = vand.u32 4294901760, %v7520_v47  ;;  %8657 = vst [vmem:[#allocation23_spill] sm:$0xff] %v7538_v52 }
  0x47   :  { %6136 = vmatmul.mubr.f32.gmra.mxu1 %v248_v0 }
  0x48   :  { %6158 = vmatprep.mubr.f32.mxu1 %v7276_v9  ;;  %v7429_v9 = vsub.f32 %v893_v3, %v7426_v4  ;;  %8654 = vst [vmem:[#allocation20_spill] sm:$0xff] %v7523_v48  ;;  %8656 = vst [vmem:[#allocation22_spill] sm:$0xff] %v7532_v51  ;;  %v1066_v53 = vsub.f32 %v7520_v47, %v7532_v51 }
  0x49   :  { %6143 = vmatmul.mubr.f32.vlgmr.msra.gmra.mxu0 %v7283_v16 }
  0x4a   :  { %6145 = vmatprep.mubr.f32.mxu0 %v7288_v18  ;;  %v7434_v12 = vand.u32 4294901760, %v7429_v9  ;;  %6171 = vmatpush3.msra.mxu0 %v7426_v4  ;;  %v7546_v54 = vand.u32 4294901760, %v1066_v53 }
  0x4b   :  { %6159 = vmatmul.mubr.f32.vlgmr.msra.gmra.mxu1 %v7283_v16  ;;  %6172 = vmatprep.subr.mxu0 %v8612_v24 }
  0x4c   :  { %6161 = vmatprep.mubr.f32.mxu1 %v7288_v18  ;;  %v1017_v16 = vsub.f32 %v7429_v9, %v7434_v12  ;;  %v7447_v18 = vsub.f32 %v891_v11, %v7439_v14  ;;  %6173 = vmatpush3.msra.mxu0 %v7431_v10  ;;  %8658 = vst [vmem:[#allocation24_spill] sm:$0xff] %v7546_v54  ;;  %v5564_v11 = vld [vmem:[%s8605_s3] ss:$0 sm:$0xff] }
  0x4d   :  { %6146 = vmatmul.mubr.f32.gmra.mxu0 %v7298_v21  ;;  %6174 = vmatprep.subr.mxu0 %v8612_v24 }
  0x4e   :  { %6148 = vmatprep.mubr.f32.mxu0 %v7323_v30  ;;  %v7456_v23 = vand.u32 4294901760, %v7447_v18  ;;  %6175 = vmatpush3.msra.mxu0 %v7439_v14 }
  0x4f   :  { %6162 = vmatmul.mubr.f32.gmra.mxu1 %v7298_v21  ;;  %v7451_v21 = vand.u32 4294901760, %v1017_v16  ;;  %6176 = vmatprep.subr.mxu0 %v8612_v24 }
  0x50   :  { %6164 = vmatprep.mubr.f32.mxu1 %v7323_v30  ;;  %8646 = vst [vmem:[#allocation12_spill] sm:$0xff] %v7456_v23  ;;  %v1031_v29 = vsub.f32 %v7447_v18, %v7456_v23  ;;  %v7471_v30 = vand.u32 4294901760, %v888_v27  ;;  %6177 = vmatpush3.msra.mxu0 %v7449_v19 }
  0x51   :  { %6149 = vmatmul.mubr.f32.gmra.mxu0 %v7325_v31  ;;  %8645 = vst [vmem:[#allocation11_spill] sm:$0xff] %v7451_v21  ;;  %6190 = vmatpush3.msra.mxu1 %v7451_v21 }
  0x52   :  { %6151 = vmatprep.mubr.f32.mxu0 %v7358_v55  ;;  %6191 = vmatprep.subr.mxu1 %v8612_v24  ;;  %v7482_v34 = vand.u32 4294901760, %v1031_v29  ;;  %v7486_v35 = vsub.f32 %v888_v27, %v7471_v30 }
  0x53   :  { %6165 = vmatmul.mubr.f32.gmra.mxu1 %v7325_v31  ;;  %v7475_v31 = vand.u32 4294901760, %v7460_v25  ;;  %6178 = vmatprep.subr.mxu0 %v8612_v24 }
  0x54   :  { %6167 = vmatprep.mubr.f32.mxu1 %v7358_v55  ;;  %6192 = vmatpush3.msra.mxu1 %v7466_v28  ;;  %8649 = vst [vmem:[#allocation15_spill] sm:$0xff] %v7482_v34  ;;  %v7499_v40 = vand.u32 4294901760, %v7486_v35 }
  0x55   :  { %6152 = vmatmul.mubr.f32.gmra.mxu0 %v7363_v58  ;;  %8648 = vst [vmem:[#allocation14_spill] sm:$0xff] %v7475_v31  ;;  %6193 = vmatprep.subr.mxu1 %v8612_v24  ;;  %v1038_v37 = vsub.f32 %v7460_v25, %v7475_v31 }
  0x56   :  { %6194 = vmatpush3.msra.mxu1 %v7482_v34  ;;  %8651 = vst [vmem:[#allocation17_spill] sm:$0xff] %v7499_v40  ;;  %v1052_v45 = vsub.f32 %v7486_v35, %v7499_v40  ;;  %6179 = vmatpush3.msra.mxu0 %v7463_v26 }
  0x57   :  { %6168 = vmatmul.mubr.f32.gmra.mxu1 %v7363_v58  ;;  %6195 = vmatprep.subr.mxu1 %v8612_v24  ;;  %v7508_v43 = vand.u32 4294901760, %v1038_v37 }
  0x58   :  { %v7527_v49 = vand.u32 4294901760, %v1052_v45  ;;  %6180 = vmatprep.subr.mxu0 %v8612_v24  ;;  %6205 = vmatprep.mubr.msk.f32.mxu1 %vm7206_vm2, %v8612_v24 }
  0x59   :  { %8652 = vst [vmem:[#allocation18_spill] sm:$0xff] %v7508_v43  ;;  %6196 = vmatpush3.msra.mxu1 %v7508_v43  ;;  %6181 = vmatpush3.msra.mxu0 %v7471_v30 }
  0x5a   :  { %6197 = vmatprep.subr.mxu1 %v8612_v24  ;;  %8655 = vst [vmem:[#allocation21_spill] sm:$0xff] %v7527_v49  ;;  %6182 = vmatprep.subr.mxu0 %v8612_v24 }
  0x5b   :  { %6198 = vmatpush3.msra.mxu1 %v7523_v48  ;;  %6183 = vmatpush3.msra.mxu0 %v7488_v36 }
  0x5c   :  { %6199 = vmatprep.subr.mxu1 %v8612_v24  ;;  %6184 = vmatprep.subr.mxu0 %v8612_v24 }
  0x5d   :  { %6200 = vmatpush3.msra.mxu1 %v7527_v49  ;;  %6185 = vmatpush3.msra.mxu0 %v7505_v42 }
  0x5e   :  { %6201 = vmatprep.subr.mxu1 %v8612_v24  ;;  %6186 = vmatprep.mubr.msk.f32.mxu0 %vm7206_vm2, %v8612_v24 }
  0x5f   :  { %6202 = vmatpush3.msra.mxu1 %v7538_v52  ;;  %6208 = vmatprep.subr.mxu0 %v8612_v24 }
  0x60   :  { %6203 = vmatprep.subr.mxu1 %v8612_v24 }
  0x61   :  { %6204 = vmatpush3.msra.mxu1 %v7546_v54 }
  0x62   :  { %6227 = vmatprep.subr.mxu1 %v8612_v24 }
  0xe9   :  { %v6080_v55 = vpop.f32.mrf.mxu0 }
  0xea   :  { %v6096_v57 = vpop.f32.mrf.mxu1  ;;  %v193_v27 = vadd.f32 %v6080_v55, %v5564_v11 }
  0xeb   :  { %v182_v56 = vpop.f32.mrf.mxu0 }
  0xec   :  { %v333_v59 = vpop.f32.mrf.mxu1  ;;  %v183_v37 = vadd.f32 %v5564_v11, %v182_v56  ;;  %v340_v45 = vadd.f32 %v6096_v57, %v193_v27 }
  0xed   :  { %v6083_v58 = vpop.f32.mrf.mxu0 }
  0xee   :  { %v6099_v61 = vpop.f32.mrf.mxu1  ;;  %v213_v50 = vadd.f32 %v6083_v58, %v5564_v11  ;;  %v334_v54 = vadd.f32 %v333_v59, %v183_v37 }
  0xef   :  { %v202_v60 = vpop.f32.mrf.mxu0 }
  0xf0   :  { %v345_v63 = vpop.f32.mrf.mxu1  ;;  %v203_v52 = vadd.f32 %v5564_v11, %v202_v60  ;;  %v352_v51 = vadd.f32 %v6099_v61, %v213_v50 }
  0xf1   :  { %v6086_v62 = vpop.f32.mrf.mxu0 }
  0xf2   :  { %v6102_v1 = vpop.f32.mrf.mxu1  ;;  %v233_v48 = vadd.f32 %v6086_v62, %v5564_v11  ;;  %v346_v40 = vadd.f32 %v345_v63, %v203_v52 }
  0xf3   :  { %v222_v0 = vpop.f32.mrf.mxu0 }
  0xf4   :  { %v357_v5 = vpop.f32.mrf.mxu1  ;;  %v223_v46 = vadd.f32 %v5564_v11, %v222_v0  ;;  %v364_v31 = vadd.f32 %v6102_v1, %v233_v48 }
  0xf5   :  { %v6089_v2 = vpop.f32.mrf.mxu0 }
  0xf6   :  { %v6105_v7 = vpop.f32.mrf.mxu1  ;;  %v253_v23 = vadd.f32 %v6089_v2, %v5564_v11  ;;  %v358_v60 = vadd.f32 %v357_v5, %v223_v46 }
  0xf7   :  { %v242_v6 = vpop.f32.mrf.mxu0 }
  0xf8   :  { %v369_v3 = vpop.f32.mrf.mxu1 }
  0xf9   :  { %v6112_v8 = vpop.f32.mrf.mxu0 }
  0xfa   :  { %v459_v49 = vadd.f32 %v6112_v8, %v340_v45  ;;  %v243_v8 = vadd.f32 %v5564_v11, %v242_v6 }
  0xfb   :  { %v451_v15 = vpop.f32.mrf.mxu0  ;;  %v6128_v16 = vpop.f32.mrf.mxu1 }
  0xfc   :  { %v452_v28 = vadd.f32 %v451_v15, %v334_v54  ;;  %v584_v38 = vadd.f32 %v6128_v16, %v459_v49  ;;  %v376_v15 = vadd.f32 %v6105_v7, %v253_v23  ;;  %v370_v1 = vadd.f32 %v369_v3, %v243_v8 }
  0xfd   :  { %v6115_v20 = vpop.f32.mrf.mxu0  ;;  %v575_v22 = vpop.f32.mrf.mxu1 }
  0xfe   :  { %v473_v56 = vadd.f32 %v6115_v20, %v352_v51  ;;  %v576_v27 = vadd.f32 %v575_v22, %v452_v28 }
  0xff   :  { %v465_v29 = vpop.f32.mrf.mxu0  ;;  %v6131_v33 = vpop.f32.mrf.mxu1 }
 0x100   :  { %v466_v17 = vadd.f32 %v465_v29, %v346_v40  ;;  %v600_v61 = vadd.f32 %v6131_v33, %v473_v56 }
 0x101   :  { %v6118_v39 = vpop.f32.mrf.mxu0  ;;  %v591_v44 = vpop.f32.mrf.mxu1 }
 0x102   :  { %v487_v62 = vadd.f32 %v6118_v39, %v364_v31  ;;  %v592_v51 = vadd.f32 %v591_v44, %v466_v17 }
 0x103   :  { %v479_v53 = vpop.f32.mrf.mxu0  ;;  %v6134_v24 = vpop.f32.mrf.mxu1 }
 0x104   :  { %v480_v50 = vadd.f32 %v479_v53, %v358_v60  ;;  %v616_v28 = vadd.f32 %v6134_v24, %v487_v62  ;;  %v7567_v62 = vpop.permute.xlu0 %900 }
 0x105   :  { %v6121_v43 = vpop.f32.mrf.mxu0  ;;  %v607_v34 = vpop.f32.mrf.mxu1 }
 0x106   :  { %v501_v46 = vadd.f32 %v6121_v43, %v376_v15  ;;  %v608_v5 = vadd.f32 %v607_v34, %v480_v50 }
 0x107   :  { %v493_v21 = vpop.f32.mrf.mxu0  ;;  %v6137_v55 = vpop.f32.mrf.mxu1 }
 0x108   :  { %v494_v16 = vadd.f32 %v493_v21, %v370_v1  ;;  %v632_v22 = vadd.f32 %v6137_v55, %v501_v46  ;;  %v8660_v1 = vld [vmem:[#allocation10_spill] sm:$0xff]  ;;  %v8664_v46 = vld [vmem:[#allocation17_spill] sm:$0xff] }
 0x109   :  { %v623_v57 = vpop.f32.mrf.mxu1  ;;  %v6144_v58 = vpop.f32.mrf.mxu0 }
 0x10a   :  { %v715_v59 = vadd.f32 %v6144_v58, %v584_v38  ;;  %v624_v39 = vadd.f32 %v623_v57, %v494_v16  ;;  %v8670_v16 = vld [vmem:[#allocation18_spill] sm:$0xff] }
 0x10b   :  { %v708_v37 = vpop.f32.mrf.mxu0  ;;  %v6160_v45 = vpop.f32.mrf.mxu1 }
 0x10c   :  { %v709_v54 = vadd.f32 %v708_v37, %v576_v27  ;;  %v830_v0 = vadd.f32 %v6160_v45, %v715_v59 }
 0x10d   :  { %v6147_v52 = vpop.f32.mrf.mxu0  ;;  %v823_v49 = vpop.f32.mrf.mxu1 }
 0x10e   :  { %7091 = vtanh.f32 %v830_v0  ;;  %v727_v48 = vadd.f32 %v6147_v52, %v600_v61  ;;  %v824_v63 = vadd.f32 %v823_v49, %v709_v54  ;;  %v8659_v49 = vmov 0.0  }
 0x10f   :  { %v720_v40 = vpop.f32.mrf.mxu0  ;;  %v6163_v38 = vpop.f32.mrf.mxu1 }
 0x110   :  { %7093 = vtanh.f32 %v824_v63  ;;  %v721_v31 = vadd.f32 %v720_v40, %v592_v51  ;;  %v842_v2 = vadd.f32 %v6163_v38, %v727_v48  ;;  %v8662_v40 = vld [vmem:[#allocation14_spill] sm:$0xff]  ;;  %v8663_v38 = vld [vmem:[#allocation16_spill] sm:$0xff] }
 0x111   :  { %v6150_v6 = vpop.f32.mrf.mxu0  ;;  %v835_v11 = vpop.f32.mrf.mxu1 }
 0x112   :  { %7095 = vtanh.f32 %v842_v2  ;;  %v739_v23 = vadd.f32 %v6150_v6, %v616_v28  ;;  %v836_v7 = vadd.f32 %v835_v11, %v721_v31  ;;  %v8661_v28 = vld [vmem:[#allocation12_spill] sm:$0xff]  ;;  %v8665_v31 = vld [vmem:[#allocation11_spill] sm:$0xff]  ;;  %v8668_v6 = vld [vmem:[#allocation22_spill] sm:$0xff] }
 0x113   :  { %v732_v20 = vpop.f32.mrf.mxu0  ;;  %v6166_v17 = vpop.f32.mrf.mxu1  ;;  %v8666_v2 = vld [vmem:[#allocation19_spill] sm:$0xff] }
 0x114   :  { %7097 = vtanh.f32 %v836_v7  ;;  %v733_v29 = vadd.f32 %v732_v20, %v608_v5  ;;  %v854_v3 = vadd.f32 %v6166_v17, %v739_v23  ;;  %v8667_v5 = vld [vmem:[#allocation13_spill] sm:$0xff]  ;;  %v8669_v11 = vld [vmem:[#allocation15_spill] sm:$0xff]  ;;  %v8671_v23 = vld [vmem:[#allocation20_spill] sm:$0xff] }
 0x115   :  { %v6153_v24 = vpop.f32.mrf.mxu0  ;;  %v847_v33 = vpop.f32.mrf.mxu1  ;;  %v8672_v7 = vld [vmem:[#allocation21_spill] sm:$0xff]  ;;  %v8673_v20 = vld [vmem:[#allocation23_spill] sm:$0xff]  ;;  %v8674_v17 = vld [vmem:[#allocation24_spill] sm:$0xff] }
 0x116   :  { %7099 = vtanh.f32 %v854_v3  ;;  %v751_v43 = vadd.f32 %v6153_v24, %v632_v22  ;;  %v848_v44 = vadd.f32 %v847_v33, %v733_v29 }
 0x117   :  { %v744_v53 = vpop.f32.mrf.mxu0  ;;  %v6169_v34 = vpop.f32.mrf.mxu1 }
 0x118   :  { %7101 = vtanh.f32 %v848_v44  ;;  %v745_v56 = vadd.f32 %v744_v53, %v624_v39  ;;  %v866_v21 = vadd.f32 %v6169_v34, %v751_v43  ;;  %v7693_v53 = vld [vmem:[%s8607_s5] ss:$0 sm:$0xff] }
 0x119   :  { %v859_v58 = vpop.f32.mrf.mxu1 }
 0x11a   :  { %7103 = vtanh.f32 %v866_v21  ;;  %v860_v27 = vadd.f32 %v859_v58, %v745_v56 }
 0x11b   :  { %v7092_v59 = vpop.eup %7091 }
 0x11c   :  { %879 = vst.msk [vmem:[#allocation2 + $0x8] sm:$0xff] %vm65_vm1, %v7092_v59  ;;  %7105 = vtanh.f32 %v860_v27 }
 0x11d   :  { %v7094_v55 = vpop.eup %7093 }
 0x11e   :  { %878 = vst.msk [vmem:[#allocation2] sm:$0xff] %vm65_vm1, %v7094_v55 }
 0x11f   :  { %v7096_v60 = vpop.eup %7095 }
 0x120   :  { %881 = vst.msk [vmem:[#allocation2 + $0x18] sm:$0xff] %vm65_vm1, %v7096_v60 }
 0x121   :  { %v7098_v57 = vpop.eup %7097 }
 0x122   :  { %880 = vst.msk [vmem:[#allocation2 + $0x10] sm:$0xff] %vm65_vm1, %v7098_v57 }
 0x123   :  { %v7100_v8 = vpop.eup %7099 }
 0x124   :  { %883 = vst.msk [vmem:[#allocation2 + $0x28] sm:$0xff] %vm65_vm1, %v7100_v8 }
 0x125   :  { %v7102_v37 = vpop.eup %7101  ;;  %v898_v45 = vld [vmem:[#allocation2] sm:$0xff] }
 0x126   :  { %882 = vst.msk [vmem:[#allocation2 + $0x20] sm:$0xff] %vm65_vm1, %v7102_v37  ;;  %v903_v61 = vsel %vm65_vm1, %v898_v45, %v7567_v62 }
 0x127   :  { %v7104_v54 = vpop.eup %7103  ;;  %v912_v0 = vsel %vm910_vm3, %v903_v61, 0 }
 0x128   :  { %885 = vst.msk [vmem:[#allocation2 + $0x38] sm:$0xff] %vm65_vm1, %v7104_v54  ;;  %v7575_v15 = vand.u32 4294901760, %v912_v0 }
 0x129   :  { %v7106_v50 = vpop.eup %7105 }
 0x12a   :  { %884 = vst.msk [vmem:[#allocation2 + $0x30] sm:$0xff] %vm65_vm1, %v7106_v50  ;;  %v988_v52 = vsub.f32 %v912_v0, %v7575_v15  ;;  %6206 = vmatmul.mubr.f32.vlgmr.msra.gmra.mxu1 %v7575_v15 }
 0x12b   :  { %6228 = vmatpush3.msra.mxu1 %v7426_v4  ;;  %6243 = vmatprep.mubr.msk.f32.mxu1 %vm7206_vm2, %v8659_v49 }
 0x12c   :  { %v989_v51 = vand.u32 4294901760, %v988_v52  ;;  %6229 = vmatprep.subr.mxu1 %v8659_v49 }
 0x12d   :  { %6230 = vmatpush3.msra.mxu1 %v7431_v10 }
 0x12e   :  { %v990_v48 = vsub.f32 %v988_v52, %v989_v51  ;;  %6231 = vmatprep.subr.mxu1 %v8659_v49 }
 0x12f   :  { %6232 = vmatpush3.msra.mxu1 %v7439_v14 }
 0x130   :  { %v991_v63 = vand.u32 4294901760, %v990_v48  ;;  %6233 = vmatprep.subr.mxu1 %v8659_v49 }
 0x131   :  { %6234 = vmatpush3.msra.mxu1 %v7449_v19 }
 0x132   :  { %6235 = vmatprep.subr.mxu1 %v8659_v49  ;;  %6187 = vmatmul.mubr.f32.vlgmr.msra.gmra.mxu0 %v991_v63 }
 0x133   :  { %6209 = vmatpush3.msra.mxu0 %v7429_v9  ;;  %6236 = vmatpush3.msra.mxu1 %v7463_v26 }
 0x134   :  { %6210 = vmatprep.subr.mxu0 %v8659_v49  ;;  %6237 = vmatprep.subr.mxu1 %v8659_v49 }
 0x135   :  { %6211 = vmatpush3.msra.mxu0 %v7437_v13  ;;  %6238 = vmatpush3.msra.mxu1 %v7471_v30 }
 0x136   :  { %6212 = vmatprep.subr.mxu0 %v8659_v49  ;;  %6239 = vmatprep.subr.mxu1 %v8659_v49 }
 0x137   :  { %6213 = vmatpush3.msra.mxu0 %v7447_v18  ;;  %6240 = vmatpush3.msra.mxu1 %v7488_v36 }
 0x138   :  { %6214 = vmatprep.subr.mxu0 %v8659_v49  ;;  %6241 = vmatprep.subr.mxu1 %v8659_v49 }
 0x139   :  { %6215 = vmatpush3.msra.mxu0 %v7460_v25  ;;  %6242 = vmatpush3.msra.mxu1 %v7505_v42 }
 0x13a   :  { %6216 = vmatprep.subr.mxu0 %v8659_v49  ;;  %6244 = vmatmul.mubr.f32.vlgmr.msra.gmra.mxu1 %v989_v51 }
 0x13b   :  { %6265 = vmatprep.subr.mxu1 %v8659_v49  ;;  %6217 = vmatpush3.msra.mxu0 %v7478_v32 }
 0x13c   :  { %6266 = vmatpush3.msra.mxu1 %v7426_v4  ;;  %6218 = vmatprep.subr.mxu0 %v8659_v49 }
 0x13d   :  { %6267 = vmatprep.subr.mxu1 %v8659_v49  ;;  %6219 = vmatpush3.msra.mxu0 %v7486_v35 }
 0x13e   :  { %6268 = vmatpush3.msra.mxu1 %v7431_v10  ;;  %6220 = vmatprep.subr.mxu0 %v8659_v49 }
 0x13f   :  { %6269 = vmatprep.subr.mxu1 %v8659_v49  ;;  %6221 = vmatpush3.msra.mxu0 %v7503_v41 }
 0x140   :  { %6270 = vmatpush3.msra.mxu1 %v7439_v14  ;;  %6222 = vmatprep.subr.mxu0 %v8659_v49 }
 0x141   :  { %6271 = vmatprep.subr.mxu1 %v8659_v49  ;;  %6223 = vmatpush3.msra.mxu0 %v7520_v47 }
 0x142   :  { %6224 = vmatprep.mubr.msk.f32.mxu0 %vm7206_vm2, %v8659_v49  ;;  %6272 = vmatpush3.msra.mxu1 %v7449_v19 }
 0x143   :  { %6225 = vmatmul.mubr.f32.vlgmr.msra.gmra.mxu0 %v988_v52  ;;  %6246 = vmatprep.subr.mxu0 %v8659_v49 }
 0x144   :  { %6273 = vmatprep.subr.mxu1 %v8659_v49  ;;  %6247 = vmatpush3.msra.mxu0 %v7434_v12 }
 0x145   :  { %6274 = vmatpush3.msra.mxu1 %v7463_v26  ;;  %6248 = vmatprep.subr.mxu0 %v8659_v49 }
 0x146   :  { %6275 = vmatprep.subr.mxu1 %v8659_v49  ;;  %6249 = vmatpush3.msra.mxu0 %v8660_v1 }
 0x147   :  { %6276 = vmatpush3.msra.mxu1 %v7471_v30  ;;  %6250 = vmatprep.subr.mxu0 %v8659_v49 }
 0x148   :  { %6277 = vmatprep.subr.mxu1 %v8659_v49  ;;  %6251 = vmatpush3.msra.mxu0 %v8661_v28 }
 0x149   :  { %6278 = vmatpush3.msra.mxu1 %v7488_v36  ;;  %6252 = vmatprep.subr.mxu0 %v8659_v49 }
 0x14a   :  { %6279 = vmatprep.subr.mxu1 %v8659_v49  ;;  %6253 = vmatpush3.msra.mxu0 %v8662_v40 }
 0x14b   :  { %6280 = vmatpush3.msra.mxu1 %v7505_v42  ;;  %6281 = vmatprep.mubr.msk.f32.mxu1 %vm7206_vm2, %v8659_v49 }
 0x14c   :  { %6254 = vmatprep.subr.mxu0 %v8659_v49  ;;  %6282 = vmatmul.mubr.f32.vlgmr.msra.gmra.mxu1 %v7575_v15 }
 0x14d   :  { %6255 = vmatpush3.msra.mxu0 %v8663_v38  ;;  %6262 = vmatprep.mubr.msk.f32.mxu0 %vm7206_vm2, %v8659_v49 }
 0x14e   :  { %6256 = vmatprep.subr.mxu0 %v8659_v49  ;;  %6303 = vmatprep.subr.mxu1 %v8659_v49 }
 0x14f   :  { %6257 = vmatpush3.msra.mxu0 %v8664_v46  ;;  %6304 = vmatpush3.msra.mxu1 %v8665_v31 }
 0x150   :  { %6258 = vmatprep.subr.mxu0 %v8659_v49  ;;  %6305 = vmatprep.subr.mxu1 %v8659_v49 }
 0x151   :  { %6259 = vmatpush3.msra.mxu0 %v8666_v2  ;;  %6306 = vmatpush3.msra.mxu1 %v8667_v5 }
 0x152   :  { %6260 = vmatprep.subr.mxu0 %v8659_v49  ;;  %6307 = vmatprep.subr.mxu1 %v8659_v49 }
 0x153   :  { %6261 = vmatpush3.msra.mxu0 %v8668_v6  ;;  %6308 = vmatpush3.msra.mxu1 %v8669_v11 }
 0x154   :  { %6263 = vmatmul.mubr.f32.vlgmr.msra.gmra.mxu0 %v7575_v15  ;;  %6309 = vmatprep.subr.mxu1 %v8659_v49 }
 0x155   :  { %6310 = vmatpush3.msra.mxu1 %v8670_v16  ;;  %6284 = vmatprep.subr.mxu0 %v8659_v49 }
 0x156   :  { %6311 = vmatprep.subr.mxu1 %v8659_v49  ;;  %6285 = vmatpush3.msra.mxu0 %v7426_v4 }
 0x157   :  { %6312 = vmatpush3.msra.mxu1 %v8671_v23  ;;  %6286 = vmatprep.subr.mxu0 %v8659_v49 }
 0x158   :  { %6313 = vmatprep.subr.mxu1 %v8659_v49  ;;  %6287 = vmatpush3.msra.mxu0 %v7431_v10 }
 0x159   :  { %6314 = vmatpush3.msra.mxu1 %v8672_v7  ;;  %6288 = vmatprep.subr.mxu0 %v8659_v49 }
 0x15a   :  { %6315 = vmatprep.subr.mxu1 %v8659_v49  ;;  %6289 = vmatpush3.msra.mxu0 %v7439_v14 }
 0x15b   :  { %6316 = vmatpush3.msra.mxu1 %v8673_v20  ;;  %6290 = vmatprep.subr.mxu0 %v8659_v49 }
 0x15c   :  { %6317 = vmatprep.subr.mxu1 %v8659_v49  ;;  %6291 = vmatpush3.msra.mxu0 %v7449_v19 }
 0x15d   :  { %6318 = vmatpush3.msra.mxu1 %v8674_v17  ;;  %6292 = vmatprep.subr.mxu0 %v8659_v49 }
 0x15e   :  { %6319 = vmatprep.mubr.msk.f32.mxu1 %vm7206_vm2, %v8659_v49  ;;  %6341 = vmatprep.subr.mxu1 %v8659_v49 }
 0x15f   :  { %6293 = vmatpush3.msra.mxu0 %v7463_v26  ;;  %6300 = vmatprep.mubr.msk.f32.mxu0 %vm7206_vm2, %v8659_v49 }
 0x160   :  { %6294 = vmatprep.subr.mxu0 %v8659_v49 }
 0x161   :  { %6295 = vmatpush3.msra.mxu0 %v7471_v30 }
 0x162   :  { %6296 = vmatprep.subr.mxu0 %v8659_v49 }
 0x163   :  { %6297 = vmatpush3.msra.mxu0 %v7488_v36 }
 0x164   :  { %6298 = vmatprep.subr.mxu0 %v8659_v49 }
 0x165   :  { %6299 = vmatpush3.msra.mxu0 %v7505_v42 }
 0x166   :  { %6322 = vmatprep.subr.mxu0 %v8659_v49 }
 0x1ea   :  { %v1104_v22 = vpop.f32.mrf.mxu1 }
 0x1ec   :  { %v6207_v29 = vpop.f32.mrf.mxu1 }
 0x1f2   :  { %v993_v3 = vpop.f32.mrf.mxu0 }
 0x1f3   :  { %v994_v34 = vadd.f32 %v7693_v53, %v993_v3 }
 0x1f4   :  { %v6188_v24 = vpop.f32.mrf.mxu0 }
 0x1f5   :  { %v1105_v21 = vadd.f32 %v1104_v22, %v994_v34  ;;  %v1497_v24 = vld [vmem:[#allocation2 + $0x8] sm:$0xff] }
 0x1fa   :  { %v1273_v33 = vpop.f32.mrf.mxu1 }
 0x1fc   :  { %v6245_v39 = vpop.f32.mrf.mxu1 }
 0x203   :  { %v1192_v43 = vpop.f32.mrf.mxu0 }
 0x204   :  { %v1193_v27 = vadd.f32 %v1192_v43, %v1105_v21 }
 0x205   :  { %v6226_v44 = vpop.f32.mrf.mxu0 }
 0x206   :  { %v1274_v59 = vadd.f32 %v1273_v33, %v1193_v27 }
 0x20c   :  { %v1447_v56 = vpop.f32.mrf.mxu1 }
 0x20e   :  { %v6283_v58 = vpop.f32.mrf.mxu1 }
 0x214   :  { %v1368_v55 = vpop.f32.mrf.mxu0 }
 0x215   :  { %v1369_v60 = vadd.f32 %v1368_v55, %v1274_v59 }
 0x216   :  { %v6264_v57 = vpop.f32.mrf.mxu0 }
 0x217   :  { %v1448_v8 = vadd.f32 %v1447_v56, %v1369_v60 }
 0x219   :  { %1458 = vrot.lane.b32.xlu0 %v1448_v8, %s7204_s27  ;;  %v5566_v37 = vmul.f32 -1.442695, %v1448_v8 }
 0x21b   :  { %7107 = vpow2.f32 %v5566_v37 }
 0x228   :  { %v7108_v45 = vpop.eup %7107 }
 0x229   :  { %v1454_v61 = vadd.f32 1.0, %v7108_v45 }
 0x22b   :  { %7109 = vrcp.f32 %v1454_v61 }
 0x238   :  { %v7110_v54 = vpop.eup %7109 }
 0x239   :  { %v1468_v48 = vsub.f32 1.0, %v7110_v54  ;;  %v1474_v22 = vmul.f32 %v7110_v54, %v7567_v62 }
 0x28b   :  { %v1459_v0 = vpop.permute.xlu0 %1458 }
 0x28c   :  { %v1461_v15 = vmul.f32 %v7110_v54, %v1459_v0 }
 0x28e   :  { %1463 = vrot.lane.b32.xlu1 %v1461_v15, %s7207_s10 }
 0x300   :  { %v1464_v50 = vpop.permute.xlu1 %1463 }
 0x301   :  { %v1466_v52 = vadd.f32 %v1464_v50, %v1448_v8 }
 0x303   :  { %7111 = vtanh.f32 %v1466_v52 }
 0x310   :  { %v7112_v51 = vpop.eup %7111 }
 0x311   :  { %1470 = vrot.lane.b32.xlu1 %v7112_v51, %s7208_s11 }
 0x383   :  { %v1471_v63 = vpop.permute.xlu1 %1470 }
 0x384   :  { %v1473_v29 = vmul.f32 %v1471_v63, %v1468_v48 }
 0x386   :  { %v7700_v3 = vadd.f32 %v1474_v22, %v1473_v29 }
 0x388   :  { %v1498_v33 = vsel %vm65_vm1, %v1497_v24, %v7700_v3 }
 0x389   :  { %v1500_v39 = vsel %vm910_vm3, %v1498_v33, 0 }
 0x38a   :  { %v7705_v43 = vand.u32 4294901760, %v1500_v39 }
 0x38c   :  { %6320 = vmatmul.mubr.f32.vlgmr.msra.gmra.mxu1 %v7705_v43  ;;  %v1576_v44 = vsub.f32 %v1500_v39, %v7705_v43 }
 0x38d   :  { %6342 = vmatpush3.msra.mxu1 %v7426_v4  ;;  %6357 = vmatprep.mubr.msk.f32.mxu1 %vm7206_vm2, %v8659_v49 }
 0x38e   :  { %6343 = vmatprep.subr.mxu1 %v8659_v49  ;;  %v1577_v62 = vand.u32 4294901760, %v1576_v44 }
 0x38f   :  { %6344 = vmatpush3.msra.mxu1 %v7431_v10 }
 0x390   :  { %6345 = vmatprep.subr.mxu1 %v8659_v49  ;;  %v1578_v34 = vsub.f32 %v1576_v44, %v1577_v62 }
 0x391   :  { %6346 = vmatpush3.msra.mxu1 %v7439_v14 }
 0x392   :  { %6347 = vmatprep.subr.mxu1 %v8659_v49  ;;  %v1579_v56 = vand.u32 4294901760, %v1578_v34 }
 0x393   :  { %6348 = vmatpush3.msra.mxu1 %v7449_v19 }
 0x394   :  { %6349 = vmatprep.subr.mxu1 %v8659_v49  ;;  %6301 = vmatmul.mubr.f32.vlgmr.msra.gmra.mxu0 %v1579_v56 }
 0x395   :  { %6323 = vmatpush3.msra.mxu0 %v7429_v9  ;;  %6350 = vmatpush3.msra.mxu1 %v7463_v26 }
 0x396   :  { %6324 = vmatprep.subr.mxu0 %v8659_v49  ;;  %6351 = vmatprep.subr.mxu1 %v8659_v49 }
 0x397   :  { %6325 = vmatpush3.msra.mxu0 %v7437_v13  ;;  %6352 = vmatpush3.msra.mxu1 %v7471_v30 }
 0x398   :  { %6326 = vmatprep.subr.mxu0 %v8659_v49  ;;  %6353 = vmatprep.subr.mxu1 %v8659_v49 }
 0x399   :  { %6327 = vmatpush3.msra.mxu0 %v7447_v18  ;;  %6354 = vmatpush3.msra.mxu1 %v7488_v36 }
 0x39a   :  { %6328 = vmatprep.subr.mxu0 %v8659_v49  ;;  %6355 = vmatprep.subr.mxu1 %v8659_v49 }
 0x39b   :  { %6329 = vmatpush3.msra.mxu0 %v7460_v25  ;;  %6356 = vmatpush3.msra.mxu1 %v7505_v42 }
 0x39c   :  { %6330 = vmatprep.subr.mxu0 %v8659_v49  ;;  %6358 = vmatmul.mubr.f32.vlgmr.msra.gmra.mxu1 %v1577_v62 }
 0x39d   :  { %6379 = vmatprep.subr.mxu1 %v8659_v49  ;;  %6331 = vmatpush3.msra.mxu0 %v7478_v32 }
 0x39e   :  { %6380 = vmatpush3.msra.mxu1 %v7426_v4  ;;  %6332 = vmatprep.subr.mxu0 %v8659_v49 }
 0x39f   :  { %6381 = vmatprep.subr.mxu1 %v8659_v49  ;;  %6333 = vmatpush3.msra.mxu0 %v7486_v35 }
 0x3a0   :  { %6382 = vmatpush3.msra.mxu1 %v7431_v10  ;;  %6334 = vmatprep.subr.mxu0 %v8659_v49 }
 0x3a1   :  { %6383 = vmatprep.subr.mxu1 %v8659_v49  ;;  %6335 = vmatpush3.msra.mxu0 %v7503_v41 }
 0x3a2   :  { %6384 = vmatpush3.msra.mxu1 %v7439_v14  ;;  %6336 = vmatprep.subr.mxu0 %v8659_v49 }
 0x3a3   :  { %6385 = vmatprep.subr.mxu1 %v8659_v49  ;;  %6337 = vmatpush3.msra.mxu0 %v7520_v47 }
 0x3a4   :  { %6338 = vmatprep.mubr.msk.f32.mxu0 %vm7206_vm2, %v8659_v49  ;;  %6386 = vmatpush3.msra.mxu1 %v7449_v19 }
 0x3a5   :  { %6339 = vmatmul.mubr.f32.vlgmr.msra.gmra.mxu0 %v1576_v44  ;;  %6360 = vmatprep.subr.mxu0 %v8659_v49 }
 0x3a6   :  { %6387 = vmatprep.subr.mxu1 %v8659_v49  ;;  %6361 = vmatpush3.msra.mxu0 %v7434_v12 }
 0x3a7   :  { %6388 = vmatpush3.msra.mxu1 %v7463_v26  ;;  %6362 = vmatprep.subr.mxu0 %v8659_v49 }
 0x3a8   :  { %6389 = vmatprep.subr.mxu1 %v8659_v49  ;;  %6363 = vmatpush3.msra.mxu0 %v8660_v1 }
 0x3a9   :  { %6390 = vmatpush3.msra.mxu1 %v7471_v30  ;;  %6364 = vmatprep.subr.mxu0 %v8659_v49 }
 0x3aa   :  { %6391 = vmatprep.subr.mxu1 %v8659_v49  ;;  %6365 = vmatpush3.msra.mxu0 %v8661_v28 }
 0x3ab   :  { %6392 = vmatpush3.msra.mxu1 %v7488_v36  ;;  %6366 = vmatprep.subr.mxu0 %v8659_v49 }
 0x3ac   :  { %6393 = vmatprep.subr.mxu1 %v8659_v49  ;;  %6367 = vmatpush3.msra.mxu0 %v8662_v40 }
 0x3ad   :  { %6394 = vmatpush3.msra.mxu1 %v7505_v42  ;;  %6395 = vmatprep.mubr.msk.f32.mxu1 %vm7206_vm2, %v8659_v49 }
 0x3ae   :  { %6368 = vmatprep.subr.mxu0 %v8659_v49  ;;  %6396 = vmatmul.mubr.f32.vlgmr.msra.gmra.mxu1 %v7705_v43 }
 0x3af   :  { %6369 = vmatpush3.msra.mxu0 %v8663_v38  ;;  %6376 = vmatprep.mubr.msk.f32.mxu0 %vm7206_vm2, %v8659_v49 }
 0x3b0   :  { %6370 = vmatprep.subr.mxu0 %v8659_v49  ;;  %6417 = vmatprep.subr.mxu1 %v8659_v49 }
 0x3b1   :  { %6371 = vmatpush3.msra.mxu0 %v8664_v46  ;;  %6418 = vmatpush3.msra.mxu1 %v8665_v31 }
 0x3b2   :  { %6372 = vmatprep.subr.mxu0 %v8659_v49  ;;  %6419 = vmatprep.subr.mxu1 %v8659_v49 }
 0x3b3   :  { %6373 = vmatpush3.msra.mxu0 %v8666_v2  ;;  %6420 = vmatpush3.msra.mxu1 %v8667_v5 }
 0x3b4   :  { %6374 = vmatprep.subr.mxu0 %v8659_v49  ;;  %6421 = vmatprep.subr.mxu1 %v8659_v49 }
 0x3b5   :  { %6375 = vmatpush3.msra.mxu0 %v8668_v6  ;;  %6422 = vmatpush3.msra.mxu1 %v8669_v11 }
 0x3b6   :  { %6377 = vmatmul.mubr.f32.vlgmr.msra.gmra.mxu0 %v7705_v43  ;;  %6423 = vmatprep.subr.mxu1 %v8659_v49 }
 0x3b7   :  { %6424 = vmatpush3.msra.mxu1 %v8670_v16  ;;  %6398 = vmatprep.subr.mxu0 %v8659_v49 }
 0x3b8   :  { %6425 = vmatprep.subr.mxu1 %v8659_v49  ;;  %6399 = vmatpush3.msra.mxu0 %v7426_v4 }
 0x3b9   :  { %6426 = vmatpush3.msra.mxu1 %v8671_v23  ;;  %6400 = vmatprep.subr.mxu0 %v8659_v49 }
 0x3ba   :  { %6427 = vmatprep.subr.mxu1 %v8659_v49  ;;  %6401 = vmatpush3.msra.mxu0 %v7431_v10 }
 0x3bb   :  { %6428 = vmatpush3.msra.mxu1 %v8672_v7  ;;  %6402 = vmatprep.subr.mxu0 %v8659_v49 }
 0x3bc   :  { %6429 = vmatprep.subr.mxu1 %v8659_v49  ;;  %6403 = vmatpush3.msra.mxu0 %v7439_v14 }
 0x3bd   :  { %6430 = vmatpush3.msra.mxu1 %v8673_v20  ;;  %6404 = vmatprep.subr.mxu0 %v8659_v49 }
 0x3be   :  { %6431 = vmatprep.subr.mxu1 %v8659_v49  ;;  %6405 = vmatpush3.msra.mxu0 %v7449_v19 }
 0x3bf   :  { %6432 = vmatpush3.msra.mxu1 %v8674_v17  ;;  %6406 = vmatprep.subr.mxu0 %v8659_v49 }
 0x3c0   :  { %6433 = vmatprep.mubr.msk.f32.mxu1 %vm7206_vm2, %v8659_v49  ;;  %6455 = vmatprep.subr.mxu1 %v8659_v49 }
 0x3c1   :  { %6407 = vmatpush3.msra.mxu0 %v7463_v26  ;;  %6414 = vmatprep.mubr.msk.f32.mxu0 %vm7206_vm2, %v8659_v49 }
 0x3c2   :  { %6408 = vmatprep.subr.mxu0 %v8659_v49 }
 0x3c3   :  { %6409 = vmatpush3.msra.mxu0 %v7471_v30 }
 0x3c4   :  { %6410 = vmatprep.subr.mxu0 %v8659_v49 }
 0x3c5   :  { %6411 = vmatpush3.msra.mxu0 %v7488_v36 }
 0x3c6   :  { %6412 = vmatprep.subr.mxu0 %v8659_v49 }
 0x3c7   :  { %6413 = vmatpush3.msra.mxu0 %v7505_v42 }
 0x3c8   :  { %6436 = vmatprep.subr.mxu0 %v8659_v49 }
 0x44c   :  { %v1692_v21 = vpop.f32.mrf.mxu1 }
 0x44e   :  { %v6321_v58 = vpop.f32.mrf.mxu1 }
 0x454   :  { %v1581_v27 = vpop.f32.mrf.mxu0 }
 0x455   :  { %v1582_v37 = vadd.f32 %v7693_v53, %v1581_v27 }
 0x456   :  { %v6302_v59 = vpop.f32.mrf.mxu0 }
 0x457   :  { %v1693_v61 = vadd.f32 %v1692_v21, %v1582_v37  ;;  %v2076_v59 = vld [vmem:[#allocation2 + $0x10] sm:$0xff] }
 0x45c   :  { %v1861_v55 = vpop.f32.mrf.mxu1 }
 0x45e   :  { %v6359_v60 = vpop.f32.mrf.mxu1 }
 0x465   :  { %v1780_v57 = vpop.f32.mrf.mxu0 }
 0x466   :  { %v1781_v0 = vadd.f32 %v1780_v57, %v1693_v61 }
 0x467   :  { %v6340_v8 = vpop.f32.mrf.mxu0 }
 0x468   :  { %v1862_v15 = vadd.f32 %v1861_v55, %v1781_v0 }
 0x46e   :  { %v2035_v45 = vpop.f32.mrf.mxu1 }
 0x470   :  { %v6397_v54 = vpop.f32.mrf.mxu1 }
 0x476   :  { %v1956_v50 = vpop.f32.mrf.mxu0 }
 0x477   :  { %v1957_v52 = vadd.f32 %v1956_v50, %v1862_v15 }
 0x478   :  { %v6378_v51 = vpop.f32.mrf.mxu0 }
 0x479   :  { %v2036_v48 = vadd.f32 %v2035_v45, %v1957_v52 }
 0x47b   :  { %2046 = vrot.lane.b32.xlu0 %v2036_v48, %s7204_s27  ;;  %v5568_v63 = vmul.f32 -1.442695, %v2036_v48 }
 0x47d   :  { %7113 = vpow2.f32 %v5568_v63 }
 0x48a   :  { %v7114_v22 = vpop.eup %7113 }
 0x48b   :  { %v2042_v29 = vadd.f32 1.0, %v7114_v22 }
 0x48d   :  { %7115 = vrcp.f32 %v2042_v29 }
 0x49a   :  { %v7116_v24 = vpop.eup %7115 }
 0x49b   :  { %v2056_v34 = vsub.f32 1.0, %v7116_v24  ;;  %v2062_v21 = vmul.f32 %v7116_v24, %v7700_v3 }
 0x4ed   :  { %v2047_v33 = vpop.permute.xlu0 %2046 }
 0x4ee   :  { %v2049_v39 = vmul.f32 %v7116_v24, %v2047_v33 }
 0x4f0   :  { %2051 = vrot.lane.b32.xlu1 %v2049_v39, %s7207_s10 }
 0x562   :  { %v2052_v43 = vpop.permute.xlu1 %2051 }
 0x563   :  { %v2054_v44 = vadd.f32 %v2052_v43, %v2036_v48 }
 0x565   :  { %7117 = vtanh.f32 %v2054_v44 }
 0x572   :  { %v7118_v62 = vpop.eup %7117 }
 0x573   :  { %2058 = vrot.lane.b32.xlu0 %v7118_v62, %s7208_s11 }
 0x5e5   :  { %v2059_v56 = vpop.permute.xlu0 %2058 }
 0x5e6   :  { %v2061_v58 = vmul.f32 %v2059_v56, %v2056_v34 }
 0x5e8   :  { %v7824_v27 = vadd.f32 %v2062_v21, %v2061_v58 }
 0x5ea   :  { %v2077_v55 = vsel %vm65_vm1, %v2076_v59, %v7824_v27 }
 0x5eb   :  { %v2079_v60 = vsel %vm910_vm3, %v2077_v55, 0 }
 0x5ec   :  { %v7829_v57 = vand.u32 4294901760, %v2079_v60 }
 0x5ee   :  { %6434 = vmatmul.mubr.f32.vlgmr.msra.gmra.mxu1 %v7829_v57  ;;  %v2155_v8 = vsub.f32 %v2079_v60, %v7829_v57 }
 0x5ef   :  { %6456 = vmatpush3.msra.mxu1 %v7426_v4  ;;  %6471 = vmatprep.mubr.msk.f32.mxu1 %vm7206_vm2, %v8659_v49 }
 0x5f0   :  { %6457 = vmatprep.subr.mxu1 %v8659_v49  ;;  %v2156_v37 = vand.u32 4294901760, %v2155_v8 }
 0x5f1   :  { %6458 = vmatpush3.msra.mxu1 %v7431_v10 }
 0x5f2   :  { %6459 = vmatprep.subr.mxu1 %v8659_v49  ;;  %v2157_v45 = vsub.f32 %v2155_v8, %v2156_v37 }
 0x5f3   :  { %6460 = vmatpush3.msra.mxu1 %v7439_v14 }
 0x5f4   :  { %6461 = vmatprep.subr.mxu1 %v8659_v49  ;;  %v2158_v61 = vand.u32 4294901760, %v2157_v45 }
 0x5f5   :  { %6462 = vmatpush3.msra.mxu1 %v7449_v19 }
 0x5f6   :  { %6463 = vmatprep.subr.mxu1 %v8659_v49  ;;  %6415 = vmatmul.mubr.f32.vlgmr.msra.gmra.mxu0 %v2158_v61 }
 0x5f7   :  { %6437 = vmatpush3.msra.mxu0 %v7429_v9  ;;  %6464 = vmatpush3.msra.mxu1 %v7463_v26 }
 0x5f8   :  { %6438 = vmatprep.subr.mxu0 %v8659_v49  ;;  %6465 = vmatprep.subr.mxu1 %v8659_v49 }
 0x5f9   :  { %6439 = vmatpush3.msra.mxu0 %v7437_v13  ;;  %6466 = vmatpush3.msra.mxu1 %v7471_v30 }
 0x5fa   :  { %6440 = vmatprep.subr.mxu0 %v8659_v49  ;;  %6467 = vmatprep.subr.mxu1 %v8659_v49 }
 0x5fb   :  { %6441 = vmatpush3.msra.mxu0 %v7447_v18  ;;  %6468 = vmatpush3.msra.mxu1 %v7488_v36 }
 0x5fc   :  { %6442 = vmatprep.subr.mxu0 %v8659_v49  ;;  %6469 = vmatprep.subr.mxu1 %v8659_v49 }
 0x5fd   :  { %6443 = vmatpush3.msra.mxu0 %v7460_v25  ;;  %6470 = vmatpush3.msra.mxu1 %v7505_v42 }
 0x5fe   :  { %6444 = vmatprep.subr.mxu0 %v8659_v49  ;;  %6472 = vmatmul.mubr.f32.vlgmr.msra.gmra.mxu1 %v2156_v37 }
 0x5ff   :  { %6493 = vmatprep.subr.mxu1 %v8659_v49  ;;  %6445 = vmatpush3.msra.mxu0 %v7478_v32 }
 0x600   :  { %6494 = vmatpush3.msra.mxu1 %v7426_v4  ;;  %6446 = vmatprep.subr.mxu0 %v8659_v49 }
 0x601   :  { %6495 = vmatprep.subr.mxu1 %v8659_v49  ;;  %6447 = vmatpush3.msra.mxu0 %v7486_v35 }
 0x602   :  { %6496 = vmatpush3.msra.mxu1 %v7431_v10  ;;  %6448 = vmatprep.subr.mxu0 %v8659_v49 }
 0x603   :  { %6497 = vmatprep.subr.mxu1 %v8659_v49  ;;  %6449 = vmatpush3.msra.mxu0 %v7503_v41 }
 0x604   :  { %6498 = vmatpush3.msra.mxu1 %v7439_v14  ;;  %6450 = vmatprep.subr.mxu0 %v8659_v49 }
 0x605   :  { %6499 = vmatprep.subr.mxu1 %v8659_v49  ;;  %6451 = vmatpush3.msra.mxu0 %v7520_v47 }
 0x606   :  { %6452 = vmatprep.mubr.msk.f32.mxu0 %vm7206_vm2, %v8659_v49  ;;  %6500 = vmatpush3.msra.mxu1 %v7449_v19 }
 0x607   :  { %6453 = vmatmul.mubr.f32.vlgmr.msra.gmra.mxu0 %v2155_v8  ;;  %6474 = vmatprep.subr.mxu0 %v8659_v49 }
 0x608   :  { %6501 = vmatprep.subr.mxu1 %v8659_v49  ;;  %6475 = vmatpush3.msra.mxu0 %v7434_v12 }
 0x609   :  { %6502 = vmatpush3.msra.mxu1 %v7463_v26  ;;  %6476 = vmatprep.subr.mxu0 %v8659_v49 }
 0x60a   :  { %6503 = vmatprep.subr.mxu1 %v8659_v49  ;;  %6477 = vmatpush3.msra.mxu0 %v8660_v1 }
 0x60b   :  { %6504 = vmatpush3.msra.mxu1 %v7471_v30  ;;  %6478 = vmatprep.subr.mxu0 %v8659_v49 }
 0x60c   :  { %6505 = vmatprep.subr.mxu1 %v8659_v49  ;;  %6479 = vmatpush3.msra.mxu0 %v8661_v28 }
 0x60d   :  { %6506 = vmatpush3.msra.mxu1 %v7488_v36  ;;  %6480 = vmatprep.subr.mxu0 %v8659_v49 }
 0x60e   :  { %6507 = vmatprep.subr.mxu1 %v8659_v49  ;;  %6481 = vmatpush3.msra.mxu0 %v8662_v40 }
 0x60f   :  { %6508 = vmatpush3.msra.mxu1 %v7505_v42  ;;  %6509 = vmatprep.mubr.msk.f32.mxu1 %vm7206_vm2, %v8659_v49 }
 0x610   :  { %6482 = vmatprep.subr.mxu0 %v8659_v49  ;;  %6510 = vmatmul.mubr.f32.vlgmr.msra.gmra.mxu1 %v7829_v57 }
 0x611   :  { %6483 = vmatpush3.msra.mxu0 %v8663_v38  ;;  %6490 = vmatprep.mubr.msk.f32.mxu0 %vm7206_vm2, %v8659_v49 }
 0x612   :  { %6484 = vmatprep.subr.mxu0 %v8659_v49  ;;  %6531 = vmatprep.subr.mxu1 %v8659_v49 }
 0x613   :  { %6485 = vmatpush3.msra.mxu0 %v8664_v46  ;;  %6532 = vmatpush3.msra.mxu1 %v8665_v31 }
 0x614   :  { %6486 = vmatprep.subr.mxu0 %v8659_v49  ;;  %6533 = vmatprep.subr.mxu1 %v8659_v49 }
 0x615   :  { %6487 = vmatpush3.msra.mxu0 %v8666_v2  ;;  %6534 = vmatpush3.msra.mxu1 %v8667_v5 }
 0x616   :  { %6488 = vmatprep.subr.mxu0 %v8659_v49  ;;  %6535 = vmatprep.subr.mxu1 %v8659_v49 }
 0x617   :  { %6489 = vmatpush3.msra.mxu0 %v8668_v6  ;;  %6536 = vmatpush3.msra.mxu1 %v8669_v11 }
 0x618   :  { %6491 = vmatmul.mubr.f32.vlgmr.msra.gmra.mxu0 %v7829_v57  ;;  %6537 = vmatprep.subr.mxu1 %v8659_v49 }
 0x619   :  { %6538 = vmatpush3.msra.mxu1 %v8670_v16  ;;  %6512 = vmatprep.subr.mxu0 %v8659_v49 }
 0x61a   :  { %6539 = vmatprep.subr.mxu1 %v8659_v49  ;;  %6513 = vmatpush3.msra.mxu0 %v7426_v4 }
 0x61b   :  { %6540 = vmatpush3.msra.mxu1 %v8671_v23  ;;  %6514 = vmatprep.subr.mxu0 %v8659_v49 }
 0x61c   :  { %6541 = vmatprep.subr.mxu1 %v8659_v49  ;;  %6515 = vmatpush3.msra.mxu0 %v7431_v10 }
 0x61d   :  { %6542 = vmatpush3.msra.mxu1 %v8672_v7  ;;  %6516 = vmatprep.subr.mxu0 %v8659_v49 }
 0x61e   :  { %6543 = vmatprep.subr.mxu1 %v8659_v49  ;;  %6517 = vmatpush3.msra.mxu0 %v7439_v14 }
 0x61f   :  { %6544 = vmatpush3.msra.mxu1 %v8673_v20  ;;  %6518 = vmatprep.subr.mxu0 %v8659_v49 }
 0x620   :  { %6545 = vmatprep.subr.mxu1 %v8659_v49  ;;  %6519 = vmatpush3.msra.mxu0 %v7449_v19 }
 0x621   :  { %6546 = vmatpush3.msra.mxu1 %v8674_v17  ;;  %6520 = vmatprep.subr.mxu0 %v8659_v49 }
 0x622   :  { %6547 = vmatprep.mubr.msk.f32.mxu1 %vm7206_vm2, %v8659_v49  ;;  %6569 = vmatprep.subr.mxu1 %v8659_v49 }
 0x623   :  { %6521 = vmatpush3.msra.mxu0 %v7463_v26  ;;  %6528 = vmatprep.mubr.msk.f32.mxu0 %vm7206_vm2, %v8659_v49 }
 0x624   :  { %6522 = vmatprep.subr.mxu0 %v8659_v49 }
 0x625   :  { %6523 = vmatpush3.msra.mxu0 %v7471_v30 }
 0x626   :  { %6524 = vmatprep.subr.mxu0 %v8659_v49 }
 0x627   :  { %6525 = vmatpush3.msra.mxu0 %v7488_v36 }
 0x628   :  { %6526 = vmatprep.subr.mxu0 %v8659_v49 }
 0x629   :  { %6527 = vmatpush3.msra.mxu0 %v7505_v42 }
 0x62a   :  { %6550 = vmatprep.subr.mxu0 %v8659_v49 }
 0x6ae   :  { %v2271_v54 = vpop.f32.mrf.mxu1 }
 0x6b0   :  { %v6435_v0 = vpop.f32.mrf.mxu1 }
 0x6b6   :  { %v2160_v15 = vpop.f32.mrf.mxu0 }
 0x6b7   :  { %v2161_v22 = vadd.f32 %v7693_v53, %v2160_v15 }
 0x6b8   :  { %v6416_v50 = vpop.f32.mrf.mxu0 }
 0x6b9   :  { %v2272_v24 = vadd.f32 %v2271_v54, %v2161_v22 }
 0x6be   :  { %v2440_v52 = vpop.f32.mrf.mxu1 }
 0x6c0   :  { %v6473_v51 = vpop.f32.mrf.mxu1 }
 0x6c7   :  { %v2359_v48 = vpop.f32.mrf.mxu0 }
 0x6c8   :  { %v2360_v39 = vadd.f32 %v2359_v48, %v2272_v24 }
 0x6c9   :  { %v6454_v63 = vpop.f32.mrf.mxu0 }
 0x6ca   :  { %v2441_v43 = vadd.f32 %v2440_v52, %v2360_v39  ;;  %v2655_v52 = vld [vmem:[#allocation2 + $0x18] sm:$0xff] }
 0x6d0   :  { %v2614_v29 = vpop.f32.mrf.mxu1 }
 0x6d2   :  { %v6511_v33 = vpop.f32.mrf.mxu1 }
 0x6d8   :  { %v2535_v44 = vpop.f32.mrf.mxu0 }
 0x6d9   :  { %v2536_v62 = vadd.f32 %v2535_v44, %v2441_v43 }
 0x6da   :  { %v6492_v34 = vpop.f32.mrf.mxu0 }
 0x6db   :  { %v2615_v56 = vadd.f32 %v2614_v29, %v2536_v62 }
 0x6dd   :  { %2625 = vrot.lane.b32.xlu1 %v2615_v56, %s7204_s27  ;;  %v5570_v21 = vmul.f32 -1.442695, %v2615_v56 }
 0x6df   :  { %7119 = vpow2.f32 %v5570_v21 }
 0x6ec   :  { %v7120_v58 = vpop.eup %7119 }
 0x6ed   :  { %v2621_v59 = vadd.f32 1.0, %v7120_v58 }
 0x6ef   :  { %7121 = vrcp.f32 %v2621_v59 }
 0x6fc   :  { %v7122_v55 = vpop.eup %7121 }
 0x6fd   :  { %v2635_v61 = vsub.f32 1.0, %v7122_v55  ;;  %v2641_v0 = vmul.f32 %v7122_v55, %v7824_v27 }
 0x74f   :  { %v2626_v60 = vpop.permute.xlu1 %2625 }
 0x750   :  { %v2628_v57 = vmul.f32 %v7122_v55, %v2626_v60 }
 0x752   :  { %2630 = vrot.lane.b32.xlu0 %v2628_v57, %s7207_s10 }
 0x7c4   :  { %v2631_v8 = vpop.permute.xlu0 %2630 }
 0x7c5   :  { %v2633_v37 = vadd.f32 %v2631_v8, %v2615_v56 }
 0x7c7   :  { %7123 = vtanh.f32 %v2633_v37 }
 0x7d4   :  { %v7124_v45 = vpop.eup %7123 }
 0x7d5   :  { %2637 = vrot.lane.b32.xlu1 %v7124_v45, %s7208_s11 }
 0x847   :  { %v2638_v54 = vpop.permute.xlu1 %2637 }
 0x848   :  { %v2640_v15 = vmul.f32 %v2638_v54, %v2635_v61 }
 0x84a   :  { %v7948_v50 = vadd.f32 %v2641_v0, %v2640_v15 }
 0x84c   :  { %v2656_v51 = vsel %vm65_vm1, %v2655_v52, %v7948_v50 }
 0x84d   :  { %v2658_v48 = vsel %vm910_vm3, %v2656_v51, 0 }
 0x84e   :  { %v7953_v63 = vand.u32 4294901760, %v2658_v48 }
 0x850   :  { %6548 = vmatmul.mubr.f32.vlgmr.msra.gmra.mxu1 %v7953_v63  ;;  %v2734_v22 = vsub.f32 %v2658_v48, %v7953_v63 }
 0x851   :  { %6570 = vmatpush3.msra.mxu1 %v7426_v4  ;;  %6585 = vmatprep.mubr.msk.f32.mxu1 %vm7206_vm2, %v8659_v49 }
 0x852   :  { %6571 = vmatprep.subr.mxu1 %v8659_v49  ;;  %v2735_v29 = vand.u32 4294901760, %v2734_v22 }
 0x853   :  { %6572 = vmatpush3.msra.mxu1 %v7431_v10 }
 0x854   :  { %6573 = vmatprep.subr.mxu1 %v8659_v49  ;;  %v2736_v24 = vsub.f32 %v2734_v22, %v2735_v29 }
 0x855   :  { %6574 = vmatpush3.msra.mxu1 %v7439_v14 }
 0x856   :  { %6575 = vmatprep.subr.mxu1 %v8659_v49  ;;  %v2737_v33 = vand.u32 4294901760, %v2736_v24 }
 0x857   :  { %6576 = vmatpush3.msra.mxu1 %v7449_v19 }
 0x858   :  { %6577 = vmatprep.subr.mxu1 %v8659_v49  ;;  %6529 = vmatmul.mubr.f32.vlgmr.msra.gmra.mxu0 %v2737_v33 }
 0x859   :  { %6551 = vmatpush3.msra.mxu0 %v7429_v9  ;;  %6578 = vmatpush3.msra.mxu1 %v7463_v26 }
 0x85a   :  { %6552 = vmatprep.subr.mxu0 %v8659_v49  ;;  %6579 = vmatprep.subr.mxu1 %v8659_v49 }
 0x85b   :  { %6553 = vmatpush3.msra.mxu0 %v7437_v13  ;;  %6580 = vmatpush3.msra.mxu1 %v7471_v30 }
 0x85c   :  { %6554 = vmatprep.subr.mxu0 %v8659_v49  ;;  %6581 = vmatprep.subr.mxu1 %v8659_v49 }
 0x85d   :  { %6555 = vmatpush3.msra.mxu0 %v7447_v18  ;;  %6582 = vmatpush3.msra.mxu1 %v7488_v36 }
 0x85e   :  { %6556 = vmatprep.subr.mxu0 %v8659_v49  ;;  %6583 = vmatprep.subr.mxu1 %v8659_v49 }
 0x85f   :  { %6557 = vmatpush3.msra.mxu0 %v7460_v25  ;;  %6584 = vmatpush3.msra.mxu1 %v7505_v42 }
 0x860   :  { %6558 = vmatprep.subr.mxu0 %v8659_v49  ;;  %6586 = vmatmul.mubr.f32.vlgmr.msra.gmra.mxu1 %v2735_v29 }
 0x861   :  { %6607 = vmatprep.subr.mxu1 %v8659_v49  ;;  %6559 = vmatpush3.msra.mxu0 %v7478_v32 }
 0x862   :  { %6608 = vmatpush3.msra.mxu1 %v7426_v4  ;;  %6560 = vmatprep.subr.mxu0 %v8659_v49 }
 0x863   :  { %6609 = vmatprep.subr.mxu1 %v8659_v49  ;;  %6561 = vmatpush3.msra.mxu0 %v7486_v35 }
 0x864   :  { %6610 = vmatpush3.msra.mxu1 %v7431_v10  ;;  %6562 = vmatprep.subr.mxu0 %v8659_v49 }
 0x865   :  { %6611 = vmatprep.subr.mxu1 %v8659_v49  ;;  %6563 = vmatpush3.msra.mxu0 %v7503_v41 }
 0x866   :  { %6612 = vmatpush3.msra.mxu1 %v7439_v14  ;;  %6564 = vmatprep.subr.mxu0 %v8659_v49 }
 0x867   :  { %6613 = vmatprep.subr.mxu1 %v8659_v49  ;;  %6565 = vmatpush3.msra.mxu0 %v7520_v47 }
 0x868   :  { %6566 = vmatprep.mubr.msk.f32.mxu0 %vm7206_vm2, %v8659_v49  ;;  %6614 = vmatpush3.msra.mxu1 %v7449_v19 }
 0x869   :  { %6567 = vmatmul.mubr.f32.vlgmr.msra.gmra.mxu0 %v2734_v22  ;;  %6588 = vmatprep.subr.mxu0 %v8659_v49 }
 0x86a   :  { %6615 = vmatprep.subr.mxu1 %v8659_v49  ;;  %6589 = vmatpush3.msra.mxu0 %v7434_v12 }
 0x86b   :  { %6616 = vmatpush3.msra.mxu1 %v7463_v26  ;;  %6590 = vmatprep.subr.mxu0 %v8659_v49 }
 0x86c   :  { %6617 = vmatprep.subr.mxu1 %v8659_v49  ;;  %6591 = vmatpush3.msra.mxu0 %v8660_v1 }
 0x86d   :  { %6618 = vmatpush3.msra.mxu1 %v7471_v30  ;;  %6592 = vmatprep.subr.mxu0 %v8659_v49 }
 0x86e   :  { %6619 = vmatprep.subr.mxu1 %v8659_v49  ;;  %6593 = vmatpush3.msra.mxu0 %v8661_v28 }
 0x86f   :  { %6620 = vmatpush3.msra.mxu1 %v7488_v36  ;;  %6594 = vmatprep.subr.mxu0 %v8659_v49 }
 0x870   :  { %6621 = vmatprep.subr.mxu1 %v8659_v49  ;;  %6595 = vmatpush3.msra.mxu0 %v8662_v40 }
 0x871   :  { %6622 = vmatpush3.msra.mxu1 %v7505_v42  ;;  %6623 = vmatprep.mubr.msk.f32.mxu1 %vm7206_vm2, %v8659_v49 }
 0x872   :  { %6596 = vmatprep.subr.mxu0 %v8659_v49  ;;  %6624 = vmatmul.mubr.f32.vlgmr.msra.gmra.mxu1 %v7953_v63 }
 0x873   :  { %6597 = vmatpush3.msra.mxu0 %v8663_v38  ;;  %6604 = vmatprep.mubr.msk.f32.mxu0 %vm7206_vm2, %v8659_v49 }
 0x874   :  { %6598 = vmatprep.subr.mxu0 %v8659_v49  ;;  %6645 = vmatprep.subr.mxu1 %v8659_v49 }
 0x875   :  { %6599 = vmatpush3.msra.mxu0 %v8664_v46  ;;  %6646 = vmatpush3.msra.mxu1 %v8665_v31 }
 0x876   :  { %6600 = vmatprep.subr.mxu0 %v8659_v49  ;;  %6647 = vmatprep.subr.mxu1 %v8659_v49 }
 0x877   :  { %6601 = vmatpush3.msra.mxu0 %v8666_v2  ;;  %6648 = vmatpush3.msra.mxu1 %v8667_v5 }
 0x878   :  { %6602 = vmatprep.subr.mxu0 %v8659_v49  ;;  %6649 = vmatprep.subr.mxu1 %v8659_v49 }
 0x879   :  { %6603 = vmatpush3.msra.mxu0 %v8668_v6  ;;  %6650 = vmatpush3.msra.mxu1 %v8669_v11 }
 0x87a   :  { %6605 = vmatmul.mubr.f32.vlgmr.msra.gmra.mxu0 %v7953_v63  ;;  %6651 = vmatprep.subr.mxu1 %v8659_v49 }
 0x87b   :  { %6652 = vmatpush3.msra.mxu1 %v8670_v16  ;;  %6626 = vmatprep.subr.mxu0 %v8659_v49 }
 0x87c   :  { %6653 = vmatprep.subr.mxu1 %v8659_v49  ;;  %6627 = vmatpush3.msra.mxu0 %v7426_v4 }
 0x87d   :  { %6654 = vmatpush3.msra.mxu1 %v8671_v23  ;;  %6628 = vmatprep.subr.mxu0 %v8659_v49 }
 0x87e   :  { %6655 = vmatprep.subr.mxu1 %v8659_v49  ;;  %6629 = vmatpush3.msra.mxu0 %v7431_v10 }
 0x87f   :  { %6656 = vmatpush3.msra.mxu1 %v8672_v7  ;;  %6630 = vmatprep.subr.mxu0 %v8659_v49 }
 0x880   :  { %6657 = vmatprep.subr.mxu1 %v8659_v49  ;;  %6631 = vmatpush3.msra.mxu0 %v7439_v14 }
 0x881   :  { %6658 = vmatpush3.msra.mxu1 %v8673_v20  ;;  %6632 = vmatprep.subr.mxu0 %v8659_v49 }
 0x882   :  { %6659 = vmatprep.subr.mxu1 %v8659_v49  ;;  %6633 = vmatpush3.msra.mxu0 %v7449_v19 }
 0x883   :  { %6660 = vmatpush3.msra.mxu1 %v8674_v17  ;;  %6634 = vmatprep.subr.mxu0 %v8659_v49 }
 0x884   :  { %6661 = vmatprep.mubr.msk.f32.mxu1 %vm7206_vm2, %v8659_v49  ;;  %6683 = vmatprep.subr.mxu1 %v8659_v49 }
 0x885   :  { %6635 = vmatpush3.msra.mxu0 %v7463_v26  ;;  %6642 = vmatprep.mubr.msk.f32.mxu0 %vm7206_vm2, %v8659_v49 }
 0x886   :  { %6636 = vmatprep.subr.mxu0 %v8659_v49 }
 0x887   :  { %6637 = vmatpush3.msra.mxu0 %v7471_v30 }
 0x888   :  { %6638 = vmatprep.subr.mxu0 %v8659_v49 }
 0x889   :  { %6639 = vmatpush3.msra.mxu0 %v7488_v36 }
 0x88a   :  { %6640 = vmatprep.subr.mxu0 %v8659_v49 }
 0x88b   :  { %6641 = vmatpush3.msra.mxu0 %v7505_v42 }
 0x88c   :  { %6664 = vmatprep.subr.mxu0 %v8659_v49 }
 0x910   :  { %v2850_v39 = vpop.f32.mrf.mxu1 }
 0x912   :  { %v6549_v43 = vpop.f32.mrf.mxu1 }
 0x918   :  { %v2739_v44 = vpop.f32.mrf.mxu0 }
 0x919   :  { %v2740_v59 = vadd.f32 %v7693_v53, %v2739_v44 }
 0x91a   :  { %v6530_v62 = vpop.f32.mrf.mxu0 }
 0x91b   :  { %v2851_v60 = vadd.f32 %v2850_v39, %v2740_v59 }
 0x920   :  { %v3019_v34 = vpop.f32.mrf.mxu1 }
 0x922   :  { %v6587_v56 = vpop.f32.mrf.mxu1 }
 0x929   :  { %v2938_v21 = vpop.f32.mrf.mxu0 }
 0x92a   :  { %v2939_v8 = vadd.f32 %v2938_v21, %v2851_v60 }
 0x92b   :  { %v6568_v58 = vpop.f32.mrf.mxu0 }
 0x92c   :  { %v3020_v37 = vadd.f32 %v3019_v34, %v2939_v8  ;;  %v3234_v34 = vld [vmem:[#allocation2 + $0x20] sm:$0xff] }
 0x932   :  { %v3193_v55 = vpop.f32.mrf.mxu1 }
 0x934   :  { %v6625_v57 = vpop.f32.mrf.mxu1 }
 0x93a   :  { %v3114_v45 = vpop.f32.mrf.mxu0 }
 0x93b   :  { %v3115_v61 = vadd.f32 %v3114_v45, %v3020_v37 }
 0x93c   :  { %v6606_v54 = vpop.f32.mrf.mxu0 }
 0x93d   :  { %v3194_v0 = vadd.f32 %v3193_v55, %v3115_v61 }
 0x93f   :  { %3204 = vrot.lane.b32.xlu0 %v3194_v0, %s7204_s27  ;;  %v5572_v15 = vmul.f32 -1.442695, %v3194_v0 }
 0x941   :  { %7125 = vpow2.f32 %v5572_v15 }
 0x94e   :  { %v7126_v52 = vpop.eup %7125 }
 0x94f   :  { %v3200_v51 = vadd.f32 1.0, %v7126_v52 }
 0x951   :  { %7127 = vrcp.f32 %v3200_v51  ;;  %v8194_v51 = vld [vmem:[%s8607_s5] ss:$0 sm:$0xff] }
 0x95e   :  { %v7128_v48 = vpop.eup %7127 }
 0x95f   :  { %v3214_v33 = vsub.f32 1.0, %v7128_v48  ;;  %v3220_v43 = vmul.f32 %v7128_v48, %v7948_v50 }
 0x9b1   :  { %v3205_v63 = vpop.permute.xlu0 %3204 }
 0x9b2   :  { %v3207_v22 = vmul.f32 %v7128_v48, %v3205_v63 }
 0x9b4   :  { %3209 = vrot.lane.b32.xlu1 %v3207_v22, %s7207_s10 }
 0xa26   :  { %v3210_v53 = vpop.permute.xlu1 %3209 }
 0xa27   :  { %v3212_v29 = vadd.f32 %v3210_v53, %v3194_v0 }
 0xa29   :  { %7129 = vtanh.f32 %v3212_v29 }
 0xa36   :  { %v7130_v24 = vpop.eup %7129 }
 0xa37   :  { %3216 = vrot.lane.b32.xlu0 %v7130_v24, %s7208_s11 }
 0xaa9   :  { %v3217_v39 = vpop.permute.xlu0 %3216 }
 0xaaa   :  { %v3219_v44 = vmul.f32 %v3217_v39, %v3214_v33 }
 0xaac   :  { %v8072_v62 = vadd.f32 %v3220_v43, %v3219_v44 }
 0xaae   :  { %v3235_v56 = vsel %vm65_vm1, %v3234_v34, %v8072_v62 }
 0xaaf   :  { %v3237_v21 = vsel %vm910_vm3, %v3235_v56, 0 }
 0xab0   :  { %v8077_v58 = vand.u32 4294901760, %v3237_v21 }
 0xab2   :  { %6662 = vmatmul.mubr.f32.vlgmr.msra.gmra.mxu1 %v8077_v58  ;;  %v3313_v59 = vsub.f32 %v3237_v21, %v8077_v58 }
 0xab3   :  { %6684 = vmatpush3.msra.mxu1 %v7426_v4  ;;  %6699 = vmatprep.mubr.msk.f32.mxu1 %vm7206_vm2, %v8659_v49 }
 0xab4   :  { %6685 = vmatprep.subr.mxu1 %v8659_v49  ;;  %v3314_v55 = vand.u32 4294901760, %v3313_v59 }
 0xab5   :  { %6686 = vmatpush3.msra.mxu1 %v7431_v10 }
 0xab6   :  { %6687 = vmatprep.subr.mxu1 %v8659_v49  ;;  %v3315_v60 = vsub.f32 %v3313_v59, %v3314_v55 }
 0xab7   :  { %6688 = vmatpush3.msra.mxu1 %v7439_v14 }
 0xab8   :  { %6689 = vmatprep.subr.mxu1 %v8659_v49  ;;  %v3316_v57 = vand.u32 4294901760, %v3315_v60 }
 0xab9   :  { %6690 = vmatpush3.msra.mxu1 %v7449_v19 }
 0xaba   :  { %6691 = vmatprep.subr.mxu1 %v8659_v49  ;;  %6643 = vmatmul.mubr.f32.vlgmr.msra.gmra.mxu0 %v3316_v57 }
 0xabb   :  { %6665 = vmatpush3.msra.mxu0 %v7429_v9  ;;  %6692 = vmatpush3.msra.mxu1 %v7463_v26 }
 0xabc   :  { %6666 = vmatprep.subr.mxu0 %v8659_v49  ;;  %6693 = vmatprep.subr.mxu1 %v8659_v49 }
 0xabd   :  { %6667 = vmatpush3.msra.mxu0 %v7437_v13  ;;  %6694 = vmatpush3.msra.mxu1 %v7471_v30 }
 0xabe   :  { %6668 = vmatprep.subr.mxu0 %v8659_v49  ;;  %6695 = vmatprep.subr.mxu1 %v8659_v49 }
 0xabf   :  { %6669 = vmatpush3.msra.mxu0 %v7447_v18  ;;  %6696 = vmatpush3.msra.mxu1 %v7488_v36 }
 0xac0   :  { %6670 = vmatprep.subr.mxu0 %v8659_v49  ;;  %6697 = vmatprep.subr.mxu1 %v8659_v49 }
 0xac1   :  { %6671 = vmatpush3.msra.mxu0 %v7460_v25  ;;  %6698 = vmatpush3.msra.mxu1 %v7505_v42 }
 0xac2   :  { %6672 = vmatprep.subr.mxu0 %v8659_v49  ;;  %6700 = vmatmul.mubr.f32.vlgmr.msra.gmra.mxu1 %v3314_v55 }
 0xac3   :  { %6721 = vmatprep.subr.mxu1 %v8659_v49  ;;  %6673 = vmatpush3.msra.mxu0 %v7478_v32 }
 0xac4   :  { %6722 = vmatpush3.msra.mxu1 %v7426_v4  ;;  %6674 = vmatprep.subr.mxu0 %v8659_v49 }
 0xac5   :  { %6723 = vmatprep.subr.mxu1 %v8659_v49  ;;  %6675 = vmatpush3.msra.mxu0 %v7486_v35 }
 0xac6   :  { %6724 = vmatpush3.msra.mxu1 %v7431_v10  ;;  %6676 = vmatprep.subr.mxu0 %v8659_v49 }
 0xac7   :  { %6725 = vmatprep.subr.mxu1 %v8659_v49  ;;  %6677 = vmatpush3.msra.mxu0 %v7503_v41 }
 0xac8   :  { %6726 = vmatpush3.msra.mxu1 %v7439_v14  ;;  %6678 = vmatprep.subr.mxu0 %v8659_v49 }
 0xac9   :  { %6727 = vmatprep.subr.mxu1 %v8659_v49  ;;  %6679 = vmatpush3.msra.mxu0 %v7520_v47 }
 0xaca   :  { %6680 = vmatprep.mubr.msk.f32.mxu0 %vm7206_vm2, %v8659_v49  ;;  %6728 = vmatpush3.msra.mxu1 %v7449_v19 }
 0xacb   :  { %6681 = vmatmul.mubr.f32.vlgmr.msra.gmra.mxu0 %v3313_v59  ;;  %6702 = vmatprep.subr.mxu0 %v8659_v49 }
 0xacc   :  { %6729 = vmatprep.subr.mxu1 %v8659_v49  ;;  %6703 = vmatpush3.msra.mxu0 %v7434_v12 }
 0xacd   :  { %6730 = vmatpush3.msra.mxu1 %v7463_v26  ;;  %6704 = vmatprep.subr.mxu0 %v8659_v49 }
 0xace   :  { %6731 = vmatprep.subr.mxu1 %v8659_v49  ;;  %6705 = vmatpush3.msra.mxu0 %v8660_v1 }
 0xacf   :  { %6732 = vmatpush3.msra.mxu1 %v7471_v30  ;;  %6706 = vmatprep.subr.mxu0 %v8659_v49 }
 0xad0   :  { %6733 = vmatprep.subr.mxu1 %v8659_v49  ;;  %6707 = vmatpush3.msra.mxu0 %v8661_v28 }
 0xad1   :  { %6734 = vmatpush3.msra.mxu1 %v7488_v36  ;;  %6708 = vmatprep.subr.mxu0 %v8659_v49 }
 0xad2   :  { %6735 = vmatprep.subr.mxu1 %v8659_v49  ;;  %6709 = vmatpush3.msra.mxu0 %v8662_v40 }
 0xad3   :  { %6736 = vmatpush3.msra.mxu1 %v7505_v42  ;;  %6737 = vmatprep.mubr.msk.f32.mxu1 %vm7206_vm2, %v8659_v49 }
 0xad4   :  { %6710 = vmatprep.subr.mxu0 %v8659_v49  ;;  %6738 = vmatmul.mubr.f32.vlgmr.msra.gmra.mxu1 %v8077_v58 }
 0xad5   :  { %6711 = vmatpush3.msra.mxu0 %v8663_v38  ;;  %6718 = vmatprep.mubr.msk.f32.mxu0 %vm7206_vm2, %v8659_v49 }
 0xad6   :  { %6712 = vmatprep.subr.mxu0 %v8659_v49  ;;  %6759 = vmatprep.subr.mxu1 %v8659_v49 }
 0xad7   :  { %6713 = vmatpush3.msra.mxu0 %v8664_v46  ;;  %6760 = vmatpush3.msra.mxu1 %v8665_v31 }
 0xad8   :  { %6714 = vmatprep.subr.mxu0 %v8659_v49  ;;  %6761 = vmatprep.subr.mxu1 %v8659_v49 }
 0xad9   :  { %6715 = vmatpush3.msra.mxu0 %v8666_v2  ;;  %6762 = vmatpush3.msra.mxu1 %v8667_v5 }
 0xada   :  { %6716 = vmatprep.subr.mxu0 %v8659_v49  ;;  %6763 = vmatprep.subr.mxu1 %v8659_v49 }
 0xadb   :  { %6717 = vmatpush3.msra.mxu0 %v8668_v6  ;;  %6764 = vmatpush3.msra.mxu1 %v8669_v11 }
 0xadc   :  { %6719 = vmatmul.mubr.f32.vlgmr.msra.gmra.mxu0 %v8077_v58  ;;  %6765 = vmatprep.subr.mxu1 %v8659_v49 }
 0xadd   :  { %6766 = vmatpush3.msra.mxu1 %v8670_v16  ;;  %6740 = vmatprep.subr.mxu0 %v8659_v49 }
 0xade   :  { %6767 = vmatprep.subr.mxu1 %v8659_v49  ;;  %6741 = vmatpush3.msra.mxu0 %v7426_v4 }
 0xadf   :  { %6768 = vmatpush3.msra.mxu1 %v8671_v23  ;;  %6742 = vmatprep.subr.mxu0 %v8659_v49 }
 0xae0   :  { %6769 = vmatprep.subr.mxu1 %v8659_v49  ;;  %6743 = vmatpush3.msra.mxu0 %v7431_v10 }
 0xae1   :  { %6770 = vmatpush3.msra.mxu1 %v8672_v7  ;;  %6744 = vmatprep.subr.mxu0 %v8659_v49 }
 0xae2   :  { %6771 = vmatprep.subr.mxu1 %v8659_v49  ;;  %6745 = vmatpush3.msra.mxu0 %v7439_v14 }
 0xae3   :  { %6772 = vmatpush3.msra.mxu1 %v8673_v20  ;;  %6746 = vmatprep.subr.mxu0 %v8659_v49 }
 0xae4   :  { %6773 = vmatprep.subr.mxu1 %v8659_v49  ;;  %6747 = vmatpush3.msra.mxu0 %v7449_v19 }
 0xae5   :  { %6774 = vmatpush3.msra.mxu1 %v8674_v17  ;;  %6748 = vmatprep.subr.mxu0 %v8659_v49 }
 0xae6   :  { %6775 = vmatprep.mubr.msk.f32.mxu1 %vm7206_vm2, %v8659_v49  ;;  %6797 = vmatprep.subr.mxu1 %v8659_v49 }
 0xae7   :  { %6749 = vmatpush3.msra.mxu0 %v7463_v26  ;;  %6756 = vmatprep.mubr.msk.f32.mxu0 %vm7206_vm2, %v8659_v49 }
 0xae8   :  { %6750 = vmatprep.subr.mxu0 %v8659_v49 }
 0xae9   :  { %6751 = vmatpush3.msra.mxu0 %v7471_v30 }
 0xaea   :  { %6752 = vmatprep.subr.mxu0 %v8659_v49 }
 0xaeb   :  { %6753 = vmatpush3.msra.mxu0 %v7488_v36 }
 0xaec   :  { %6754 = vmatprep.subr.mxu0 %v8659_v49 }
 0xaed   :  { %6755 = vmatpush3.msra.mxu0 %v7505_v42 }
 0xaee   :  { %6778 = vmatprep.subr.mxu0 %v8659_v49 }
 0xb72   :  { %v3429_v8 = vpop.f32.mrf.mxu1 }
 0xb74   :  { %v6663_v37 = vpop.f32.mrf.mxu1 }
 0xb7a   :  { %v3318_v45 = vpop.f32.mrf.mxu0 }
 0xb7b   :  { %v3319_v48 = vadd.f32 %v8194_v51, %v3318_v45 }
 0xb7c   :  { %v6644_v61 = vpop.f32.mrf.mxu0 }
 0xb7d   :  { %v3430_v22 = vadd.f32 %v3429_v8, %v3319_v48 }
 0xb82   :  { %v3598_v54 = vpop.f32.mrf.mxu1 }
 0xb84   :  { %v6701_v0 = vpop.f32.mrf.mxu1 }
 0xb8b   :  { %v3517_v15 = vpop.f32.mrf.mxu0 }
 0xb8c   :  { %v3518_v29 = vadd.f32 %v3517_v15, %v3430_v22  ;;  %v3813_v15 = vld [vmem:[#allocation2 + $0x28] sm:$0xff] }
 0xb8d   :  { %v6682_v52 = vpop.f32.mrf.mxu0 }
 0xb8e   :  { %v3599_v24 = vadd.f32 %v3598_v54, %v3518_v29 }
 0xb94   :  { %v3772_v63 = vpop.f32.mrf.mxu1 }
 0xb96   :  { %v6739_v53 = vpop.f32.mrf.mxu1 }
 0xb9c   :  { %v3693_v33 = vpop.f32.mrf.mxu0 }
 0xb9d   :  { %v3694_v39 = vadd.f32 %v3693_v33, %v3599_v24 }
 0xb9e   :  { %v6720_v43 = vpop.f32.mrf.mxu0 }
 0xb9f   :  { %v3773_v44 = vadd.f32 %v3772_v63, %v3694_v39 }
 0xba1   :  { %3783 = vrot.lane.b32.xlu1 %v3773_v44, %s7204_s27  ;;  %v5574_v34 = vmul.f32 -1.442695, %v3773_v44 }
 0xba3   :  { %7131 = vpow2.f32 %v5574_v34 }
 0xbb0   :  { %v7132_v56 = vpop.eup %7131 }
 0xbb1   :  { %v3779_v21 = vadd.f32 1.0, %v7132_v56 }
 0xbb3   :  { %7133 = vrcp.f32 %v3779_v21 }
 0xbc0   :  { %v7134_v58 = vpop.eup %7133 }
 0xbc1   :  { %v3793_v37 = vsub.f32 1.0, %v7134_v58  ;;  %v3799_v61 = vmul.f32 %v7134_v58, %v8072_v62 }
 0xc13   :  { %v3784_v59 = vpop.permute.xlu1 %3783 }
 0xc14   :  { %v3786_v55 = vmul.f32 %v7134_v58, %v3784_v59 }
 0xc16   :  { %3788 = vrot.lane.b32.xlu0 %v3786_v55, %s7207_s10 }
 0xc88   :  { %v3789_v60 = vpop.permute.xlu0 %3788 }
 0xc89   :  { %v3791_v57 = vadd.f32 %v3789_v60, %v3773_v44 }
 0xc8b   :  { %7135 = vtanh.f32 %v3791_v57 }
 0xc98   :  { %v7136_v8 = vpop.eup %7135 }
 0xc99   :  { %3795 = vrot.lane.b32.xlu1 %v7136_v8, %s7208_s11 }
 0xd0b   :  { %v3796_v45 = vpop.permute.xlu1 %3795 }
 0xd0c   :  { %v3798_v54 = vmul.f32 %v3796_v45, %v3793_v37 }
 0xd0e   :  { %v8201_v0 = vadd.f32 %v3799_v61, %v3798_v54 }
 0xd10   :  { %v3814_v52 = vsel %vm65_vm1, %v3813_v15, %v8201_v0 }
 0xd11   :  { %v3816_v48 = vsel %vm910_vm3, %v3814_v52, 0 }
 0xd12   :  { %v8206_v63 = vand.u32 4294901760, %v3816_v48 }
 0xd14   :  { %6776 = vmatmul.mubr.f32.vlgmr.msra.gmra.mxu1 %v8206_v63  ;;  %v3892_v22 = vsub.f32 %v3816_v48, %v8206_v63 }
 0xd15   :  { %6798 = vmatpush3.msra.mxu1 %v7426_v4  ;;  %6813 = vmatprep.mubr.msk.f32.mxu1 %vm7206_vm2, %v8659_v49 }
 0xd16   :  { %6799 = vmatprep.subr.mxu1 %v8659_v49  ;;  %v3893_v53 = vand.u32 4294901760, %v3892_v22 }
 0xd17   :  { %6800 = vmatpush3.msra.mxu1 %v7431_v10 }
 0xd18   :  { %6801 = vmatprep.subr.mxu1 %v8659_v49  ;;  %v3894_v29 = vsub.f32 %v3892_v22, %v3893_v53 }
 0xd19   :  { %6802 = vmatpush3.msra.mxu1 %v7439_v14 }
 0xd1a   :  { %6803 = vmatprep.subr.mxu1 %v8659_v49  ;;  %v3895_v24 = vand.u32 4294901760, %v3894_v29 }
 0xd1b   :  { %6804 = vmatpush3.msra.mxu1 %v7449_v19 }
 0xd1c   :  { %6805 = vmatprep.subr.mxu1 %v8659_v49  ;;  %6757 = vmatmul.mubr.f32.vlgmr.msra.gmra.mxu0 %v3895_v24 }
 0xd1d   :  { %6779 = vmatpush3.msra.mxu0 %v7429_v9  ;;  %6806 = vmatpush3.msra.mxu1 %v7463_v26 }
 0xd1e   :  { %6780 = vmatprep.subr.mxu0 %v8659_v49  ;;  %6807 = vmatprep.subr.mxu1 %v8659_v49 }
 0xd1f   :  { %6781 = vmatpush3.msra.mxu0 %v7437_v13  ;;  %6808 = vmatpush3.msra.mxu1 %v7471_v30 }
 0xd20   :  { %6782 = vmatprep.subr.mxu0 %v8659_v49  ;;  %6809 = vmatprep.subr.mxu1 %v8659_v49 }
 0xd21   :  { %6783 = vmatpush3.msra.mxu0 %v7447_v18  ;;  %6810 = vmatpush3.msra.mxu1 %v7488_v36 }
 0xd22   :  { %6784 = vmatprep.subr.mxu0 %v8659_v49  ;;  %6811 = vmatprep.subr.mxu1 %v8659_v49 }
 0xd23   :  { %6785 = vmatpush3.msra.mxu0 %v7460_v25  ;;  %6812 = vmatpush3.msra.mxu1 %v7505_v42 }
 0xd24   :  { %6786 = vmatprep.subr.mxu0 %v8659_v49  ;;  %6814 = vmatmul.mubr.f32.vlgmr.msra.gmra.mxu1 %v3893_v53 }
 0xd25   :  { %6835 = vmatprep.subr.mxu1 %v8659_v49  ;;  %6787 = vmatpush3.msra.mxu0 %v7478_v32 }
 0xd26   :  { %6836 = vmatpush3.msra.mxu1 %v7426_v4  ;;  %6788 = vmatprep.subr.mxu0 %v8659_v49 }
 0xd27   :  { %6837 = vmatprep.subr.mxu1 %v8659_v49  ;;  %6789 = vmatpush3.msra.mxu0 %v7486_v35 }
 0xd28   :  { %6838 = vmatpush3.msra.mxu1 %v7431_v10  ;;  %6790 = vmatprep.subr.mxu0 %v8659_v49 }
 0xd29   :  { %6839 = vmatprep.subr.mxu1 %v8659_v49  ;;  %6791 = vmatpush3.msra.mxu0 %v7503_v41 }
 0xd2a   :  { %6840 = vmatpush3.msra.mxu1 %v7439_v14  ;;  %6792 = vmatprep.subr.mxu0 %v8659_v49 }
 0xd2b   :  { %6841 = vmatprep.subr.mxu1 %v8659_v49  ;;  %6793 = vmatpush3.msra.mxu0 %v7520_v47 }
 0xd2c   :  { %6794 = vmatprep.mubr.msk.f32.mxu0 %vm7206_vm2, %v8659_v49  ;;  %6842 = vmatpush3.msra.mxu1 %v7449_v19 }
 0xd2d   :  { %6795 = vmatmul.mubr.f32.vlgmr.msra.gmra.mxu0 %v3892_v22  ;;  %6816 = vmatprep.subr.mxu0 %v8659_v49 }
 0xd2e   :  { %6843 = vmatprep.subr.mxu1 %v8659_v49  ;;  %6817 = vmatpush3.msra.mxu0 %v7434_v12 }
 0xd2f   :  { %6844 = vmatpush3.msra.mxu1 %v7463_v26  ;;  %6818 = vmatprep.subr.mxu0 %v8659_v49 }
 0xd30   :  { %6845 = vmatprep.subr.mxu1 %v8659_v49  ;;  %6819 = vmatpush3.msra.mxu0 %v8660_v1 }
 0xd31   :  { %6846 = vmatpush3.msra.mxu1 %v7471_v30  ;;  %6820 = vmatprep.subr.mxu0 %v8659_v49 }
 0xd32   :  { %6847 = vmatprep.subr.mxu1 %v8659_v49  ;;  %6821 = vmatpush3.msra.mxu0 %v8661_v28 }
 0xd33   :  { %6848 = vmatpush3.msra.mxu1 %v7488_v36  ;;  %6822 = vmatprep.subr.mxu0 %v8659_v49 }
 0xd34   :  { %6849 = vmatprep.subr.mxu1 %v8659_v49  ;;  %6823 = vmatpush3.msra.mxu0 %v8662_v40 }
 0xd35   :  { %6850 = vmatpush3.msra.mxu1 %v7505_v42  ;;  %6851 = vmatprep.mubr.msk.f32.mxu1 %vm7206_vm2, %v8659_v49 }
 0xd36   :  { %6824 = vmatprep.subr.mxu0 %v8659_v49  ;;  %6852 = vmatmul.mubr.f32.vlgmr.msra.gmra.mxu1 %v8206_v63 }
 0xd37   :  { %6825 = vmatpush3.msra.mxu0 %v8663_v38  ;;  %6832 = vmatprep.mubr.msk.f32.mxu0 %vm7206_vm2, %v8659_v49 }
 0xd38   :  { %6826 = vmatprep.subr.mxu0 %v8659_v49  ;;  %6873 = vmatprep.subr.mxu1 %v8659_v49 }
 0xd39   :  { %6827 = vmatpush3.msra.mxu0 %v8664_v46  ;;  %6874 = vmatpush3.msra.mxu1 %v8665_v31 }
 0xd3a   :  { %6828 = vmatprep.subr.mxu0 %v8659_v49  ;;  %6875 = vmatprep.subr.mxu1 %v8659_v49 }
 0xd3b   :  { %6829 = vmatpush3.msra.mxu0 %v8666_v2  ;;  %6876 = vmatpush3.msra.mxu1 %v8667_v5 }
 0xd3c   :  { %6830 = vmatprep.subr.mxu0 %v8659_v49  ;;  %6877 = vmatprep.subr.mxu1 %v8659_v49 }
 0xd3d   :  { %6831 = vmatpush3.msra.mxu0 %v8668_v6  ;;  %6878 = vmatpush3.msra.mxu1 %v8669_v11 }
 0xd3e   :  { %6833 = vmatmul.mubr.f32.vlgmr.msra.gmra.mxu0 %v8206_v63  ;;  %6879 = vmatprep.subr.mxu1 %v8659_v49 }
 0xd3f   :  { %6880 = vmatpush3.msra.mxu1 %v8670_v16  ;;  %6854 = vmatprep.subr.mxu0 %v8659_v49 }
 0xd40   :  { %6881 = vmatprep.subr.mxu1 %v8659_v49  ;;  %6855 = vmatpush3.msra.mxu0 %v7426_v4 }
 0xd41   :  { %6882 = vmatpush3.msra.mxu1 %v8671_v23  ;;  %6856 = vmatprep.subr.mxu0 %v8659_v49 }
 0xd42   :  { %6883 = vmatprep.subr.mxu1 %v8659_v49  ;;  %6857 = vmatpush3.msra.mxu0 %v7431_v10 }
 0xd43   :  { %6884 = vmatpush3.msra.mxu1 %v8672_v7  ;;  %6858 = vmatprep.subr.mxu0 %v8659_v49 }
 0xd44   :  { %6885 = vmatprep.subr.mxu1 %v8659_v49  ;;  %6859 = vmatpush3.msra.mxu0 %v7439_v14 }
 0xd45   :  { %6886 = vmatpush3.msra.mxu1 %v8673_v20  ;;  %6860 = vmatprep.subr.mxu0 %v8659_v49 }
 0xd46   :  { %6887 = vmatprep.subr.mxu1 %v8659_v49  ;;  %6861 = vmatpush3.msra.mxu0 %v7449_v19 }
 0xd47   :  { %6888 = vmatpush3.msra.mxu1 %v8674_v17  ;;  %6862 = vmatprep.subr.mxu0 %v8659_v49 }
 0xd48   :  { %6889 = vmatprep.mubr.msk.f32.mxu1 %vm7206_vm2, %v8659_v49  ;;  %6911 = vmatprep.subr.mxu1 %v8659_v49 }
 0xd49   :  { %6863 = vmatpush3.msra.mxu0 %v7463_v26  ;;  %6870 = vmatprep.mubr.msk.f32.mxu0 %vm7206_vm2, %v8659_v49 }
 0xd4a   :  { %6864 = vmatprep.subr.mxu0 %v8659_v49 }
 0xd4b   :  { %6865 = vmatpush3.msra.mxu0 %v7471_v30 }
 0xd4c   :  { %6866 = vmatprep.subr.mxu0 %v8659_v49 }
 0xd4d   :  { %6867 = vmatpush3.msra.mxu0 %v7488_v36 }
 0xd4e   :  { %6868 = vmatprep.subr.mxu0 %v8659_v49 }
 0xd4f   :  { %6869 = vmatpush3.msra.mxu0 %v7505_v42 }
 0xd50   :  { %6892 = vmatprep.subr.mxu0 %v8659_v49 }
 0xdd4   :  { %v4008_v33 = vpop.f32.mrf.mxu1 }
 0xdd6   :  { %v6777_v39 = vpop.f32.mrf.mxu1 }
 0xddc   :  { %v3897_v43 = vpop.f32.mrf.mxu0 }
 0xddd   :  { %v3898_v59 = vadd.f32 %v8194_v51, %v3897_v43 }
 0xdde   :  { %v6758_v44 = vpop.f32.mrf.mxu0 }
 0xddf   :  { %v4009_v60 = vadd.f32 %v4008_v33, %v3898_v59 }
 0xde4   :  { %v4177_v34 = vpop.f32.mrf.mxu1 }
 0xde6   :  { %v6815_v56 = vpop.f32.mrf.mxu1 }
 0xded   :  { %v4096_v21 = vpop.f32.mrf.mxu0 }
 0xdee   :  { %v4097_v8 = vadd.f32 %v4096_v21, %v4009_v60 }
 0xdef   :  { %v6796_v58 = vpop.f32.mrf.mxu0 }
 0xdf0   :  { %v4178_v37 = vadd.f32 %v4177_v34, %v4097_v8  ;;  %v4392_v58 = vld [vmem:[#allocation2 + $0x30] sm:$0xff] }
 0xdf6   :  { %v4351_v55 = vpop.f32.mrf.mxu1 }
 0xdf8   :  { %v6853_v57 = vpop.f32.mrf.mxu1 }
 0xdfe   :  { %v4272_v45 = vpop.f32.mrf.mxu0 }
 0xdff   :  { %v4273_v61 = vadd.f32 %v4272_v45, %v4178_v37 }
 0xe00   :  { %v6834_v54 = vpop.f32.mrf.mxu0 }
 0xe01   :  { %v4352_v15 = vadd.f32 %v4351_v55, %v4273_v61 }
 0xe03   :  { %4362 = vrot.lane.b32.xlu0 %v4352_v15, %s7204_s27  ;;  %v5576_v52 = vmul.f32 -1.442695, %v4352_v15 }
 0xe05   :  { %7137 = vpow2.f32 %v5576_v52 }
 0xe12   :  { %v7138_v48 = vpop.eup %7137 }
 0xe13   :  { %v4358_v63 = vadd.f32 1.0, %v7138_v48 }
 0xe15   :  { %7139 = vrcp.f32 %v4358_v63 }
 0xe22   :  { %v7140_v22 = vpop.eup %7139 }
 0xe23   :  { %v4372_v43 = vsub.f32 1.0, %v7140_v22  ;;  %v4378_v34 = vmul.f32 %v7140_v22, %v8201_v0 }
 0xe75   :  { %v4363_v53 = vpop.permute.xlu0 %4362 }
 0xe76   :  { %v4365_v29 = vmul.f32 %v7140_v22, %v4363_v53 }
 0xe78   :  { %4367 = vrot.lane.b32.xlu1 %v4365_v29, %s7207_s10 }
 0xeea   :  { %v4368_v24 = vpop.permute.xlu1 %4367 }
 0xeeb   :  { %v4370_v33 = vadd.f32 %v4368_v24, %v4352_v15 }
 0xeed   :  { %7141 = vtanh.f32 %v4370_v33 }
 0xefa   :  { %v7142_v39 = vpop.eup %7141 }
 0xefb   :  { %4374 = vrot.lane.b32.xlu0 %v7142_v39, %s7208_s11 }
 0xf6d   :  { %v4375_v44 = vpop.permute.xlu0 %4374 }
 0xf6e   :  { %v4377_v56 = vmul.f32 %v4375_v44, %v4372_v43 }
 0xf70   :  { %v8325_v21 = vadd.f32 %v4378_v34, %v4377_v56 }
 0xf72   :  { %v4393_v59 = vsel %vm65_vm1, %v4392_v58, %v8325_v21 }
 0xf73   :  { %v4395_v55 = vsel %vm910_vm3, %v4393_v59, 0 }
 0xf74   :  { %v8330_v60 = vand.u32 4294901760, %v4395_v55 }
 0xf76   :  { %6890 = vmatmul.mubr.f32.vlgmr.msra.gmra.mxu1 %v8330_v60  ;;  %v4471_v57 = vsub.f32 %v4395_v55, %v8330_v60 }
 0xf77   :  { %6912 = vmatpush3.msra.mxu1 %v7426_v4  ;;  %6927 = vmatprep.mubr.msk.f32.mxu1 %vm7206_vm2, %v8659_v49 }
 0xf78   :  { %6913 = vmatprep.subr.mxu1 %v8659_v49  ;;  %v4472_v8 = vand.u32 4294901760, %v4471_v57 }
 0xf79   :  { %6914 = vmatpush3.msra.mxu1 %v7431_v10 }
 0xf7a   :  { %6915 = vmatprep.subr.mxu1 %v8659_v49  ;;  %v4473_v37 = vsub.f32 %v4471_v57, %v4472_v8 }
 0xf7b   :  { %6916 = vmatpush3.msra.mxu1 %v7439_v14 }
 0xf7c   :  { %6917 = vmatprep.subr.mxu1 %v8659_v49  ;;  %v4474_v45 = vand.u32 4294901760, %v4473_v37 }
 0xf7d   :  { %6918 = vmatpush3.msra.mxu1 %v7449_v19 }
 0xf7e   :  { %6919 = vmatprep.subr.mxu1 %v8659_v49  ;;  %6871 = vmatmul.mubr.f32.vlgmr.msra.gmra.mxu0 %v4474_v45 }
 0xf7f   :  { %6893 = vmatpush3.msra.mxu0 %v7429_v9  ;;  %6920 = vmatpush3.msra.mxu1 %v7463_v26 }
 0xf80   :  { %6894 = vmatprep.subr.mxu0 %v8659_v49  ;;  %6921 = vmatprep.subr.mxu1 %v8659_v49 }
 0xf81   :  { %6895 = vmatpush3.msra.mxu0 %v7437_v13  ;;  %6922 = vmatpush3.msra.mxu1 %v7471_v30 }
 0xf82   :  { %6896 = vmatprep.subr.mxu0 %v8659_v49  ;;  %6923 = vmatprep.subr.mxu1 %v8659_v49 }
 0xf83   :  { %6897 = vmatpush3.msra.mxu0 %v7447_v18  ;;  %6924 = vmatpush3.msra.mxu1 %v7488_v36 }
 0xf84   :  { %6898 = vmatprep.subr.mxu0 %v8659_v49  ;;  %6925 = vmatprep.subr.mxu1 %v8659_v49 }
 0xf85   :  { %6899 = vmatpush3.msra.mxu0 %v7460_v25  ;;  %6926 = vmatpush3.msra.mxu1 %v7505_v42 }
 0xf86   :  { %6900 = vmatprep.subr.mxu0 %v8659_v49  ;;  %6928 = vmatmul.mubr.f32.vlgmr.msra.gmra.mxu1 %v4472_v8 }
 0xf87   :  { %6949 = vmatprep.subr.mxu1 %v8659_v49  ;;  %6901 = vmatpush3.msra.mxu0 %v7478_v32 }
 0xf88   :  { %6950 = vmatpush3.msra.mxu1 %v7426_v4  ;;  %6902 = vmatprep.subr.mxu0 %v8659_v49 }
 0xf89   :  { %6951 = vmatprep.subr.mxu1 %v8659_v49  ;;  %6903 = vmatpush3.msra.mxu0 %v7486_v35 }
 0xf8a   :  { %6952 = vmatpush3.msra.mxu1 %v7431_v10  ;;  %6904 = vmatprep.subr.mxu0 %v8659_v49 }
 0xf8b   :  { %6953 = vmatprep.subr.mxu1 %v8659_v49  ;;  %6905 = vmatpush3.msra.mxu0 %v7503_v41 }
 0xf8c   :  { %6954 = vmatpush3.msra.mxu1 %v7439_v14  ;;  %6906 = vmatprep.subr.mxu0 %v8659_v49 }
 0xf8d   :  { %6955 = vmatprep.subr.mxu1 %v8659_v49  ;;  %6907 = vmatpush3.msra.mxu0 %v7520_v47 }
 0xf8e   :  { %6908 = vmatprep.mubr.msk.f32.mxu0 %vm7206_vm2, %v8659_v49  ;;  %6956 = vmatpush3.msra.mxu1 %v7449_v19 }
 0xf8f   :  { %6909 = vmatmul.mubr.f32.vlgmr.msra.gmra.mxu0 %v4471_v57  ;;  %6930 = vmatprep.subr.mxu0 %v8659_v49 }
 0xf90   :  { %6957 = vmatprep.subr.mxu1 %v8659_v49  ;;  %6931 = vmatpush3.msra.mxu0 %v7434_v12 }
 0xf91   :  { %6958 = vmatpush3.msra.mxu1 %v7463_v26  ;;  %6932 = vmatprep.subr.mxu0 %v8659_v49 }
 0xf92   :  { %6959 = vmatprep.subr.mxu1 %v8659_v49  ;;  %6933 = vmatpush3.msra.mxu0 %v8660_v1 }
 0xf93   :  { %6960 = vmatpush3.msra.mxu1 %v7471_v30  ;;  %6934 = vmatprep.subr.mxu0 %v8659_v49 }
 0xf94   :  { %6961 = vmatprep.subr.mxu1 %v8659_v49  ;;  %6935 = vmatpush3.msra.mxu0 %v8661_v28 }
 0xf95   :  { %6962 = vmatpush3.msra.mxu1 %v7488_v36  ;;  %6936 = vmatprep.subr.mxu0 %v8659_v49 }
 0xf96   :  { %6963 = vmatprep.subr.mxu1 %v8659_v49  ;;  %6937 = vmatpush3.msra.mxu0 %v8662_v40 }
 0xf97   :  { %6964 = vmatpush3.msra.mxu1 %v7505_v42  ;;  %6965 = vmatprep.mubr.msk.f32.mxu1 %vm7206_vm2, %v8659_v49 }
 0xf98   :  { %6938 = vmatprep.subr.mxu0 %v8659_v49  ;;  %6966 = vmatmul.mubr.f32.vlgmr.msra.gmra.mxu1 %v8330_v60 }
 0xf99   :  { %6939 = vmatpush3.msra.mxu0 %v8663_v38  ;;  %6946 = vmatprep.mubr.msk.f32.mxu0 %vm7206_vm2, %v8659_v49 }
 0xf9a   :  { %6940 = vmatprep.subr.mxu0 %v8659_v49  ;;  %6987 = vmatprep.subr.mxu1 %v8659_v49 }
 0xf9b   :  { %6941 = vmatpush3.msra.mxu0 %v8664_v46  ;;  %6988 = vmatpush3.msra.mxu1 %v8665_v31 }
 0xf9c   :  { %6942 = vmatprep.subr.mxu0 %v8659_v49  ;;  %6989 = vmatprep.subr.mxu1 %v8659_v49 }
 0xf9d   :  { %6943 = vmatpush3.msra.mxu0 %v8666_v2  ;;  %6990 = vmatpush3.msra.mxu1 %v8667_v5 }
 0xf9e   :  { %6944 = vmatprep.subr.mxu0 %v8659_v49  ;;  %6991 = vmatprep.subr.mxu1 %v8659_v49 }
 0xf9f   :  { %6945 = vmatpush3.msra.mxu0 %v8668_v6  ;;  %6992 = vmatpush3.msra.mxu1 %v8669_v11 }
 0xfa0   :  { %6947 = vmatmul.mubr.f32.vlgmr.msra.gmra.mxu0 %v8330_v60  ;;  %6993 = vmatprep.subr.mxu1 %v8659_v49 }
 0xfa1   :  { %6994 = vmatpush3.msra.mxu1 %v8670_v16  ;;  %6968 = vmatprep.subr.mxu0 %v8659_v49 }
 0xfa2   :  { %6995 = vmatprep.subr.mxu1 %v8659_v49  ;;  %6969 = vmatpush3.msra.mxu0 %v7426_v4 }
 0xfa3   :  { %6996 = vmatpush3.msra.mxu1 %v8671_v23  ;;  %6970 = vmatprep.subr.mxu0 %v8659_v49 }
 0xfa4   :  { %6997 = vmatprep.subr.mxu1 %v8659_v49  ;;  %6971 = vmatpush3.msra.mxu0 %v7431_v10 }
 0xfa5   :  { %6998 = vmatpush3.msra.mxu1 %v8672_v7  ;;  %6972 = vmatprep.subr.mxu0 %v8659_v49 }
 0xfa6   :  { %6999 = vmatprep.subr.mxu1 %v8659_v49  ;;  %6973 = vmatpush3.msra.mxu0 %v7439_v14 }
 0xfa7   :  { %7000 = vmatpush3.msra.mxu1 %v8673_v20  ;;  %6974 = vmatprep.subr.mxu0 %v8659_v49 }
 0xfa8   :  { %7001 = vmatprep.subr.mxu1 %v8659_v49  ;;  %6975 = vmatpush3.msra.mxu0 %v7449_v19 }
 0xfa9   :  { %7002 = vmatpush3.msra.mxu1 %v8674_v17  ;;  %6976 = vmatprep.subr.mxu0 %v8659_v49 }
 0xfaa   :  { %7003 = vmatprep.mubr.msk.f32.mxu1 %vm7206_vm2, %v8659_v49  ;;  %7025 = vmatprep.subr.mxu1 %v8659_v49 }
 0xfab   :  { %6977 = vmatpush3.msra.mxu0 %v7463_v26  ;;  %6984 = vmatprep.mubr.msk.f32.mxu0 %vm7206_vm2, %v8659_v49 }
 0xfac   :  { %6978 = vmatprep.subr.mxu0 %v8659_v49 }
 0xfad   :  { %6979 = vmatpush3.msra.mxu0 %v7471_v30 }
 0xfae   :  { %6980 = vmatprep.subr.mxu0 %v8659_v49 }
 0xfaf   :  { %6981 = vmatpush3.msra.mxu0 %v7488_v36 }
 0xfb0   :  { %6982 = vmatprep.subr.mxu0 %v8659_v49 }
 0xfb1   :  { %6983 = vmatpush3.msra.mxu0 %v7505_v42 }
 0xfb2   :  { %7006 = vmatprep.subr.mxu0 %v8659_v49 }
0x1036   :  { %v4587_v31 = vpop.f32.mrf.mxu1 }
0x1038   :  { %v6891_v5 = vpop.f32.mrf.mxu1 }
0x103e   :  { %v4476_v11 = vpop.f32.mrf.mxu0 }
0x103f   :  { %v4477_v61 = vadd.f32 %v8194_v51, %v4476_v11 }
0x1040   :  { %v6872_v16 = vpop.f32.mrf.mxu0 }
0x1041   :  { %v4588_v15 = vadd.f32 %v4587_v31, %v4477_v61  ;;  %v4971_v31 = vld [vmem:[#allocation2 + $0x38] sm:$0xff] }
0x1046   :  { %v4756_v23 = vpop.f32.mrf.mxu1 }
0x1048   :  { %v6929_v7 = vpop.f32.mrf.mxu1 }
0x104f   :  { %v4675_v20 = vpop.f32.mrf.mxu0 }
0x1050   :  { %v4676_v48 = vadd.f32 %v4675_v20, %v4588_v15 }
0x1051   :  { %v6910_v17 = vpop.f32.mrf.mxu0 }
0x1052   :  { %v4757_v63 = vadd.f32 %v4756_v23, %v4676_v48 }
0x1058   :  { %v4930_v54 = vpop.f32.mrf.mxu1 }
0x105a   :  { %v6967_v52 = vpop.f32.mrf.mxu1 }
0x1060   :  { %v4851_v22 = vpop.f32.mrf.mxu0 }
0x1061   :  { %v4852_v53 = vadd.f32 %v4851_v22, %v4757_v63 }
0x1062   :  { %v6948_v29 = vpop.f32.mrf.mxu0 }
0x1063   :  { %v4931_v24 = vadd.f32 %v4930_v54, %v4852_v53 }
0x1065   :  { %4941 = vrot.lane.b32.xlu1 %v4931_v24, %s7204_s27  ;;  %v5578_v33 = vmul.f32 -1.442695, %v4931_v24 }
0x1067   :  { %7143 = vpow2.f32 %v5578_v33 }
0x1074   :  { %v7144_v39 = vpop.eup %7143 }
0x1075   :  { %v4937_v43 = vadd.f32 1.0, %v7144_v39 }
0x1077   :  { %7145 = vrcp.f32 %v4937_v43 }
0x1084   :  { %v7146_v44 = vpop.eup %7145 }
0x1085   :  { %v4951_v60 = vsub.f32 1.0, %v7146_v44  ;;  %v4957_v8 = vmul.f32 %v7146_v44, %v8325_v21 }
0x10d7   :  { %v4942_v34 = vpop.permute.xlu1 %4941 }
0x10d8   :  { %v4944_v56 = vmul.f32 %v7146_v44, %v4942_v34 }
0x10da   :  { %4946 = vrot.lane.b32.xlu0 %v4944_v56, %s7207_s10 }
0x114c   :  { %v4947_v58 = vpop.permute.xlu0 %4946 }
0x114d   :  { %v4949_v59 = vadd.f32 %v4947_v58, %v4931_v24 }
0x114f   :  { %7147 = vtanh.f32 %v4949_v59 }
0x115c   :  { %v7148_v55 = vpop.eup %7147 }
0x115d   :  { %4953 = vrot.lane.b32.xlu1 %v7148_v55, %s7208_s11 }
0x11cf   :  { %v4954_v57 = vpop.permute.xlu1 %4953 }
0x11d0   :  { %v4956_v37 = vmul.f32 %v4954_v57, %v4951_v60 }
0x11d2   :  { %v8449_v45 = vadd.f32 %v4957_v8, %v4956_v37 }
0x11d4   :  { %v4972_v5 = vsel %vm65_vm1, %v4971_v31, %v8449_v45 }
0x11d5   :  { %v4974_v11 = vsel %vm910_vm3, %v4972_v5, 0 }
0x11d6   :  { %v8454_v16 = vand.u32 4294901760, %v4974_v11 }
0x11d8   :  { %7004 = vmatmul.mubr.f32.vlgmr.msra.gmra.mxu1 %v8454_v16  ;;  %v5050_v23 = vsub.f32 %v4974_v11, %v8454_v16 }
0x11d9   :  { %7026 = vmatpush3.msra.mxu1 %v7426_v4  ;;  %7041 = vmatprep.mubr.msk.f32.mxu1 %vm7206_vm2, %v8659_v49 }
0x11da   :  { %7027 = vmatprep.subr.mxu1 %v8659_v49  ;;  %v5051_v7 = vand.u32 4294901760, %v5050_v23 }
0x11db   :  { %7028 = vmatpush3.msra.mxu1 %v7431_v10 }
0x11dc   :  { %7029 = vmatprep.subr.mxu1 %v8659_v49  ;;  %v5052_v20 = vsub.f32 %v5050_v23, %v5051_v7 }
0x11dd   :  { %7030 = vmatpush3.msra.mxu1 %v7439_v14 }
0x11de   :  { %7031 = vmatprep.subr.mxu1 %v8659_v49  ;;  %v5053_v17 = vand.u32 4294901760, %v5052_v20 }
0x11df   :  { %7032 = vmatpush3.msra.mxu1 %v7449_v19 }
0x11e0   :  { %7033 = vmatprep.subr.mxu1 %v8659_v49  ;;  %6985 = vmatmul.mubr.f32.vlgmr.msra.gmra.mxu0 %v5053_v17 }
0x11e1   :  { %7007 = vmatpush3.msra.mxu0 %v7429_v9  ;;  %7034 = vmatpush3.msra.mxu1 %v7463_v26 }
0x11e2   :  { %7008 = vmatprep.subr.mxu0 %v8659_v49  ;;  %7035 = vmatprep.subr.mxu1 %v8659_v49 }
0x11e3   :  { %7009 = vmatpush3.msra.mxu0 %v7437_v13  ;;  %7036 = vmatpush3.msra.mxu1 %v7471_v30 }
0x11e4   :  { %7010 = vmatprep.subr.mxu0 %v8659_v49  ;;  %7037 = vmatprep.subr.mxu1 %v8659_v49 }
0x11e5   :  { %7011 = vmatpush3.msra.mxu0 %v7447_v18  ;;  %7038 = vmatpush3.msra.mxu1 %v7488_v36 }
0x11e6   :  { %7012 = vmatprep.subr.mxu0 %v8659_v49  ;;  %7039 = vmatprep.subr.mxu1 %v8659_v49 }
0x11e7   :  { %7013 = vmatpush3.msra.mxu0 %v7460_v25  ;;  %7040 = vmatpush3.msra.mxu1 %v7505_v42 }
0x11e8   :  { %7014 = vmatprep.subr.mxu0 %v8659_v49  ;;  %7042 = vmatmul.mubr.f32.vlgmr.msra.gmra.mxu1 %v5051_v7 }
0x11e9   :  { %7063 = vmatprep.subr.mxu1 %v8659_v49  ;;  %7015 = vmatpush3.msra.mxu0 %v7478_v32 }
0x11ea   :  { %7064 = vmatpush3.msra.mxu1 %v7426_v4  ;;  %7016 = vmatprep.subr.mxu0 %v8659_v49 }
0x11eb   :  { %7065 = vmatprep.subr.mxu1 %v8659_v49  ;;  %7017 = vmatpush3.msra.mxu0 %v7486_v35 }
0x11ec   :  { %7066 = vmatpush3.msra.mxu1 %v7431_v10  ;;  %7018 = vmatprep.subr.mxu0 %v8659_v49 }
0x11ed   :  { %7067 = vmatprep.subr.mxu1 %v8659_v49  ;;  %7019 = vmatpush3.msra.mxu0 %v7503_v41 }
0x11ee   :  { %7068 = vmatpush3.msra.mxu1 %v7439_v14  ;;  %7020 = vmatprep.subr.mxu0 %v8659_v49 }
0x11ef   :  { %7069 = vmatprep.subr.mxu1 %v8659_v49  ;;  %7021 = vmatpush3.msra.mxu0 %v7520_v47 }
0x11f0   :  { %7022 = vmatprep.mubr.msk.f32.mxu0 %vm7206_vm2, %v8659_v49  ;;  %7070 = vmatpush3.msra.mxu1 %v7449_v19 }
0x11f1   :  { %7023 = vmatmul.mubr.f32.vlgmr.msra.gmra.mxu0 %v5050_v23  ;;  %7044 = vmatprep.subr.mxu0 %v8659_v49 }
0x11f2   :  { %7071 = vmatprep.subr.mxu1 %v8659_v49  ;;  %7045 = vmatpush3.msra.mxu0 %v7434_v12 }
0x11f3   :  { %7072 = vmatpush3.msra.mxu1 %v7463_v26  ;;  %7046 = vmatprep.subr.mxu0 %v8659_v49 }
0x11f4   :  { %7073 = vmatprep.subr.mxu1 %v8659_v49  ;;  %7047 = vmatpush3.msra.mxu0 %v8660_v1  ;;  %v5567_v1 = vld [vmem:[%s8608_s6] ss:$0 sm:$0xff] }
0x11f5   :  { %7074 = vmatpush3.msra.mxu1 %v7471_v30  ;;  %7048 = vmatprep.subr.mxu0 %v8659_v49 }
0x11f6   :  { %7075 = vmatprep.subr.mxu1 %v8659_v49  ;;  %7049 = vmatpush3.msra.mxu0 %v8661_v28 }
0x11f7   :  { %7076 = vmatpush3.msra.mxu1 %v7488_v36  ;;  %7050 = vmatprep.subr.mxu0 %v8659_v49 }
0x11f8   :  { %7077 = vmatprep.subr.mxu1 %v8659_v49  ;;  %7051 = vmatpush3.msra.mxu0 %v8662_v40 }
0x11f9   :  { %7078 = vmatpush3.msra.mxu1 %v7505_v42  ;;  %7079 = vmatprep.mubr.msk.f32.mxu1 %vm7206_vm2, %v8659_v49 }
0x11fa   :  { %7052 = vmatprep.subr.mxu0 %v8659_v49  ;;  %7080 = vmatmul.mubr.f32.vlgmr.msra.gmra.mxu1 %v8454_v16 }
0x11fb   :  { %7053 = vmatpush3.msra.mxu0 %v8663_v38  ;;  %7060 = vmatprep.mubr.msk.f32.mxu0 %vm7206_vm2, %v8659_v49 }
0x11fc   :  { %7054 = vmatprep.subr.mxu0 %v8659_v49 }
0x11fd   :  { %7055 = vmatpush3.msra.mxu0 %v8664_v46 }
0x11fe   :  { %7056 = vmatprep.subr.mxu0 %v8659_v49 }
0x11ff   :  { %7057 = vmatpush3.msra.mxu0 %v8666_v2 }
0x1200   :  { %7058 = vmatprep.subr.mxu0 %v8659_v49 }
0x1201   :  { %7059 = vmatpush3.msra.mxu0 %v8668_v6 }
0x1202   :  { %7061 = vmatmul.mubr.f32.vlgmr.msra.gmra.mxu0 %v8454_v16 }
0x1298   :  { %v5166_v4 = vpop.f32.mrf.mxu1 }
0x129a   :  { %v7005_v9 = vpop.f32.mrf.mxu1 }
0x12a0   :  { %v5055_v10 = vpop.f32.mrf.mxu0 }
0x12a1   :  { %v5056_v25 = vadd.f32 %v8194_v51, %v5055_v10 }
0x12a2   :  { %v6986_v12 = vpop.f32.mrf.mxu0 }
0x12a3   :  { %v5167_v30 = vadd.f32 %v5166_v4, %v5056_v25 }
0x12a8   :  { %v5335_v13 = vpop.f32.mrf.mxu1 }
0x12aa   :  { %v7043_v14 = vpop.f32.mrf.mxu1 }
0x12b1   :  { %v5254_v18 = vpop.f32.mrf.mxu0 }
0x12b2   :  { %v5255_v35 = vadd.f32 %v5254_v18, %v5167_v30 }
0x12b3   :  { %v7024_v19 = vpop.f32.mrf.mxu0 }
0x12b4   :  { %v5336_v36 = vadd.f32 %v5335_v13, %v5255_v35 }
0x12ba   :  { %v5509_v26 = vpop.f32.mrf.mxu1 }
0x12bc   :  { %v7081_v32 = vpop.f32.mrf.mxu1 }
0x12c2   :  { %v5430_v41 = vpop.f32.mrf.mxu0 }
0x12c3   :  { %v5431_v42 = vadd.f32 %v5430_v41, %v5336_v36 }
0x12c4   :  { %v7062_v47 = vpop.f32.mrf.mxu0 }
0x12c5   :  { %v5510_v49 = vadd.f32 %v5509_v26, %v5431_v42 }
0x12c7   :  { %5520 = vrot.lane.b32.xlu0 %v5510_v49, %s7204_s27  ;;  %v5580_v28 = vmul.f32 -1.442695, %v5510_v49 }
0x12c9   :  { %7149 = vpow2.f32 %v5580_v28 }
0x12cb   :  { %1481 = vrot.lane.b32.xlu0 %v5567_v1, %s7204_s27 }
0x12d6   :  { %v7150_v40 = vpop.eup %7149 }
0x12d7   :  { %v5516_v38 = vadd.f32 1.0, %v7150_v40 }
0x12d9   :  { %7151 = vrcp.f32 %v5516_v38 }
0x12e6   :  { %v7152_v46 = vpop.eup %7151 }
0x12e7   :  { %v5530_v59 = vsub.f32 1.0, %v7152_v46  ;;  %v5536_v57 = vmul.f32 %v7152_v46, %v8449_v45 }
0x1339   :  { %v5521_v2 = vpop.permute.xlu0 %5520 }
0x133a   :  { %v5523_v6 = vmul.f32 %v7152_v46, %v5521_v2 }
0x133c   :  { %5525 = vrot.lane.b32.xlu1 %v5523_v6, %s7207_s10 }
0x133d   :  { %v1482_v51 = vpop.permute.xlu0 %1481 }
0x133e   :  { %v1484_v61 = vmul.f32 %v1482_v51, %v7700_v3  ;;  %v2064_v54 = vmul.f32 %v7824_v27, %v1482_v51  ;;  %v2643_v3 = vmul.f32 %v7948_v50, %v1482_v51  ;;  %v1492_v27 = vstv %s8609_s7 }
0x133f   :  { %v3222_v34 = vmul.f32 %v8072_v62, %v1482_v51  ;;  %v3801_v56 = vmul.f32 %v8201_v0, %v1482_v51  ;;  %v4380_v60 = vmul.f32 %v8325_v21, %v1482_v51  ;;  %v4959_v37 = vmul.f32 %v8449_v45, %v1482_v51 }
0x1340   :  { %1486 = vrot.lane.b32.xlu1 %v1484_v61, %s7208_s11 }
0x1344   :  { %2066 = vrot.lane.b32.xlu1 %v2064_v54, %s7208_s11 }
0x13ae   :  { %v5526_v15 = vpop.permute.xlu1 %5525 }
0x13af   :  { %v5528_v22 = vadd.f32 %v5526_v15, %v5510_v49 }
0x13b1   :  { %7153 = vtanh.f32 %v5528_v22 }
0x13b2   :  { %v1487_v52 = vpop.permute.xlu1 %1486 }
0x13b3   :  { %v1489_v48 = vsel %vm65_vm1, %v1487_v52, 0.0 }
0x13b4   :  { %1490 = vadd.xlane.f32.xlu0 %v1489_v48 }
0x13b6   :  { %v2067_v63 = vpop.permute.xlu1 %2066 }
0x13b7   :  { %v2069_v53 = vsel %vm65_vm1, %v2067_v63, 0.0 }
0x13b8   :  { %2070 = vadd.xlane.f32.xlu1 %v2069_v53 }
0x13be   :  { %v7154_v29 = vpop.eup %7153 }
0x13c9   :  { %5532 = vrot.lane.b32.xlu1 %v7154_v29, %s7208_s11 }
0x13ca   :  { %2645 = vrot.lane.b32.xlu0 %v2643_v3, %s7208_s11 }
0x143d   :  { %v1491_v24 = vpop.xlane.xlu0 %1490 }
0x143e   :  { %v1493_v33 = vadd.f32 %v1492_v27, %v1491_v24 }
0x1440   :  { %1495 = vst.msk [vmem:[%s8610_s8] sm:$0xff] %vm1494_vm4, %v1493_v33 }
0x1441   :  { %v2646_v39 = vpop.permute.xlu0 %2645  ;;  %v2071_v43 = vpop.xlane.xlu1 %2070 }
0x1442   :  { %v2072_v44 = vadd.f32 %v2071_v43, %v1492_v27  ;;  %v2648_v50 = vsel %vm65_vm1, %v2646_v39, 0.0 }
0x1443   :  { %2649 = vadd.xlane.f32.xlu1 %v2648_v50 }
0x1444   :  { %5569 = vst.msk [vmem:[%s8610_s8 + $0x8] sm:$0xff] %vm1494_vm4, %v2072_v44 }
0x1445   :  { %v5533_v58 = vpop.permute.xlu1 %5532 }
0x1446   :  { %v5535_v55 = vmul.f32 %v5533_v58, %v5530_v59 }
0x1448   :  { %v5537_v8 = vadd.f32 %v5536_v57, %v5535_v55 }
0x144a   :  { %v5538_v62 = vmul.f32 %v5537_v8, %v1482_v51 }
0x1454   :  { %3224 = vrot.lane.b32.xlu1 %v3222_v34, %s7208_s11 }
0x1458   :  { %3803 = vrot.lane.b32.xlu1 %v3801_v56, %s7208_s11 }
0x145c   :  { %4382 = vrot.lane.b32.xlu1 %v4380_v60, %s7208_s11 }
0x1460   :  { %4961 = vrot.lane.b32.xlu1 %v4959_v37, %s7208_s11 }
0x1464   :  { %5540 = vrot.lane.b32.xlu1 %v5538_v62, %s7208_s11 }
0x14cc   :  { %v2650_v0 = vpop.xlane.xlu1 %2649 }
0x14cd   :  { %v2651_v31 = vadd.f32 %v2650_v0, %v1492_v27 }
0x14cf   :  { %5571 = vst.msk [vmem:[%s8610_s8 + $0x10] sm:$0xff] %vm1494_vm4, %v2651_v31 }
0x14d0   :  { %v3225_v21 = vpop.permute.xlu1 %3224 }
0x14d1   :  { %v3227_v5 = vsel %vm65_vm1, %v3225_v21, 0.0 }
0x14d2   :  { %3228 = vadd.xlane.f32.xlu0 %v3227_v5 }
0x14d4   :  { %v3804_v11 = vpop.permute.xlu1 %3803 }
0x14d5   :  { %v3806_v16 = vsel %vm65_vm1, %v3804_v11, 0.0 }
0x14d6   :  { %3807 = vadd.xlane.f32.xlu1 %v3806_v16 }
0x14d8   :  { %v4383_v45 = vpop.permute.xlu1 %4382 }
0x14d9   :  { %v4385_v23 = vsel %vm65_vm1, %v4383_v45, 0.0 }
0x14da   :  { %4386 = vadd.xlane.f32.xlu0 %v4385_v23 }
0x14dc   :  { %v4962_v7 = vpop.permute.xlu1 %4961 }
0x14dd   :  { %v4964_v20 = vsel %vm65_vm1, %v4962_v7, 0.0 }
0x14de   :  { %4965 = vadd.xlane.f32.xlu0 %v4964_v20 }
0x14e0   :  { %v5541_v17 = vpop.permute.xlu1 %5540 }
0x14e1   :  { %v5543_v4 = vsel %vm65_vm1, %v5541_v17, 0.0 }
0x14e2   :  { %5544 = vadd.xlane.f32.xlu0 %v5543_v4 }
0x14f8   :  { %5550 = vrot.lane.b32.xlu0 %v5537_v8, %s7208_s11 }
0x155b   :  { %v3229_v9 = vpop.xlane.xlu0 %3228 }
0x155c   :  { %v3230_v10 = vadd.f32 %v3229_v9, %v1492_v27 }
0x155e   :  { %5573 = vst.msk [vmem:[%s8610_s8 + $0x18] sm:$0xff] %vm1494_vm4, %v3230_v10 }
0x155f   :  { %v3808_v12 = vpop.xlane.xlu1 %3807 }
0x1560   :  { %v3809_v13 = vadd.f32 %v3808_v12, %v1492_v27 }
0x1562   :  { %5575 = vst.msk [vmem:[%s8610_s8 + $0x20] sm:$0xff] %vm1494_vm4, %v3809_v13 }
0x1563   :  { %v4387_v14 = vpop.xlane.xlu0 %4386 }
0x1564   :  { %v4388_v18 = vadd.f32 %v4387_v14, %v1492_v27 }
0x1566   :  { %5577 = vst.msk [vmem:[%s8610_s8 + $0x28] sm:$0xff] %vm1494_vm4, %v4388_v18 }
0x1567   :  { %v4966_v19 = vpop.xlane.xlu0 %4965 }
0x1568   :  { %v4967_v25 = vadd.f32 %v4966_v19, %v1492_v27 }
0x156a   :  { %5579 = vst.msk [vmem:[%s8610_s8 + $0x30] sm:$0xff] %vm1494_vm4, %v4967_v25 }
0x156b   :  { %v5545_v26 = vpop.xlane.xlu0 %5544 }
0x156c   :  { %v5546_v30 = vadd.f32 %v5545_v26, %v1492_v27 }
0x156e   :  { %5581 = vst.msk [vmem:[%s8610_s8 + $0x38] sm:$0xff] %vm1494_vm4, %v5546_v30 }
0x156f   :  { %v5551_v32 = vpop.permute.xlu0 %5550 }
0x1570   :  { %5553 = vst.msk [vmem:[%s8611_s9] sm:$0xff] %vm65_vm1, %v5551_v32 }
0x1571   :  { %5562 = vsyncpa [#allocation5], 1 }
0x1572   :  { %5563 = vsyncpa [#allocation7], 1 }

</bundles_post_ra>
